<compile_context>
chip_gen: v5e
topology: v5e:2x2
jax: 0.10.0
libtpu: 0.0.40
codegen_flags: <defaults>
</compile_context>

<pallas_src>
import functools

import jax
import jax.numpy as jnp
import numpy as np
from jax.experimental import pallas as pl
from jax.experimental.pallas import tpu as pltpu

KH = KW = 3   # 3x3 conv, stride 1, padding 1
LANES = 128


def _default_plane_dtype():
    """bf16 planes where the VPU has bf16 ALUs (v6e/v7x); f32 elsewhere (v5e)."""
    try:
        kind = jax.devices()[0].device_kind.lower()
    except Exception:
        return jnp.float32
    if any(tag in kind for tag in ("v6", "v7", "7x")):
        return jnp.bfloat16
    return jnp.float32


def _flat_shift(x2d, s, lane_idx, wrap_is_masked=False):
    """y[p] = x_flat[(p + s) mod size] for the row-major flattened view of x2d (rows, 128).

    Implemented with lane rolls + a one-row sublane roll and a lane-index select,
    so no unaligned slices are generated.  Wrapped positions are always masked out
    by the caller (they correspond to out-of-image taps).

    If `wrap_is_masked` is True and |s| < 128, the caller guarantees that every
    lane that wraps across the 128-lane boundary is zeroed by its border mask,
    so only the single lane roll is emitted (no sublane roll, no select).
    """
    if s == 0:
        return x2d
    rows = x2d.shape[0]
    if s > 0:
        q, rem = divmod(s, LANES)
        a = pltpu.roll(x2d, (-rem) % LANES, axis=1) if rem else x2d
        if wrap_is_masked and q == 0:
            return a                               # wrapped lanes are masked by caller
        lo = pltpu.roll(a, (-q) % rows, axis=0) if (q % rows) else a
        if rem == 0:
            return lo
        hi_shift = (-(q + 1)) % rows
        hi = pltpu.roll(a, hi_shift, axis=0) if hi_shift else a
        return jnp.where(lane_idx < LANES - rem, lo, hi)
    t = -s
    q, rem = divmod(t, LANES)
    a = pltpu.roll(x2d, rem, axis=1) if rem else x2d
    if wrap_is_masked and q == 0:
        return a
    lo = pltpu.roll(a, q % rows, axis=0) if (q % rows) else a
    if rem == 0:
        return lo
    hi_shift = (q + 1) % rows
    hi = pltpu.roll(a, hi_shift, axis=0) if hi_shift else a
    return jnp.where(lane_idx >= rem, lo, hi)


def conv3x3_kernel(x_ref, w_ref, b_ref, o_ref, *, H, W, cin, cout, bt):
    # x_ref: (bt, cin, R, 128)  VMEM   (R = H*W // 128, row-major flattened planes)
    # w_ref: (cout*cin*9,)      SMEM   (OIHW flattened, f32)
    # b_ref: (cout,)            SMEM   (f32)
    # o_ref: (bt, cout, R, 128) VMEM   (f32)
    R = x_ref.shape[2]

    lane = jax.lax.broadcasted_iota(jnp.int32, (R, LANES), 1)
    row = jax.lax.broadcasted_iota(jnp.int32, (R, LANES), 0)

    # "aligned" => each 128-lane row holds an integer number of image rows
    # (W divides 128), so column index depends only on the lane.
    aligned = (LANES % W == 0)
    if aligned:
        j = (lane & (W - 1)) if (W & (W - 1) == 0) else (lane % W)
        top_ok = jnp.logical_or(row > 0, lane >= W)          # source row i-1 exists
        lim = (H - 1) * W
        rq, rl = divmod(lim, LANES)
        if rl == 0:
            bot_ok = row < rq                                # source row i+1 exists
        else:
            bot_ok = jnp.logical_or(row < rq,
                                    jnp.logical_and(row == rq, lane < rl))
    else:
        p = row * LANES + lane                               # flattened pixel index i*W + j
        j = p % W
        top_ok = p >= W
        bot_ok = p < (H - 1) * W
    left_ok = j != 0                                         # source col j-1 exists
    right_ok = j != (W - 1)                                  # source col j+1 exists

    # Python-level tap table (center tap handled separately in the accumulator init).
    taps = []
    for kh in range(KH):
        dy = kh - 1
        for kw in range(KW):
            dx = kw - 1
            if dy == 0 and dx == 0:
                continue
            s = dy * W + dx
            mask = None
            if dy == -1:
                mask = top_ok
            elif dy == 1:
                mask = bot_ok
            if dx == -1:
                mask = left_ok if mask is None else jnp.logical_and(mask, left_ok)
            elif dx == 1:
                mask = right_ok if mask is None else jnp.logical_and(mask, right_ok)
            # dy == 0, dx == +-1: lane-wrap positions are exactly the border columns
            # zeroed by left_ok/right_ok (requires W | 128) -> skip sublane roll + select.
            wrap_masked = aligned and (dy == 0)
            taps.append((kh, kw, s, mask, wrap_masked))

    ctr = (KH // 2) * KW + (KW // 2)                         # flat index of center weight

    def compute_one(bi):
        planes = [x_ref[bi, ci].astype(jnp.float32) for ci in range(cin)]

        # Accumulator init = center tap (ci=0) + bias: no zero materialization.
        acc = [planes[0] * w_ref[(co * cin) * (KH * KW) + ctr] + b_ref[co]
               for co in range(cout)]
        for ci in range(1, cin):
            for co in range(cout):
                acc[co] = acc[co] + planes[ci] * w_ref[(co * cin + ci) * (KH * KW) + ctr]

        # Remaining 8 taps.
        for (kh, kw, s, mask, wrap_masked) in taps:
            for ci in range(cin):
                sh = _flat_shift(planes[ci], s, lane, wrap_is_masked=wrap_masked)
                sh = jnp.where(mask, sh, 0.0)
                for co in range(cout):
                    w = w_ref[(co * cin + ci) * (KH * KW) + kh * KW + kw]
                    acc[co] = acc[co] + sh * w

        for co in range(cout):
            o_ref[bi, co] = acc[co]

    if bt == 1:
        compute_one(0)
    else:
        # fori_loop (not a Python for): bounds live ranges for the unrolled 81-tap body.
        def body(bi, carry):
            compute_one(bi)
            return carry
        jax.lax.fori_loop(0, bt, body, None)


def conv2d_same_pallas(x_nchw, w_oihw, bias, *, batch_tile=8, plane_dtype=None):
    """3x3 stride-1 'same' conv. x_nchw: (N, Cin, H, W) -> (N, Cout, H, W) f32."""
    N, cin, H, W = x_nchw.shape
    cout = w_oihw.shape[0]
    HW = H * W
    if HW % LANES != 0:
        raise NotImplementedError("H*W must be a multiple of 128 for this kernel")
    R = HW // LANES

    if plane_dtype is None:
        plane_dtype = _default_plane_dtype()

    # Batch blocking: Bt images per grid step to amortize per-step overhead.
    bt = max(1, min(int(batch_tile), N))
    n_blocks = -(-N // bt)
    n_pad = n_blocks * bt

    # Free reshape (contiguous); cast planes to the compute-plane dtype.
    x_r = x_nchw.reshape(N, cin, R, LANES).astype(plane_dtype)
    if n_pad != N:
        x_r = jnp.pad(x_r, ((0, n_pad - N), (0, 0), (0, 0), (0, 0)))
    w_flat = w_oihw.astype(jnp.float32).reshape(-1)          # (cout*cin*9,)
    b_flat = bias.astype(jnp.float32).reshape(-1)            # (cout,)

    # VMEM guard: whole-image blocks, double-buffered on input and output.
    in_bytes = bt * cin * HW * jnp.dtype(plane_dtype).itemsize
    out_bytes = bt * cout * HW * 4
    resident = 2 * (in_bytes + out_bytes)
    if resident > 48 * 1024 * 1024:
        # TODO(synk): tile R (with a 1-row halo) before reusing at large H*W on v7x (64 MiB VMEM).
        raise NotImplementedError("block too large for VMEM; reduce batch_tile or tile R")
    vmem_limit = int(min(max(resident + (2 << 20), 16 << 20), 64 << 20))

    kernel = functools.partial(conv3x3_kernel, H=H, W=W, cin=cin, cout=cout, bt=bt)

    # TODO(synk): for N == 1 on v7x, a second "parallel" grid axis splitting R
    # (with a 1-lane-row halo) would give the second TensorCore work; at 64x64
    # the win is bounded by per-step overhead, so it is omitted here.
    out = pl.pallas_call(
        kernel,
        out_shape=jax.ShapeDtypeStruct((n_pad, cout, R, LANES), jnp.float32),
        grid=(n_blocks,),
        in_specs=[
            pl.BlockSpec((bt, cin, R, LANES), lambda n: (n, 0, 0, 0)),
            pl.BlockSpec(memory_space=pltpu.MemorySpace.SMEM),
            pl.BlockSpec(memory_space=pltpu.MemorySpace.SMEM),
        ],
        out_specs=pl.BlockSpec((bt, cout, R, LANES), lambda n: (n, 0, 0, 0)),
        compiler_params=pltpu.CompilerParams(
            dimension_semantics=("parallel",),
            vmem_limit_bytes=vmem_limit),
    )(x_r, w_flat, b_flat)

    return out[:N].reshape(N, cout, H, W)


def init_params(key, cin=3, cout=3):
    # Deterministic init (PyTorch-style uniform fan-in scaling).
    k1, k2 = jax.random.split(key)
    fan_in = cin * KH * KW
    bound = 1.0 / np.sqrt(fan_in)
    w = jax.random.uniform(k1, (cout, cin, KH, KW), jnp.float32, -bound, bound)
    b = jax.random.uniform(k2, (cout,), jnp.float32, -bound, bound)
    return w, b


def conv2d_reference(x, w, b, plane_dtype):
    # Reference on the same plane-dtype-rounded input, accumulated in f32.
    x32 = x.astype(plane_dtype).astype(jnp.float32)
    ref = jax.lax.conv_general_dilated(
        x32, w.astype(jnp.float32), window_strides=(1, 1),
        padding=((1, 1), (1, 1)),
        dimension_numbers=("NCHW", "OIHW", "NCHW"))
    return ref + b.astype(jnp.float32)[None, :, None, None]


if __name__ == "__main__":
    key = jax.random.PRNGKey(0)
    kx1, kx2, kp = jax.random.split(key, 3)

    w, b = init_params(kp, cin=3, cout=3)
    plane_dtype = _default_plane_dtype()

    # Shape implied by the module: x1 = (1, 3, 64, 64), Conv2d(3, 3, 3, 1, 1).
    x1 = jax.random.normal(kx1, (1, 3, 64, 64), jnp.float32)
    out1 = jax.block_until_ready(conv2d_same_pallas(x1, w, b, plane_dtype=plane_dtype))
    ref1 = jax.block_until_ready(conv2d_reference(x1, w, b, plane_dtype))
    assert out1.shape == (1, 3, 64, 64)
    np.testing.assert_allclose(np.asarray(out1), np.asarray(ref1), rtol=1e-5, atol=1e-5)

    # Batched case: exercises the in-kernel sub-batch loop, batch padding and grid > 1.
    x2 = jax.random.normal(kx2, (5, 3, 64, 64), jnp.float32)
    out2 = jax.block_until_ready(
        conv2d_same_pallas(x2, w, b, batch_tile=2, plane_dtype=plane_dtype))
    ref2 = jax.block_until_ready(conv2d_reference(x2, w, b, plane_dtype))
    assert out2.shape == (5, 3, 64, 64)
    np.testing.assert_allclose(np.asarray(out2), np.asarray(ref2), rtol=1e-5, atol=1e-5)

    print("KERNEL_OK")
</pallas_src>

<mosaic_0001>
module attributes {stable_mosaic.version = 11 : i64} {
  func.func @conv3x3_kernel(%arg0: i32, %arg1: memref<1x3x32x128xf32, #tpu.memory_space<vmem>>, %arg2: memref<81xf32, #tpu.memory_space<smem>>, %arg3: memref<3xf32, #tpu.memory_space<smem>>, %arg4: memref<1x3x32x128xf32, #tpu.memory_space<vmem>>) attributes {dimension_semantics = [#tpu.dimension_semantics<parallel>], iteration_bounds = array<i64: 1>, scalar_prefetch = 0 : i64, scratch_operands = 0 : i64, tpu.core_type = #tpu.core_type<tc>, window_params = [{transform_indices = @transform_0, window_bounds = array<i64: 1, 3, 32, 128>}, {transform_indices = @transform_1, window_bounds = array<i64: 81>}, {transform_indices = @transform_2, window_bounds = array<i64: 3>}, {transform_indices = @transform_3, window_bounds = array<i64: 1, 3, 32, 128>}]} {
    %0 = tpu.iota {dimensions = array<i32: 1>} : vector<32x128xi32>
    %1 = tpu.iota {dimensions = array<i32: 0>} : vector<32x128xi32>
    %c63_i32 = arith.constant 63 : i32
    %2 = vector.broadcast %c63_i32 : i32 to vector<32x128xi32>
    %3 = arith.andi %0, %2 : vector<32x128xi32>
    %c0_i32 = arith.constant 0 : i32
    %4 = vector.broadcast %c0_i32 : i32 to vector<32x128xi32>
    %5 = arith.cmpi sgt, %1, %4 : vector<32x128xi32>
    %c64_i32 = arith.constant 64 : i32
    %6 = vector.broadcast %c64_i32 : i32 to vector<32x128xi32>
    %7 = arith.cmpi sge, %0, %6 : vector<32x128xi32>
    %8 = arith.ori %5, %7 : vector<32x128xi1>
    %c31_i32 = arith.constant 31 : i32
    %9 = vector.broadcast %c31_i32 : i32 to vector<32x128xi32>
    %10 = arith.cmpi slt, %1, %9 : vector<32x128xi32>
    %c31_i32_0 = arith.constant 31 : i32
    %11 = vector.broadcast %c31_i32_0 : i32 to vector<32x128xi32>
    %12 = arith.cmpi eq, %1, %11 : vector<32x128xi32>
    %c64_i32_1 = arith.constant 64 : i32
    %13 = vector.broadcast %c64_i32_1 : i32 to vector<32x128xi32>
    %14 = arith.cmpi slt, %0, %13 : vector<32x128xi32>
    %15 = arith.andi %12, %14 : vector<32x128xi1>
    %16 = arith.ori %10, %15 : vector<32x128xi1>
    %c0_i32_2 = arith.constant 0 : i32
    %17 = vector.broadcast %c0_i32_2 : i32 to vector<32x128xi32>
    %18 = arith.cmpi ne, %3, %17 : vector<32x128xi32>
    %c63_i32_3 = arith.constant 63 : i32
    %19 = vector.broadcast %c63_i32_3 : i32 to vector<32x128xi32>
    %20 = arith.cmpi ne, %3, %19 : vector<32x128xi32>
    %21 = arith.andi %8, %18 : vector<32x128xi1>
    %22 = arith.andi %8, %20 : vector<32x128xi1>
    %23 = arith.andi %16, %18 : vector<32x128xi1>
    %24 = arith.andi %16, %20 : vector<32x128xi1>
    %c0 = arith.constant 0 : index
    %c0_4 = arith.constant 0 : index
    %c0_5 = arith.constant 0 : index
    %c0_6 = arith.constant 0 : index
    %25 = vector.load %arg1[%c0, %c0_4, %c0_5, %c0_6] : memref<1x3x32x128xf32, #tpu.memory_space<vmem>>, vector<1x1x32x128xf32>
    %26 = vector.shape_cast %25 : vector<1x1x32x128xf32> to vector<32x128xf32>
    %c0_7 = arith.constant 0 : index
    %c1 = arith.constant 1 : index
    %c0_8 = arith.constant 0 : index
    %c0_9 = arith.constant 0 : index
    %27 = vector.load %arg1[%c0_7, %c1, %c0_8, %c0_9] : memref<1x3x32x128xf32, #tpu.memory_space<vmem>>, vector<1x1x32x128xf32>
    %28 = vector.shape_cast %27 : vector<1x1x32x128xf32> to vector<32x128xf32>
    %c0_10 = arith.constant 0 : index
    %c2 = arith.constant 2 : index
    %c0_11 = arith.constant 0 : index
    %c0_12 = arith.constant 0 : index
    %29 = vector.load %arg1[%c0_10, %c2, %c0_11, %c0_12] : memref<1x3x32x128xf32, #tpu.memory_space<vmem>>, vector<1x1x32x128xf32>
    %30 = vector.shape_cast %29 : vector<1x1x32x128xf32> to vector<32x128xf32>
    %c4 = arith.constant 4 : index
    %31 = memref.load %arg2[%c4] : memref<81xf32, #tpu.memory_space<smem>>
    %32 = vector.broadcast %31 : f32 to vector<32x128xf32>
    %33 = arith.mulf %26, %32 : vector<32x128xf32>
    %c0_13 = arith.constant 0 : index
    %34 = memref.load %arg3[%c0_13] : memref<3xf32, #tpu.memory_space<smem>>
    %35 = vector.broadcast %34 : f32 to vector<32x128xf32>
    %36 = arith.addf %33, %35 : vector<32x128xf32>
    %c31 = arith.constant 31 : index
    %37 = memref.load %arg2[%c31] : memref<81xf32, #tpu.memory_space<smem>>
    %38 = vector.broadcast %37 : f32 to vector<32x128xf32>
    %39 = arith.mulf %26, %38 : vector<32x128xf32>
    %c1_14 = arith.constant 1 : index
    %40 = memref.load %arg3[%c1_14] : memref<3xf32, #tpu.memory_space<smem>>
    %41 = vector.broadcast %40 : f32 to vector<32x128xf32>
    %42 = arith.addf %39, %41 : vector<32x128xf32>
    %c58 = arith.constant 58 : index
    %43 = memref.load %arg2[%c58] : memref<81xf32, #tpu.memory_space<smem>>
    %44 = vector.broadcast %43 : f32 to vector<32x128xf32>
    %45 = arith.mulf %26, %44 : vector<32x128xf32>
    %c2_15 = arith.constant 2 : index
    %46 = memref.load %arg3[%c2_15] : memref<3xf32, #tpu.memory_space<smem>>
    %47 = vector.broadcast %46 : f32 to vector<32x128xf32>
    %48 = arith.addf %45, %47 : vector<32x128xf32>
    %c13 = arith.constant 13 : index
    %49 = memref.load %arg2[%c13] : memref<81xf32, #tpu.memory_space<smem>>
    %50 = vector.broadcast %49 : f32 to vector<32x128xf32>
    %51 = arith.mulf %28, %50 : vector<32x128xf32>
    %52 = arith.addf %36, %51 : vector<32x128xf32>
    %c40 = arith.constant 40 : index
    %53 = memref.load %arg2[%c40] : memref<81xf32, #tpu.memory_space<smem>>
    %54 = vector.broadcast %53 : f32 to vector<32x128xf32>
    %55 = arith.mulf %28, %54 : vector<32x128xf32>
    %56 = arith.addf %42, %55 : vector<32x128xf32>
    %c67 = arith.constant 67 : index
    %57 = memref.load %arg2[%c67] : memref<81xf32, #tpu.memory_space<smem>>
    %58 = vector.broadcast %57 : f32 to vector<32x128xf32>
    %59 = arith.mulf %28, %58 : vector<32x128xf32>
    %60 = arith.addf %48, %59 : vector<32x128xf32>
    %c22 = arith.constant 22 : index
    %61 = memref.load %arg2[%c22] : memref<81xf32, #tpu.memory_space<smem>>
    %62 = vector.broadcast %61 : f32 to vector<32x128xf32>
    %63 = arith.mulf %30, %62 : vector<32x128xf32>
    %64 = arith.addf %52, %63 : vector<32x128xf32>
    %c49 = arith.constant 49 : index
    %65 = memref.load %arg2[%c49] : memref<81xf32, #tpu.memory_space<smem>>
    %66 = vector.broadcast %65 : f32 to vector<32x128xf32>
    %67 = arith.mulf %30, %66 : vector<32x128xf32>
    %68 = arith.addf %56, %67 : vector<32x128xf32>
    %c76 = arith.constant 76 : index
    %69 = memref.load %arg2[%c76] : memref<81xf32, #tpu.memory_space<smem>>
    %70 = vector.broadcast %69 : f32 to vector<32x128xf32>
    %71 = arith.mulf %30, %70 : vector<32x128xf32>
    %72 = arith.addf %60, %71 : vector<32x128xf32>
    %c65_i32 = arith.constant 65 : i32
    %73 = tpu.dynamic_rotate %26 by %c65_i32 dim 1 : vector<32x128xf32>, i32 -> vector<32x128xf32>
    %c1_i32 = arith.constant 1 : i32
    %74 = tpu.dynamic_rotate %73 by %c1_i32 dim 0 : vector<32x128xf32>, i32 -> vector<32x128xf32>
    %c65_i32_16 = arith.constant 65 : i32
    %75 = vector.broadcast %c65_i32_16 : i32 to vector<32x128xi32>
    %76 = arith.cmpi sge, %0, %75 : vector<32x128xi32>
    %77 = arith.select %76, %73, %74 : vector<32x128xi1>, vector<32x128xf32>
    %cst = arith.constant 0.000000e+00 : f32
    %78 = vector.broadcast %cst : f32 to vector<32x128xf32>
    %79 = arith.select %21, %77, %78 : vector<32x128xi1>, vector<32x128xf32>
    %c0_17 = arith.constant 0 : index
    %80 = memref.load %arg2[%c0_17] : memref<81xf32, #tpu.memory_space<smem>>
    %81 = vector.broadcast %80 : f32 to vector<32x128xf32>
    %82 = arith.mulf %79, %81 : vector<32x128xf32>
    %83 = arith.addf %64, %82 : vector<32x128xf32>
    %c27 = arith.constant 27 : index
    %84 = memref.load %arg2[%c27] : memref<81xf32, #tpu.memory_space<smem>>
    %85 = vector.broadcast %84 : f32 to vector<32x128xf32>
    %86 = arith.mulf %79, %85 : vector<32x128xf32>
    %87 = arith.addf %68, %86 : vector<32x128xf32>
    %c54 = arith.constant 54 : index
    %88 = memref.load %arg2[%c54] : memref<81xf32, #tpu.memory_space<smem>>
    %89 = vector.broadcast %88 : f32 to vector<32x128xf32>
    %90 = arith.mulf %79, %89 : vector<32x128xf32>
    %91 = arith.addf %72, %90 : vector<32x128xf32>
    %c65_i32_18 = arith.constant 65 : i32
    %92 = tpu.dynamic_rotate %28 by %c65_i32_18 dim 1 : vector<32x128xf32>, i32 -> vector<32x128xf32>
    %c1_i32_19 = arith.constant 1 : i32
    %93 = tpu.dynamic_rotate %92 by %c1_i32_19 dim 0 : vector<32x128xf32>, i32 -> vector<32x128xf32>
    %c65_i32_20 = arith.constant 65 : i32
    %94 = vector.broadcast %c65_i32_20 : i32 to vector<32x128xi32>
    %95 = arith.cmpi sge, %0, %94 : vector<32x128xi32>
    %96 = arith.select %95, %92, %93 : vector<32x128xi1>, vector<32x128xf32>
    %cst_21 = arith.constant 0.000000e+00 : f32
    %97 = vector.broadcast %cst_21 : f32 to vector<32x128xf32>
    %98 = arith.select %21, %96, %97 : vector<32x128xi1>, vector<32x128xf32>
    %c9 = arith.constant 9 : index
    %99 = memref.load %arg2[%c9] : memref<81xf32, #tpu.memory_space<smem>>
    %100 = vector.broadcast %99 : f32 to vector<32x128xf32>
    %101 = arith.mulf %98, %100 : vector<32x128xf32>
    %102 = arith.addf %83, %101 : vector<32x128xf32>
    %c36 = arith.constant 36 : index
    %103 = memref.load %arg2[%c36] : memref<81xf32, #tpu.memory_space<smem>>
    %104 = vector.broadcast %103 : f32 to vector<32x128xf32>
    %105 = arith.mulf %98, %104 : vector<32x128xf32>
    %106 = arith.addf %87, %105 : vector<32x128xf32>
    %c63 = arith.constant 63 : index
    %107 = memref.load %arg2[%c63] : memref<81xf32, #tpu.memory_space<smem>>
    %108 = vector.broadcast %107 : f32 to vector<32x128xf32>
    %109 = arith.mulf %98, %108 : vector<32x128xf32>
    %110 = arith.addf %91, %109 : vector<32x128xf32>
    %c65_i32_22 = arith.constant 65 : i32
    %111 = tpu.dynamic_rotate %30 by %c65_i32_22 dim 1 : vector<32x128xf32>, i32 -> vector<32x128xf32>
    %c1_i32_23 = arith.constant 1 : i32
    %112 = tpu.dynamic_rotate %111 by %c1_i32_23 dim 0 : vector<32x128xf32>, i32 -> vector<32x128xf32>
    %c65_i32_24 = arith.constant 65 : i32
    %113 = vector.broadcast %c65_i32_24 : i32 to vector<32x128xi32>
    %114 = arith.cmpi sge, %0, %113 : vector<32x128xi32>
    %115 = arith.select %114, %111, %112 : vector<32x128xi1>, vector<32x128xf32>
    %cst_25 = arith.constant 0.000000e+00 : f32
    %116 = vector.broadcast %cst_25 : f32 to vector<32x128xf32>
    %117 = arith.select %21, %115, %116 : vector<32x128xi1>, vector<32x128xf32>
    %c18 = arith.constant 18 : index
    %118 = memref.load %arg2[%c18] : memref<81xf32, #tpu.memory_space<smem>>
    %119 = vector.broadcast %118 : f32 to vector<32x128xf32>
    %120 = arith.mulf %117, %119 : vector<32x128xf32>
    %121 = arith.addf %102, %120 : vector<32x128xf32>
    %c45 = arith.constant 45 : index
    %122 = memref.load %arg2[%c45] : memref<81xf32, #tpu.memory_space<smem>>
    %123 = vector.broadcast %122 : f32 to vector<32x128xf32>
    %124 = arith.mulf %117, %123 : vector<32x128xf32>
    %125 = arith.addf %106, %124 : vector<32x128xf32>
    %c72 = arith.constant 72 : index
    %126 = memref.load %arg2[%c72] : memref<81xf32, #tpu.memory_space<smem>>
    %127 = vector.broadcast %126 : f32 to vector<32x128xf32>
    %128 = arith.mulf %117, %127 : vector<32x128xf32>
    %129 = arith.addf %110, %128 : vector<32x128xf32>
    %c64_i32_26 = arith.constant 64 : i32
    %130 = tpu.dynamic_rotate %26 by %c64_i32_26 dim 1 : vector<32x128xf32>, i32 -> vector<32x128xf32>
    %c1_i32_27 = arith.constant 1 : i32
    %131 = tpu.dynamic_rotate %130 by %c1_i32_27 dim 0 : vector<32x128xf32>, i32 -> vector<32x128xf32>
    %c64_i32_28 = arith.constant 64 : i32
    %132 = vector.broadcast %c64_i32_28 : i32 to vector<32x128xi32>
    %133 = arith.cmpi sge, %0, %132 : vector<32x128xi32>
    %134 = arith.select %133, %130, %131 : vector<32x128xi1>, vector<32x128xf32>
    %cst_29 = arith.constant 0.000000e+00 : f32
    %135 = vector.broadcast %cst_29 : f32 to vector<32x128xf32>
    %136 = arith.select %8, %134, %135 : vector<32x128xi1>, vector<32x128xf32>
    %c1_30 = arith.constant 1 : index
    %137 = memref.load %arg2[%c1_30] : memref<81xf32, #tpu.memory_space<smem>>
    %138 = vector.broadcast %137 : f32 to vector<32x128xf32>
    %139 = arith.mulf %136, %138 : vector<32x128xf32>
    %140 = arith.addf %121, %139 : vector<32x128xf32>
    %c28 = arith.constant 28 : index
    %141 = memref.load %arg2[%c28] : memref<81xf32, #tpu.memory_space<smem>>
    %142 = vector.broadcast %141 : f32 to vector<32x128xf32>
    %143 = arith.mulf %136, %142 : vector<32x128xf32>
    %144 = arith.addf %125, %143 : vector<32x128xf32>
    %c55 = arith.constant 55 : index
    %145 = memref.load %arg2[%c55] : memref<81xf32, #tpu.memory_space<smem>>
    %146 = vector.broadcast %145 : f32 to vector<32x128xf32>
    %147 = arith.mulf %136, %146 : vector<32x128xf32>
    %148 = arith.addf %129, %147 : vector<32x128xf32>
    %c64_i32_31 = arith.constant 64 : i32
    %149 = tpu.dynamic_rotate %28 by %c64_i32_31 dim 1 : vector<32x128xf32>, i32 -> vector<32x128xf32>
    %c1_i32_32 = arith.constant 1 : i32
    %150 = tpu.dynamic_rotate %149 by %c1_i32_32 dim 0 : vector<32x128xf32>, i32 -> vector<32x128xf32>
    %c64_i32_33 = arith.constant 64 : i32
    %151 = vector.broadcast %c64_i32_33 : i32 to vector<32x128xi32>
    %152 = arith.cmpi sge, %0, %151 : vector<32x128xi32>
    %153 = arith.select %152, %149, %150 : vector<32x128xi1>, vector<32x128xf32>
    %cst_34 = arith.constant 0.000000e+00 : f32
    %154 = vector.broadcast %cst_34 : f32 to vector<32x128xf32>
    %155 = arith.select %8, %153, %154 : vector<32x128xi1>, vector<32x128xf32>
    %c10 = arith.constant 10 : index
    %156 = memref.load %arg2[%c10] : memref<81xf32, #tpu.memory_space<smem>>
    %157 = vector.broadcast %156 : f32 to vector<32x128xf32>
    %158 = arith.mulf %155, %157 : vector<32x128xf32>
    %159 = arith.addf %140, %158 : vector<32x128xf32>
    %c37 = arith.constant 37 : index
    %160 = memref.load %arg2[%c37] : memref<81xf32, #tpu.memory_space<smem>>
    %161 = vector.broadcast %160 : f32 to vector<32x128xf32>
    %162 = arith.mulf %155, %161 : vector<32x128xf32>
    %163 = arith.addf %144, %162 : vector<32x128xf32>
    %c64 = arith.constant 64 : index
    %164 = memref.load %arg2[%c64] : memref<81xf32, #tpu.memory_space<smem>>
    %165 = vector.broadcast %164 : f32 to vector<32x128xf32>
    %166 = arith.mulf %155, %165 : vector<32x128xf32>
    %167 = arith.addf %148, %166 : vector<32x128xf32>
    %c64_i32_35 = arith.constant 64 : i32
    %168 = tpu.dynamic_rotate %30 by %c64_i32_35 dim 1 : vector<32x128xf32>, i32 -> vector<32x128xf32>
    %c1_i32_36 = arith.constant 1 : i32
    %169 = tpu.dynamic_rotate %168 by %c1_i32_36 dim 0 : vector<32x128xf32>, i32 -> vector<32x128xf32>
    %c64_i32_37 = arith.constant 64 : i32
    %170 = vector.broadcast %c64_i32_37 : i32 to vector<32x128xi32>
    %171 = arith.cmpi sge, %0, %170 : vector<32x128xi32>
    %172 = arith.select %171, %168, %169 : vector<32x128xi1>, vector<32x128xf32>
    %cst_38 = arith.constant 0.000000e+00 : f32
    %173 = vector.broadcast %cst_38 : f32 to vector<32x128xf32>
    %174 = arith.select %8, %172, %173 : vector<32x128xi1>, vector<32x128xf32>
    %c19 = arith.constant 19 : index
    %175 = memref.load %arg2[%c19] : memref<81xf32, #tpu.memory_space<smem>>
    %176 = vector.broadcast %175 : f32 to vector<32x128xf32>
    %177 = arith.mulf %174, %176 : vector<32x128xf32>
    %178 = arith.addf %159, %177 : vector<32x128xf32>
    %c46 = arith.constant 46 : index
    %179 = memref.load %arg2[%c46] : memref<81xf32, #tpu.memory_space<smem>>
    %180 = vector.broadcast %179 : f32 to vector<32x128xf32>
    %181 = arith.mulf %174, %180 : vector<32x128xf32>
    %182 = arith.addf %163, %181 : vector<32x128xf32>
    %c73 = arith.constant 73 : index
    %183 = memref.load %arg2[%c73] : memref<81xf32, #tpu.memory_space<smem>>
    %184 = vector.broadcast %183 : f32 to vector<32x128xf32>
    %185 = arith.mulf %174, %184 : vector<32x128xf32>
    %186 = arith.addf %167, %185 : vector<32x128xf32>
    %c63_i32_39 = arith.constant 63 : i32
    %187 = tpu.dynamic_rotate %26 by %c63_i32_39 dim 1 : vector<32x128xf32>, i32 -> vector<32x128xf32>
    %c1_i32_40 = arith.constant 1 : i32
    %188 = tpu.dynamic_rotate %187 by %c1_i32_40 dim 0 : vector<32x128xf32>, i32 -> vector<32x128xf32>
    %c63_i32_41 = arith.constant 63 : i32
    %189 = vector.broadcast %c63_i32_41 : i32 to vector<32x128xi32>
    %190 = arith.cmpi sge, %0, %189 : vector<32x128xi32>
    %191 = arith.select %190, %187, %188 : vector<32x128xi1>, vector<32x128xf32>
    %cst_42 = arith.constant 0.000000e+00 : f32
    %192 = vector.broadcast %cst_42 : f32 to vector<32x128xf32>
    %193 = arith.select %22, %191, %192 : vector<32x128xi1>, vector<32x128xf32>
    %c2_43 = arith.constant 2 : index
    %194 = memref.load %arg2[%c2_43] : memref<81xf32, #tpu.memory_space<smem>>
    %195 = vector.broadcast %194 : f32 to vector<32x128xf32>
    %196 = arith.mulf %193, %195 : vector<32x128xf32>
    %197 = arith.addf %178, %196 : vector<32x128xf32>
    %c29 = arith.constant 29 : index
    %198 = memref.load %arg2[%c29] : memref<81xf32, #tpu.memory_space<smem>>
    %199 = vector.broadcast %198 : f32 to vector<32x128xf32>
    %200 = arith.mulf %193, %199 : vector<32x128xf32>
    %201 = arith.addf %182, %200 : vector<32x128xf32>
    %c56 = arith.constant 56 : index
    %202 = memref.load %arg2[%c56] : memref<81xf32, #tpu.memory_space<smem>>
    %203 = vector.broadcast %202 : f32 to vector<32x128xf32>
    %204 = arith.mulf %193, %203 : vector<32x128xf32>
    %205 = arith.addf %186, %204 : vector<32x128xf32>
    %c63_i32_44 = arith.constant 63 : i32
    %206 = tpu.dynamic_rotate %28 by %c63_i32_44 dim 1 : vector<32x128xf32>, i32 -> vector<32x128xf32>
    %c1_i32_45 = arith.constant 1 : i32
    %207 = tpu.dynamic_rotate %206 by %c1_i32_45 dim 0 : vector<32x128xf32>, i32 -> vector<32x128xf32>
    %c63_i32_46 = arith.constant 63 : i32
    %208 = vector.broadcast %c63_i32_46 : i32 to vector<32x128xi32>
    %209 = arith.cmpi sge, %0, %208 : vector<32x128xi32>
    %210 = arith.select %209, %206, %207 : vector<32x128xi1>, vector<32x128xf32>
    %cst_47 = arith.constant 0.000000e+00 : f32
    %211 = vector.broadcast %cst_47 : f32 to vector<32x128xf32>
    %212 = arith.select %22, %210, %211 : vector<32x128xi1>, vector<32x128xf32>
    %c11 = arith.constant 11 : index
    %213 = memref.load %arg2[%c11] : memref<81xf32, #tpu.memory_space<smem>>
    %214 = vector.broadcast %213 : f32 to vector<32x128xf32>
    %215 = arith.mulf %212, %214 : vector<32x128xf32>
    %216 = arith.addf %197, %215 : vector<32x128xf32>
    %c38 = arith.constant 38 : index
    %217 = memref.load %arg2[%c38] : memref<81xf32, #tpu.memory_space<smem>>
    %218 = vector.broadcast %217 : f32 to vector<32x128xf32>
    %219 = arith.mulf %212, %218 : vector<32x128xf32>
    %220 = arith.addf %201, %219 : vector<32x128xf32>
    %c65 = arith.constant 65 : index
    %221 = memref.load %arg2[%c65] : memref<81xf32, #tpu.memory_space<smem>>
    %222 = vector.broadcast %221 : f32 to vector<32x128xf32>
    %223 = arith.mulf %212, %222 : vector<32x128xf32>
    %224 = arith.addf %205, %223 : vector<32x128xf32>
    %c63_i32_48 = arith.constant 63 : i32
    %225 = tpu.dynamic_rotate %30 by %c63_i32_48 dim 1 : vector<32x128xf32>, i32 -> vector<32x128xf32>
    %c1_i32_49 = arith.constant 1 : i32
    %226 = tpu.dynamic_rotate %225 by %c1_i32_49 dim 0 : vector<32x128xf32>, i32 -> vector<32x128xf32>
    %c63_i32_50 = arith.constant 63 : i32
    %227 = vector.broadcast %c63_i32_50 : i32 to vector<32x128xi32>
    %228 = arith.cmpi sge, %0, %227 : vector<32x128xi32>
    %229 = arith.select %228, %225, %226 : vector<32x128xi1>, vector<32x128xf32>
    %cst_51 = arith.constant 0.000000e+00 : f32
    %230 = vector.broadcast %cst_51 : f32 to vector<32x128xf32>
    %231 = arith.select %22, %229, %230 : vector<32x128xi1>, vector<32x128xf32>
    %c20 = arith.constant 20 : index
    %232 = memref.load %arg2[%c20] : memref<81xf32, #tpu.memory_space<smem>>
    %233 = vector.broadcast %232 : f32 to vector<32x128xf32>
    %234 = arith.mulf %231, %233 : vector<32x128xf32>
    %235 = arith.addf %216, %234 : vector<32x128xf32>
    %c47 = arith.constant 47 : index
    %236 = memref.load %arg2[%c47] : memref<81xf32, #tpu.memory_space<smem>>
    %237 = vector.broadcast %236 : f32 to vector<32x128xf32>
    %238 = arith.mulf %231, %237 : vector<32x128xf32>
    %239 = arith.addf %220, %238 : vector<32x128xf32>
    %c74 = arith.constant 74 : index
    %240 = memref.load %arg2[%c74] : memref<81xf32, #tpu.memory_space<smem>>
    %241 = vector.broadcast %240 : f32 to vector<32x128xf32>
    %242 = arith.mulf %231, %241 : vector<32x128xf32>
    %243 = arith.addf %224, %242 : vector<32x128xf32>
    %c1_i32_52 = arith.constant 1 : i32
    %244 = tpu.dynamic_rotate %26 by %c1_i32_52 dim 1 : vector<32x128xf32>, i32 -> vector<32x128xf32>
    %cst_53 = arith.constant 0.000000e+00 : f32
    %245 = vector.broadcast %cst_53 : f32 to vector<32x128xf32>
    %246 = arith.select %18, %244, %245 : vector<32x128xi1>, vector<32x128xf32>
    %c3 = arith.constant 3 : index
    %247 = memref.load %arg2[%c3] : memref<81xf32, #tpu.memory_space<smem>>
    %248 = vector.broadcast %247 : f32 to vector<32x128xf32>
    %249 = arith.mulf %246, %248 : vector<32x128xf32>
    %250 = arith.addf %235, %249 : vector<32x128xf32>
    %c30 = arith.constant 30 : index
    %251 = memref.load %arg2[%c30] : memref<81xf32, #tpu.memory_space<smem>>
    %252 = vector.broadcast %251 : f32 to vector<32x128xf32>
    %253 = arith.mulf %246, %252 : vector<32x128xf32>
    %254 = arith.addf %239, %253 : vector<32x128xf32>
    %c57 = arith.constant 57 : index
    %255 = memref.load %arg2[%c57] : memref<81xf32, #tpu.memory_space<smem>>
    %256 = vector.broadcast %255 : f32 to vector<32x128xf32>
    %257 = arith.mulf %246, %256 : vector<32x128xf32>
    %258 = arith.addf %243, %257 : vector<32x128xf32>
    %c1_i32_54 = arith.constant 1 : i32
    %259 = tpu.dynamic_rotate %28 by %c1_i32_54 dim 1 : vector<32x128xf32>, i32 -> vector<32x128xf32>
    %cst_55 = arith.constant 0.000000e+00 : f32
    %260 = vector.broadcast %cst_55 : f32 to vector<32x128xf32>
    %261 = arith.select %18, %259, %260 : vector<32x128xi1>, vector<32x128xf32>
    %c12 = arith.constant 12 : index
    %262 = memref.load %arg2[%c12] : memref<81xf32, #tpu.memory_space<smem>>
    %263 = vector.broadcast %262 : f32 to vector<32x128xf32>
    %264 = arith.mulf %261, %263 : vector<32x128xf32>
    %265 = arith.addf %250, %264 : vector<32x128xf32>
    %c39 = arith.constant 39 : index
    %266 = memref.load %arg2[%c39] : memref<81xf32, #tpu.memory_space<smem>>
    %267 = vector.broadcast %266 : f32 to vector<32x128xf32>
    %268 = arith.mulf %261, %267 : vector<32x128xf32>
    %269 = arith.addf %254, %268 : vector<32x128xf32>
    %c66 = arith.constant 66 : index
    %270 = memref.load %arg2[%c66] : memref<81xf32, #tpu.memory_space<smem>>
    %271 = vector.broadcast %270 : f32 to vector<32x128xf32>
    %272 = arith.mulf %261, %271 : vector<32x128xf32>
    %273 = arith.addf %258, %272 : vector<32x128xf32>
    %c1_i32_56 = arith.constant 1 : i32
    %274 = tpu.dynamic_rotate %30 by %c1_i32_56 dim 1 : vector<32x128xf32>, i32 -> vector<32x128xf32>
    %cst_57 = arith.constant 0.000000e+00 : f32
    %275 = vector.broadcast %cst_57 : f32 to vector<32x128xf32>
    %276 = arith.select %18, %274, %275 : vector<32x128xi1>, vector<32x128xf32>
    %c21 = arith.constant 21 : index
    %277 = memref.load %arg2[%c21] : memref<81xf32, #tpu.memory_space<smem>>
    %278 = vector.broadcast %277 : f32 to vector<32x128xf32>
    %279 = arith.mulf %276, %278 : vector<32x128xf32>
    %280 = arith.addf %265, %279 : vector<32x128xf32>
    %c48 = arith.constant 48 : index
    %281 = memref.load %arg2[%c48] : memref<81xf32, #tpu.memory_space<smem>>
    %282 = vector.broadcast %281 : f32 to vector<32x128xf32>
    %283 = arith.mulf %276, %282 : vector<32x128xf32>
    %284 = arith.addf %269, %283 : vector<32x128xf32>
    %c75 = arith.constant 75 : index
    %285 = memref.load %arg2[%c75] : memref<81xf32, #tpu.memory_space<smem>>
    %286 = vector.broadcast %285 : f32 to vector<32x128xf32>
    %287 = arith.mulf %276, %286 : vector<32x128xf32>
    %288 = arith.addf %273, %287 : vector<32x128xf32>
    %c127_i32 = arith.constant 127 : i32
    %289 = tpu.dynamic_rotate %26 by %c127_i32 dim 1 : vector<32x128xf32>, i32 -> vector<32x128xf32>
    %cst_58 = arith.constant 0.000000e+00 : f32
    %290 = vector.broadcast %cst_58 : f32 to vector<32x128xf32>
    %291 = arith.select %20, %289, %290 : vector<32x128xi1>, vector<32x128xf32>
    %c5 = arith.constant 5 : index
    %292 = memref.load %arg2[%c5] : memref<81xf32, #tpu.memory_space<smem>>
    %293 = vector.broadcast %292 : f32 to vector<32x128xf32>
    %294 = arith.mulf %291, %293 : vector<32x128xf32>
    %295 = arith.addf %280, %294 : vector<32x128xf32>
    %c32 = arith.constant 32 : index
    %296 = memref.load %arg2[%c32] : memref<81xf32, #tpu.memory_space<smem>>
    %297 = vector.broadcast %296 : f32 to vector<32x128xf32>
    %298 = arith.mulf %291, %297 : vector<32x128xf32>
    %299 = arith.addf %284, %298 : vector<32x128xf32>
    %c59 = arith.constant 59 : index
    %300 = memref.load %arg2[%c59] : memref<81xf32, #tpu.memory_space<smem>>
    %301 = vector.broadcast %300 : f32 to vector<32x128xf32>
    %302 = arith.mulf %291, %301 : vector<32x128xf32>
    %303 = arith.addf %288, %302 : vector<32x128xf32>
    %c127_i32_59 = arith.constant 127 : i32
    %304 = tpu.dynamic_rotate %28 by %c127_i32_59 dim 1 : vector<32x128xf32>, i32 -> vector<32x128xf32>
    %cst_60 = arith.constant 0.000000e+00 : f32
    %305 = vector.broadcast %cst_60 : f32 to vector<32x128xf32>
    %306 = arith.select %20, %304, %305 : vector<32x128xi1>, vector<32x128xf32>
    %c14 = arith.constant 14 : index
    %307 = memref.load %arg2[%c14] : memref<81xf32, #tpu.memory_space<smem>>
    %308 = vector.broadcast %307 : f32 to vector<32x128xf32>
    %309 = arith.mulf %306, %308 : vector<32x128xf32>
    %310 = arith.addf %295, %309 : vector<32x128xf32>
    %c41 = arith.constant 41 : index
    %311 = memref.load %arg2[%c41] : memref<81xf32, #tpu.memory_space<smem>>
    %312 = vector.broadcast %311 : f32 to vector<32x128xf32>
    %313 = arith.mulf %306, %312 : vector<32x128xf32>
    %314 = arith.addf %299, %313 : vector<32x128xf32>
    %c68 = arith.constant 68 : index
    %315 = memref.load %arg2[%c68] : memref<81xf32, #tpu.memory_space<smem>>
    %316 = vector.broadcast %315 : f32 to vector<32x128xf32>
    %317 = arith.mulf %306, %316 : vector<32x128xf32>
    %318 = arith.addf %303, %317 : vector<32x128xf32>
    %c127_i32_61 = arith.constant 127 : i32
    %319 = tpu.dynamic_rotate %30 by %c127_i32_61 dim 1 : vector<32x128xf32>, i32 -> vector<32x128xf32>
    %cst_62 = arith.constant 0.000000e+00 : f32
    %320 = vector.broadcast %cst_62 : f32 to vector<32x128xf32>
    %321 = arith.select %20, %319, %320 : vector<32x128xi1>, vector<32x128xf32>
    %c23 = arith.constant 23 : index
    %322 = memref.load %arg2[%c23] : memref<81xf32, #tpu.memory_space<smem>>
    %323 = vector.broadcast %322 : f32 to vector<32x128xf32>
    %324 = arith.mulf %321, %323 : vector<32x128xf32>
    %325 = arith.addf %310, %324 : vector<32x128xf32>
    %c50 = arith.constant 50 : index
    %326 = memref.load %arg2[%c50] : memref<81xf32, #tpu.memory_space<smem>>
    %327 = vector.broadcast %326 : f32 to vector<32x128xf32>
    %328 = arith.mulf %321, %327 : vector<32x128xf32>
    %329 = arith.addf %314, %328 : vector<32x128xf32>
    %c77 = arith.constant 77 : index
    %330 = memref.load %arg2[%c77] : memref<81xf32, #tpu.memory_space<smem>>
    %331 = vector.broadcast %330 : f32 to vector<32x128xf32>
    %332 = arith.mulf %321, %331 : vector<32x128xf32>
    %333 = arith.addf %318, %332 : vector<32x128xf32>
    %c65_i32_63 = arith.constant 65 : i32
    %334 = tpu.dynamic_rotate %26 by %c65_i32_63 dim 1 : vector<32x128xf32>, i32 -> vector<32x128xf32>
    %c31_i32_64 = arith.constant 31 : i32
    %335 = tpu.dynamic_rotate %334 by %c31_i32_64 dim 0 : vector<32x128xf32>, i32 -> vector<32x128xf32>
    %c65_i32_65 = arith.constant 65 : i32
    %336 = vector.broadcast %c65_i32_65 : i32 to vector<32x128xi32>
    %337 = arith.cmpi slt, %0, %336 : vector<32x128xi32>
    %338 = arith.select %337, %334, %335 : vector<32x128xi1>, vector<32x128xf32>
    %cst_66 = arith.constant 0.000000e+00 : f32
    %339 = vector.broadcast %cst_66 : f32 to vector<32x128xf32>
    %340 = arith.select %23, %338, %339 : vector<32x128xi1>, vector<32x128xf32>
    %c6 = arith.constant 6 : index
    %341 = memref.load %arg2[%c6] : memref<81xf32, #tpu.memory_space<smem>>
    %342 = vector.broadcast %341 : f32 to vector<32x128xf32>
    %343 = arith.mulf %340, %342 : vector<32x128xf32>
    %344 = arith.addf %325, %343 : vector<32x128xf32>
    %c33 = arith.constant 33 : index
    %345 = memref.load %arg2[%c33] : memref<81xf32, #tpu.memory_space<smem>>
    %346 = vector.broadcast %345 : f32 to vector<32x128xf32>
    %347 = arith.mulf %340, %346 : vector<32x128xf32>
    %348 = arith.addf %329, %347 : vector<32x128xf32>
    %c60 = arith.constant 60 : index
    %349 = memref.load %arg2[%c60] : memref<81xf32, #tpu.memory_space<smem>>
    %350 = vector.broadcast %349 : f32 to vector<32x128xf32>
    %351 = arith.mulf %340, %350 : vector<32x128xf32>
    %352 = arith.addf %333, %351 : vector<32x128xf32>
    %c65_i32_67 = arith.constant 65 : i32
    %353 = tpu.dynamic_rotate %28 by %c65_i32_67 dim 1 : vector<32x128xf32>, i32 -> vector<32x128xf32>
    %c31_i32_68 = arith.constant 31 : i32
    %354 = tpu.dynamic_rotate %353 by %c31_i32_68 dim 0 : vector<32x128xf32>, i32 -> vector<32x128xf32>
    %c65_i32_69 = arith.constant 65 : i32
    %355 = vector.broadcast %c65_i32_69 : i32 to vector<32x128xi32>
    %356 = arith.cmpi slt, %0, %355 : vector<32x128xi32>
    %357 = arith.select %356, %353, %354 : vector<32x128xi1>, vector<32x128xf32>
    %cst_70 = arith.constant 0.000000e+00 : f32
    %358 = vector.broadcast %cst_70 : f32 to vector<32x128xf32>
    %359 = arith.select %23, %357, %358 : vector<32x128xi1>, vector<32x128xf32>
    %c15 = arith.constant 15 : index
    %360 = memref.load %arg2[%c15] : memref<81xf32, #tpu.memory_space<smem>>
    %361 = vector.broadcast %360 : f32 to vector<32x128xf32>
    %362 = arith.mulf %359, %361 : vector<32x128xf32>
    %363 = arith.addf %344, %362 : vector<32x128xf32>
    %c42 = arith.constant 42 : index
    %364 = memref.load %arg2[%c42] : memref<81xf32, #tpu.memory_space<smem>>
    %365 = vector.broadcast %364 : f32 to vector<32x128xf32>
    %366 = arith.mulf %359, %365 : vector<32x128xf32>
    %367 = arith.addf %348, %366 : vector<32x128xf32>
    %c69 = arith.constant 69 : index
    %368 = memref.load %arg2[%c69] : memref<81xf32, #tpu.memory_space<smem>>
    %369 = vector.broadcast %368 : f32 to vector<32x128xf32>
    %370 = arith.mulf %359, %369 : vector<32x128xf32>
    %371 = arith.addf %352, %370 : vector<32x128xf32>
    %c65_i32_71 = arith.constant 65 : i32
    %372 = tpu.dynamic_rotate %30 by %c65_i32_71 dim 1 : vector<32x128xf32>, i32 -> vector<32x128xf32>
    %c31_i32_72 = arith.constant 31 : i32
    %373 = tpu.dynamic_rotate %372 by %c31_i32_72 dim 0 : vector<32x128xf32>, i32 -> vector<32x128xf32>
    %c65_i32_73 = arith.constant 65 : i32
    %374 = vector.broadcast %c65_i32_73 : i32 to vector<32x128xi32>
    %375 = arith.cmpi slt, %0, %374 : vector<32x128xi32>
    %376 = arith.select %375, %372, %373 : vector<32x128xi1>, vector<32x128xf32>
    %cst_74 = arith.constant 0.000000e+00 : f32
    %377 = vector.broadcast %cst_74 : f32 to vector<32x128xf32>
    %378 = arith.select %23, %376, %377 : vector<32x128xi1>, vector<32x128xf32>
    %c24 = arith.constant 24 : index
    %379 = memref.load %arg2[%c24] : memref<81xf32, #tpu.memory_space<smem>>
    %380 = vector.broadcast %379 : f32 to vector<32x128xf32>
    %381 = arith.mulf %378, %380 : vector<32x128xf32>
    %382 = arith.addf %363, %381 : vector<32x128xf32>
    %c51 = arith.constant 51 : index
    %383 = memref.load %arg2[%c51] : memref<81xf32, #tpu.memory_space<smem>>
    %384 = vector.broadcast %383 : f32 to vector<32x128xf32>
    %385 = arith.mulf %378, %384 : vector<32x128xf32>
    %386 = arith.addf %367, %385 : vector<32x128xf32>
    %c78 = arith.constant 78 : index
    %387 = memref.load %arg2[%c78] : memref<81xf32, #tpu.memory_space<smem>>
    %388 = vector.broadcast %387 : f32 to vector<32x128xf32>
    %389 = arith.mulf %378, %388 : vector<32x128xf32>
    %390 = arith.addf %371, %389 : vector<32x128xf32>
    %c64_i32_75 = arith.constant 64 : i32
    %391 = tpu.dynamic_rotate %26 by %c64_i32_75 dim 1 : vector<32x128xf32>, i32 -> vector<32x128xf32>
    %c31_i32_76 = arith.constant 31 : i32
    %392 = tpu.dynamic_rotate %391 by %c31_i32_76 dim 0 : vector<32x128xf32>, i32 -> vector<32x128xf32>
    %c64_i32_77 = arith.constant 64 : i32
    %393 = vector.broadcast %c64_i32_77 : i32 to vector<32x128xi32>
    %394 = arith.cmpi slt, %0, %393 : vector<32x128xi32>
    %395 = arith.select %394, %391, %392 : vector<32x128xi1>, vector<32x128xf32>
    %cst_78 = arith.constant 0.000000e+00 : f32
    %396 = vector.broadcast %cst_78 : f32 to vector<32x128xf32>
    %397 = arith.select %16, %395, %396 : vector<32x128xi1>, vector<32x128xf32>
    %c7 = arith.constant 7 : index
    %398 = memref.load %arg2[%c7] : memref<81xf32, #tpu.memory_space<smem>>
    %399 = vector.broadcast %398 : f32 to vector<32x128xf32>
    %400 = arith.mulf %397, %399 : vector<32x128xf32>
    %401 = arith.addf %382, %400 : vector<32x128xf32>
    %c34 = arith.constant 34 : index
    %402 = memref.load %arg2[%c34] : memref<81xf32, #tpu.memory_space<smem>>
    %403 = vector.broadcast %402 : f32 to vector<32x128xf32>
    %404 = arith.mulf %397, %403 : vector<32x128xf32>
    %405 = arith.addf %386, %404 : vector<32x128xf32>
    %c61 = arith.constant 61 : index
    %406 = memref.load %arg2[%c61] : memref<81xf32, #tpu.memory_space<smem>>
    %407 = vector.broadcast %406 : f32 to vector<32x128xf32>
    %408 = arith.mulf %397, %407 : vector<32x128xf32>
    %409 = arith.addf %390, %408 : vector<32x128xf32>
    %c64_i32_79 = arith.constant 64 : i32
    %410 = tpu.dynamic_rotate %28 by %c64_i32_79 dim 1 : vector<32x128xf32>, i32 -> vector<32x128xf32>
    %c31_i32_80 = arith.constant 31 : i32
    %411 = tpu.dynamic_rotate %410 by %c31_i32_80 dim 0 : vector<32x128xf32>, i32 -> vector<32x128xf32>
    %c64_i32_81 = arith.constant 64 : i32
    %412 = vector.broadcast %c64_i32_81 : i32 to vector<32x128xi32>
    %413 = arith.cmpi slt, %0, %412 : vector<32x128xi32>
    %414 = arith.select %413, %410, %411 : vector<32x128xi1>, vector<32x128xf32>
    %cst_82 = arith.constant 0.000000e+00 : f32
    %415 = vector.broadcast %cst_82 : f32 to vector<32x128xf32>
    %416 = arith.select %16, %414, %415 : vector<32x128xi1>, vector<32x128xf32>
    %c16 = arith.constant 16 : index
    %417 = memref.load %arg2[%c16] : memref<81xf32, #tpu.memory_space<smem>>
    %418 = vector.broadcast %417 : f32 to vector<32x128xf32>
    %419 = arith.mulf %416, %418 : vector<32x128xf32>
    %420 = arith.addf %401, %419 : vector<32x128xf32>
    %c43 = arith.constant 43 : index
    %421 = memref.load %arg2[%c43] : memref<81xf32, #tpu.memory_space<smem>>
    %422 = vector.broadcast %421 : f32 to vector<32x128xf32>
    %423 = arith.mulf %416, %422 : vector<32x128xf32>
    %424 = arith.addf %405, %423 : vector<32x128xf32>
    %c70 = arith.constant 70 : index
    %425 = memref.load %arg2[%c70] : memref<81xf32, #tpu.memory_space<smem>>
    %426 = vector.broadcast %425 : f32 to vector<32x128xf32>
    %427 = arith.mulf %416, %426 : vector<32x128xf32>
    %428 = arith.addf %409, %427 : vector<32x128xf32>
    %c64_i32_83 = arith.constant 64 : i32
    %429 = tpu.dynamic_rotate %30 by %c64_i32_83 dim 1 : vector<32x128xf32>, i32 -> vector<32x128xf32>
    %c31_i32_84 = arith.constant 31 : i32
    %430 = tpu.dynamic_rotate %429 by %c31_i32_84 dim 0 : vector<32x128xf32>, i32 -> vector<32x128xf32>
    %c64_i32_85 = arith.constant 64 : i32
    %431 = vector.broadcast %c64_i32_85 : i32 to vector<32x128xi32>
    %432 = arith.cmpi slt, %0, %431 : vector<32x128xi32>
    %433 = arith.select %432, %429, %430 : vector<32x128xi1>, vector<32x128xf32>
    %cst_86 = arith.constant 0.000000e+00 : f32
    %434 = vector.broadcast %cst_86 : f32 to vector<32x128xf32>
    %435 = arith.select %16, %433, %434 : vector<32x128xi1>, vector<32x128xf32>
    %c25 = arith.constant 25 : index
    %436 = memref.load %arg2[%c25] : memref<81xf32, #tpu.memory_space<smem>>
    %437 = vector.broadcast %436 : f32 to vector<32x128xf32>
    %438 = arith.mulf %435, %437 : vector<32x128xf32>
    %439 = arith.addf %420, %438 : vector<32x128xf32>
    %c52 = arith.constant 52 : index
    %440 = memref.load %arg2[%c52] : memref<81xf32, #tpu.memory_space<smem>>
    %441 = vector.broadcast %440 : f32 to vector<32x128xf32>
    %442 = arith.mulf %435, %441 : vector<32x128xf32>
    %443 = arith.addf %424, %442 : vector<32x128xf32>
    %c79 = arith.constant 79 : index
    %444 = memref.load %arg2[%c79] : memref<81xf32, #tpu.memory_space<smem>>
    %445 = vector.broadcast %444 : f32 to vector<32x128xf32>
    %446 = arith.mulf %435, %445 : vector<32x128xf32>
    %447 = arith.addf %428, %446 : vector<32x128xf32>
    %c63_i32_87 = arith.constant 63 : i32
    %448 = tpu.dynamic_rotate %26 by %c63_i32_87 dim 1 : vector<32x128xf32>, i32 -> vector<32x128xf32>
    %c31_i32_88 = arith.constant 31 : i32
    %449 = tpu.dynamic_rotate %448 by %c31_i32_88 dim 0 : vector<32x128xf32>, i32 -> vector<32x128xf32>
    %c63_i32_89 = arith.constant 63 : i32
    %450 = vector.broadcast %c63_i32_89 : i32 to vector<32x128xi32>
    %451 = arith.cmpi slt, %0, %450 : vector<32x128xi32>
    %452 = arith.select %451, %448, %449 : vector<32x128xi1>, vector<32x128xf32>
    %cst_90 = arith.constant 0.000000e+00 : f32
    %453 = vector.broadcast %cst_90 : f32 to vector<32x128xf32>
    %454 = arith.select %24, %452, %453 : vector<32x128xi1>, vector<32x128xf32>
    %c8 = arith.constant 8 : index
    %455 = memref.load %arg2[%c8] : memref<81xf32, #tpu.memory_space<smem>>
    %456 = vector.broadcast %455 : f32 to vector<32x128xf32>
    %457 = arith.mulf %454, %456 : vector<32x128xf32>
    %458 = arith.addf %439, %457 : vector<32x128xf32>
    %c35 = arith.constant 35 : index
    %459 = memref.load %arg2[%c35] : memref<81xf32, #tpu.memory_space<smem>>
    %460 = vector.broadcast %459 : f32 to vector<32x128xf32>
    %461 = arith.mulf %454, %460 : vector<32x128xf32>
    %462 = arith.addf %443, %461 : vector<32x128xf32>
    %c62 = arith.constant 62 : index
    %463 = memref.load %arg2[%c62] : memref<81xf32, #tpu.memory_space<smem>>
    %464 = vector.broadcast %463 : f32 to vector<32x128xf32>
    %465 = arith.mulf %454, %464 : vector<32x128xf32>
    %466 = arith.addf %447, %465 : vector<32x128xf32>
    %c63_i32_91 = arith.constant 63 : i32
    %467 = tpu.dynamic_rotate %28 by %c63_i32_91 dim 1 : vector<32x128xf32>, i32 -> vector<32x128xf32>
    %c31_i32_92 = arith.constant 31 : i32
    %468 = tpu.dynamic_rotate %467 by %c31_i32_92 dim 0 : vector<32x128xf32>, i32 -> vector<32x128xf32>
    %c63_i32_93 = arith.constant 63 : i32
    %469 = vector.broadcast %c63_i32_93 : i32 to vector<32x128xi32>
    %470 = arith.cmpi slt, %0, %469 : vector<32x128xi32>
    %471 = arith.select %470, %467, %468 : vector<32x128xi1>, vector<32x128xf32>
    %cst_94 = arith.constant 0.000000e+00 : f32
    %472 = vector.broadcast %cst_94 : f32 to vector<32x128xf32>
    %473 = arith.select %24, %471, %472 : vector<32x128xi1>, vector<32x128xf32>
    %c17 = arith.constant 17 : index
    %474 = memref.load %arg2[%c17] : memref<81xf32, #tpu.memory_space<smem>>
    %475 = vector.broadcast %474 : f32 to vector<32x128xf32>
    %476 = arith.mulf %473, %475 : vector<32x128xf32>
    %477 = arith.addf %458, %476 : vector<32x128xf32>
    %c44 = arith.constant 44 : index
    %478 = memref.load %arg2[%c44] : memref<81xf32, #tpu.memory_space<smem>>
    %479 = vector.broadcast %478 : f32 to vector<32x128xf32>
    %480 = arith.mulf %473, %479 : vector<32x128xf32>
    %481 = arith.addf %462, %480 : vector<32x128xf32>
    %c71 = arith.constant 71 : index
    %482 = memref.load %arg2[%c71] : memref<81xf32, #tpu.memory_space<smem>>
    %483 = vector.broadcast %482 : f32 to vector<32x128xf32>
    %484 = arith.mulf %473, %483 : vector<32x128xf32>
    %485 = arith.addf %466, %484 : vector<32x128xf32>
    %c63_i32_95 = arith.constant 63 : i32
    %486 = tpu.dynamic_rotate %30 by %c63_i32_95 dim 1 : vector<32x128xf32>, i32 -> vector<32x128xf32>
    %c31_i32_96 = arith.constant 31 : i32
    %487 = tpu.dynamic_rotate %486 by %c31_i32_96 dim 0 : vector<32x128xf32>, i32 -> vector<32x128xf32>
    %c63_i32_97 = arith.constant 63 : i32
    %488 = vector.broadcast %c63_i32_97 : i32 to vector<32x128xi32>
    %489 = arith.cmpi slt, %0, %488 : vector<32x128xi32>
    %490 = arith.select %489, %486, %487 : vector<32x128xi1>, vector<32x128xf32>
    %cst_98 = arith.constant 0.000000e+00 : f32
    %491 = vector.broadcast %cst_98 : f32 to vector<32x128xf32>
    %492 = arith.select %24, %490, %491 : vector<32x128xi1>, vector<32x128xf32>
    %c26 = arith.constant 26 : index
    %493 = memref.load %arg2[%c26] : memref<81xf32, #tpu.memory_space<smem>>
    %494 = vector.broadcast %493 : f32 to vector<32x128xf32>
    %495 = arith.mulf %492, %494 : vector<32x128xf32>
    %496 = arith.addf %477, %495 : vector<32x128xf32>
    %c53 = arith.constant 53 : index
    %497 = memref.load %arg2[%c53] : memref<81xf32, #tpu.memory_space<smem>>
    %498 = vector.broadcast %497 : f32 to vector<32x128xf32>
    %499 = arith.mulf %492, %498 : vector<32x128xf32>
    %500 = arith.addf %481, %499 : vector<32x128xf32>
    %c80 = arith.constant 80 : index
    %501 = memref.load %arg2[%c80] : memref<81xf32, #tpu.memory_space<smem>>
    %502 = vector.broadcast %501 : f32 to vector<32x128xf32>
    %503 = arith.mulf %492, %502 : vector<32x128xf32>
    %504 = arith.addf %485, %503 : vector<32x128xf32>
    %c0_99 = arith.constant 0 : index
    %c0_100 = arith.constant 0 : index
    %c0_101 = arith.constant 0 : index
    %c0_102 = arith.constant 0 : index
    %505 = vector.load %arg4[%c0_99, %c0_100, %c0_101, %c0_102] : memref<1x3x32x128xf32, #tpu.memory_space<vmem>>, vector<1x1x32x128xf32>
    %506 = vector.shape_cast %505 : vector<1x1x32x128xf32> to vector<32x128xf32>
    %507 = vector.shape_cast %496 : vector<32x128xf32> to vector<1x1x32x128xf32>
    tpu.vector_store %arg4[%c0_99, %c0_100, %c0_101, %c0_102], %507 {strides = array<i32>} : memref<1x3x32x128xf32, #tpu.memory_space<vmem>>, vector<1x1x32x128xf32>,
    %c0_103 = arith.constant 0 : index
    %c1_104 = arith.constant 1 : index
    %c0_105 = arith.constant 0 : index
    %c0_106 = arith.constant 0 : index
    %508 = vector.load %arg4[%c0_103, %c1_104, %c0_105, %c0_106] : memref<1x3x32x128xf32, #tpu.memory_space<vmem>>, vector<1x1x32x128xf32>
    %509 = vector.shape_cast %508 : vector<1x1x32x128xf32> to vector<32x128xf32>
    %510 = vector.shape_cast %500 : vector<32x128xf32> to vector<1x1x32x128xf32>
    tpu.vector_store %arg4[%c0_103, %c1_104, %c0_105, %c0_106], %510 {strides = array<i32>} : memref<1x3x32x128xf32, #tpu.memory_space<vmem>>, vector<1x1x32x128xf32>,
    %c0_107 = arith.constant 0 : index
    %c2_108 = arith.constant 2 : index
    %c0_109 = arith.constant 0 : index
    %c0_110 = arith.constant 0 : index
    %511 = vector.load %arg4[%c0_107, %c2_108, %c0_109, %c0_110] : memref<1x3x32x128xf32, #tpu.memory_space<vmem>>, vector<1x1x32x128xf32>
    %512 = vector.shape_cast %511 : vector<1x1x32x128xf32> to vector<32x128xf32>
    %513 = vector.shape_cast %504 : vector<32x128xf32> to vector<1x1x32x128xf32>
    tpu.vector_store %arg4[%c0_107, %c2_108, %c0_109, %c0_110], %513 {strides = array<i32>} : memref<1x3x32x128xf32, #tpu.memory_space<vmem>>, vector<1x1x32x128xf32>,
    return
  }
  func.func @transform_0(%arg0: i32) -> (i32, i32, i32, i32) {
    %c0_i32 = arith.constant 0 : i32
    %c0_i32_0 = arith.constant 0 : i32
    %c0_i32_1 = arith.constant 0 : i32
    %c0_i32_2 = arith.constant 0 : i32
    return %arg0, %c0_i32, %c0_i32_0, %c0_i32_1 : i32, i32, i32, i32
  }
  func.func @transform_1(%arg0: i32) -> i32 {
    %c0_i32 = arith.constant 0 : i32
    %c0_i32_0 = arith.constant 0 : i32
    return %c0_i32 : i32
  }
  func.func @transform_2(%arg0: i32) -> i32 {
    %c0_i32 = arith.constant 0 : i32
    %c0_i32_0 = arith.constant 0 : i32
    return %c0_i32 : i32
  }
  func.func @transform_3(%arg0: i32) -> (i32, i32, i32, i32) {
    %c0_i32 = arith.constant 0 : i32
    %c0_i32_0 = arith.constant 0 : i32
    %c0_i32_1 = arith.constant 0 : i32
    %c0_i32_2 = arith.constant 0 : i32
    return %arg0, %c0_i32, %c0_i32_0, %c0_i32_1 : i32, i32, i32, i32
  }
}

</mosaic_0001>

<bundles_post_ra>
// kernel: tpu_custom_call.1
= control target key start
LH: loop header
LB: loop body
LE: loop exit
PB: predicated region body
PF: predicated region fallthrough
CT: control target
= control target key end

     0   :  { %8 = vsyncpa [#allocation3], 0  ;;  %s3894_s0 = inlined_call_operand.hbm [shape: f32[1,3,32,128], index: 0, kind: input, shape index: {}]   ;;  %s3895_s1 = inlined_call_operand.hbm [shape: f32[81], index: 1, kind: input, shape index: {}]   ;;  %s3896_s2 = inlined_call_operand.vmem [shape: f32[3], index: 2, kind: input, shape index: {}]   ;;  %s3897_s3 = inlined_call_operand.hbm [shape: f32[1,3,32,128], index: 3, kind: output, shape index: {}]  }
   0x1   :  { %9 = vsyncpa [#allocation5], 0 }
   0x2   :  { %10 = vsyncpa [#allocation6], 0 }
   0x3   :  { %11 = vsyncpa [#allocation4], 0  ;;  %s16_s14 = sshll.u32 %s3894_s0, 4  ;;  %s1584_s15 = smov [#allocation2]   ;;  %s17_s14 = int_to_ptr.hbm [resolvable:$true] %s16_s14 }
   0x4   :  { %s18_s16 = sshll.u32 %s1584_s15, 4  ;;  %s30_s19 = sshll.u32 %s3895_s1, 4  ;;  %s19_s16 = int_to_ptr.vmem [resolvable:$true] %s18_s16  ;;  %s31_s19 = int_to_ptr.hbm [resolvable:$true] %s30_s19 }
   0x5   :  { %s1585_s20 = smov 128   ;;  %s1586_s21 = smov 8  }
   0x6   :  { %24 = dma.hbm_to_vmem [thread:$0]  %s17_s14, 1536, %s19_s16, [#allocation3], %s1585_s20, %s1585_s20, %s1586_s21  }
   0x7   :  { %s1587_s22 = smov [#allocation7]   ;;  %s39_s0 = sshll.u32 %s3896_s2, 4  ;;  %s40_s0 = int_to_ptr.vmem [resolvable:$true] %s39_s0 }
   0x8   :  { %33 = dma.hbm_to_smem %s31_s19, 16, %s1587_s22, [#allocation5]  }
   0x9   :  { %s1588_s25 = smov [#allocation8]  }
   0xa   :  { %42 = dma.vmem_to_smem %s40_s0, 16, %s1588_s25, [#allocation6]  }
   0xb   :  { %1576 = dma.done.wait [#allocation3], 1536  }
   0xc   :  { %1577 = vsyncadd [#allocation3], 4294965760 }
   0xd   :  { %1578 = dma.done.wait [#allocation5], 16  }
   0xe   :  { %1579 = vsyncadd [#allocation5], 4294967280 }
   0xf   :  { %1580 = dma.done.wait [#allocation6], 16  }
  0x10   :  { %1581 = vsyncadd [#allocation6], 4294967280 }
  0x11   :  { %55 = sfence }
  0x12   :  { %v1627_v0 = vld [vmem:[#allocation2 + $0x10] sm:$0xff]  ;;  %v1629_v1 = vld [vmem:[#allocation2] sm:$0xff]  ;;  %s1589_s1 = smov 65   ;;  %v1636_v3 = vld [vmem:[#allocation2 + $0x18] sm:$0xff]  ;;  %s1590_s2 = smov 64   ;;  %v56_v12 = vlaneseq }
  0x13   :  { %222 = vrot.lane.b32.xlu1 %v1627_v0, %s1589_s1  ;;  %218 = vrot.lane.b32.xlu0 %v1629_v1, %s1589_s1  ;;  %v1633_v2 = vld [vmem:[#allocation2 + $0x20] sm:$0xff]  ;;  %v1638_v4 = vld [vmem:[#allocation2 + $0x8] sm:$0xff]  ;;  %v1645_v6 = vld [vmem:[#allocation2 + $0x38] sm:$0xff]  ;;  %s1591_s26 = smov 63   ;;  %s1424_s27 = sld [smem:[#allocation7 + $0x9]] }
  0x14   :  { %274 = vrot.lane.b32.xlu2 %v1633_v2, %s1589_s1  ;;  %v1640_v5 = vld [vmem:[#allocation2 + $0x28] sm:$0xff]  ;;  %v1647_v7 = vld [vmem:[#allocation2 + $0x30] sm:$0xff]  ;;  %v1649_v8 = vld [vmem:[#allocation2 + $0x40] sm:$0xff]  ;;  %s1425_s28 = sld [smem:[#allocation7 + $0x24]]  ;;  %v1699_v14 = vand.u32 127, %v56_v12  ;;  %v1705_v16 = vshrl.u32 %v56_v12, 7 }
  0x15   :  { %v1654_v9 = vld [vmem:[#allocation2 + $0x50] sm:$0xff]  ;;  %v1656_v10 = vld [vmem:[#allocation2 + $0x48] sm:$0xff]  ;;  %v1658_v11 = vld [vmem:[#allocation2 + $0x58] sm:$0xff]  ;;  %s1426_s29 = sld [smem:[#allocation7 + $0x3f]]  ;;  %s1592_s15 = smov 1  }
  0x16   :  { %3964 = vst [vmem:[#allocation14_spill] sm:$0xff] %v1656_v10  ;;  %s1411_s30 = sld [smem:[#allocation7 + $0x4]]  ;;  %v3898_v22 = vand.u32 63, %v1699_v14  ;;  %vm230_vm0 = vcmp.lt.s32.totalorder %v1705_v16, 1  ;;  %vm235_vm1 = vcmp.ge.s32.totalorder %v1699_v14, 65  ;;  %vm963_vm2 = vcmp.lt.s32.totalorder %v1705_v16, 7 }
  0x17   :  { %3965 = vst [vmem:[#allocation15_spill] sm:$0xff] %v1658_v11  ;;  %s1684_s4 = sld [smem:[#allocation8]]  ;;  %vm968_vm3 = vcmp.lt.s32.totalorder %v1699_v14, 65  ;;  %vm64_vm5 = vcmp.gt.s32.totalorder %v1705_v16, 0  ;;  %vm68_vm6 = vcmp.ge.s32.totalorder %v1699_v14, 64  ;;  %vm81_vm7 = vcmp.lt.s32.totalorder %v1699_v14, 64 }
  0x18   :  { %s1412_s5 = sld [smem:[#allocation7 + $0x1f]]  ;;  %vm1819_vm4 = vcmp.ne.s32.totalorder %v3898_v22, 0  ;;  %vm2007_vm11 = vmor %vm64_vm5, %vm68_vm6  ;;  %vm1245_vm5 = vcmp.lt.s32.totalorder %v1699_v14, 63 }
  0x19   :  { %s1414_s6 = sld [smem:[#allocation7 + $0x3a]]  ;;  %v1713_v19 = vstv %s1424_s27  ;;  %vm2046_vm13 = vmand %vm2007_vm11, %vm1819_vm4  ;;  %s1593_s27 = smov 127  }
  0x1a   :  { %s1686_s7 = sld [smem:[#allocation8 + $0x1]]  ;;  %v1715_v20 = vstv %s1425_s28 }
  0x1b   :  { %224 = vrot.lane.b32.xlu1 %v1636_v3, %s1589_s1  ;;  %220 = vrot.lane.b32.xlu0 %v1638_v4, %s1589_s1  ;;  %s1688_s8 = sld [smem:[#allocation8 + $0x2]]  ;;  %v1719_v21 = vstv %s1426_s29 }
  0x1c   :  { %276 = vrot.lane.b32.xlu2 %v1640_v5, %s1589_s1  ;;  %s1416_s9 = sld [smem:[#allocation7 + $0xd]]  ;;  %v1701_v15 = vstv %s1411_s30 }
  0x1d   :  { %s1693_s10 = sld [smem:[#allocation7 + $0x28]]  ;;  %v127_v23 = vmul.f32 %v1701_v15, %v1636_v3  ;;  %v1730_v24 = vstv %s1684_s4  ;;  %v124_v49 = vmul.f32 %v1701_v15, %v1629_v1 }
  0x1e   :  { %s1695_s11 = sld [smem:[#allocation7 + $0x43]]  ;;  %v1707_v17 = vstv %s1412_s5 }
  0x1f   :  { %s1703_s12 = sld [smem:[#allocation7 + $0x16]]  ;;  %v1709_v18 = vstv %s1414_s6  ;;  %v139_v25 = vmul.f32 %v1707_v17, %v1636_v3  ;;  %v133_v35 = vadd.f32 %v1730_v24, %v127_v23  ;;  %v136_v52 = vmul.f32 %v1707_v17, %v1629_v1 }
  0x20   :  { %s1711_s13 = sld [smem:[#allocation7 + $0x31]]  ;;  %v151_v26 = vmul.f32 %v1709_v18, %v1636_v3  ;;  %v1743_v28 = vstv %s1686_s7  ;;  %v148_v53 = vmul.f32 %v1709_v18, %v1629_v1  ;;  %v125_v23 = vmul.f32 %v1701_v15, %v1638_v4 }
  0x21   :  { %s1717_s14 = sld [smem:[#allocation7 + $0x4c]]  ;;  %v1746_v29 = vstv %s1688_s8  ;;  %v145_v40 = vadd.f32 %v1743_v28, %v139_v25 }
  0x22   :  { %v1736_v27 = vstv %s1416_s9  ;;  %s1764_s16 = sld [smem:[#allocation7]]  ;;  %v157_v41 = vadd.f32 %v1746_v29, %v151_v26 }
  0x23   :  { %280 = vrot.lane.b32.xlu1 %v1645_v6, %s1589_s1  ;;  %278 = vrot.lane.b32.xlu0 %v1647_v7, %s1589_s1  ;;  %v1751_v32 = vstv %s1693_s10  ;;  %v160_v36 = vmul.f32 %v1736_v27, %v1633_v2  ;;  %v163_v37 = vmul.f32 %v1736_v27, %v1645_v6  ;;  %s1780_s17 = sld [smem:[#allocation7 + $0x1b]] }
  0x24   :  { %328 = vrot.lane.b32.xlu2 %v1649_v8, %s1589_s1  ;;  %v1754_v33 = vstv %s1695_s11  ;;  %v173_v42 = vmul.f32 %v1751_v32, %v1645_v6  ;;  %s1797_s18 = sld [smem:[#allocation7 + $0x36]]  ;;  %v170_v56 = vmul.f32 %v1751_v32, %v1633_v2 }
  0x25   :  { %v183_v43 = vmul.f32 %v1754_v33, %v1645_v6  ;;  %v1775_v44 = vstv %s1703_s12  ;;  %v167_v55 = vadd.f32 %v163_v37, %v133_v35  ;;  %v180_v59 = vmul.f32 %v1754_v33, %v1633_v2  ;;  %s1867_s19 = sld [smem:[#allocation7 + $0x12]] }
  0x26   :  { %v1778_v45 = vstv %s1711_s13  ;;  %v193_v57 = vmul.f32 %v1775_v44, %v1658_v11  ;;  %v177_v58 = vadd.f32 %v173_v42, %v145_v40  ;;  %v190_v60 = vmul.f32 %v1775_v44, %v1649_v8  ;;  %s1877_s22 = sld [smem:[#allocation7 + $0x2d]] }
  0x27   :  { %v1795_v48 = vstv %s1717_s14  ;;  %v203_v61 = vmul.f32 %v1778_v45, %v1658_v11  ;;  %v187_v62 = vadd.f32 %v183_v43, %v157_v41  ;;  %v200_v63 = vmul.f32 %v1778_v45, %v1649_v8  ;;  %s1882_s23 = sld [smem:[#allocation7 + $0x48]] }
  0x28   :  { %v213_v12 = vmul.f32 %v1795_v48, %v1658_v11  ;;  %v1844_v26 = vstv %s1764_s16  ;;  %v130_v35 = vadd.f32 %v1730_v24, %v124_v49  ;;  %v142_v37 = vadd.f32 %v1743_v28, %v136_v52  ;;  %s1894_s24 = sld [smem:[#allocation7 + $0x18]] }
  0x29   :  { %v154_v40 = vadd.f32 %v1746_v29, %v148_v53  ;;  %v1849_v41 = vadd.f32 %v193_v57, %v167_v55  ;;  %v210_v42 = vmul.f32 %v1795_v48, %v1649_v8  ;;  %v1854_v43 = vadd.s32 24, %v1705_v16  ;;  %s1904_s0 = sld [smem:[#allocation7 + $0x33]] }
  0x2a   :  { %v1860_v22 = vadd.f32 %v203_v61, %v177_v58  ;;  %v1863_v49 = vstv %s1780_s17  ;;  %v149_v52 = vmul.f32 %v1709_v18, %v1638_v4  ;;  %v1869_v53 = vadd.f32 %v213_v12, %v187_v62  ;;  %s1916_s25 = sld [smem:[#allocation7 + $0x4e]] }
  0x2b   :  { %332 = vrot.lane.b32.xlu1 %v1654_v9, %s1589_s1  ;;  %330 = vrot.lane.b32.xlu0 %v1656_v10, %s1589_s1  ;;  %3970 = vst [vmem:[#allocation18_spill] sm:$0xff] %v1849_v41  ;;  %v1872_v55 = vstv %s1797_s18  ;;  %v131_v57 = vadd.f32 %v1730_v24, %v125_v23  ;;  %v174_v58 = vadd.f32 %v170_v56, %v142_v37  ;;  %vm76_vm8 = vcmp.lt.s32.totalorder %v1854_v43, 31  ;;  %s2387_s28 = sld [smem:[#allocation7 + $0x1]] }
  0x2c   :  { %334 = vrot.lane.b32.xlu2 %v1658_v11, %s1589_s1  ;;  %3971 = vst [vmem:[#allocation19_spill] sm:$0xff] %v1860_v22  ;;  %v184_v61 = vadd.f32 %v180_v59, %v154_v40  ;;  %vm80_vm9 = vcmp.eq.s32.totalorder %v1854_v43, 31  ;;  %v155_v56 = vadd.f32 %v1746_v29, %v149_v52  ;;  %v171_v59 = vmul.f32 %v1751_v32, %v1640_v5  ;;  %s1929_s1 = sld [smem:[#allocation7 + $0xf]] }
  0x2d   :  { %3972 = vst [vmem:[#allocation20_spill] sm:$0xff] %v1869_v53  ;;  %v181_v23 = vmul.f32 %v1754_v33, %v1640_v5  ;;  %vm1980_vm10 = vmand %vm80_vm9, %vm81_vm7  ;;  %s2404_s29 = sld [smem:[#allocation7 + $0x1c]] }
  0x2e   :  { %v1925_v53 = vadd.f32 %v210_v42, %v184_v61  ;;  %v201_v42 = vmul.f32 %v1778_v45, %v1656_v10  ;;  %v211_v61 = vmul.f32 %v1795_v48, %v1656_v10  ;;  %vm2029_vm12 = vmor %vm76_vm8, %vm1980_vm10  ;;  %s2414_s30 = sld [smem:[#allocation7 + $0x37]] }
  0x2f   :  { %vm2062_vm14 = vmand %vm2029_vm12, %vm1819_vm4  ;;  %s2441_s4 = sld [smem:[#allocation7 + $0x7]] }
  0x30   :  { %s2463_s5 = sld [smem:[#allocation7 + $0x22]] }
  0x31   :  { %s2465_s6 = sld [smem:[#allocation7 + $0x3d]] }
  0x32   :  { %s2471_s7 = sld [smem:[#allocation7 + $0x10]] }
  0x33   :  { %384 = vrot.lane.b32.xlu1 %v1638_v4, %s1590_s2  ;;  %382 = vrot.lane.b32.xlu0 %v1629_v1, %s1590_s2  ;;  %s2477_s8 = sld [smem:[#allocation7 + $0x2b]] }
  0x34   :  { %386 = vrot.lane.b32.xlu2 %v1627_v0, %s1590_s2  ;;  %s2508_s9 = sld [smem:[#allocation7 + $0x46]] }
  0x35   :  { %s2593_s10 = sld [smem:[#allocation7 + $0xa]] }
  0x36   :  { %s2609_s11 = sld [smem:[#allocation7 + $0x25]] }
  0x37   :  { %s2641_s12 = sld [smem:[#allocation7 + $0x40]] }
  0x38   :  { %s2659_s13 = sld [smem:[#allocation7 + $0x19]] }
  0x39   :  { %s2672_s14 = sld [smem:[#allocation7 + $0x34]] }
  0x3a   :  { %s2731_s16 = sld [smem:[#allocation7 + $0x13]] }
  0x3b   :  { %436 = vrot.lane.b32.xlu1 %v1633_v2, %s1590_s2  ;;  %388 = vrot.lane.b32.xlu0 %v1636_v3, %s1590_s2  ;;  %s2746_s17 = sld [smem:[#allocation7 + $0x2e]] }
  0x3c   :  { %438 = vrot.lane.b32.xlu2 %v1640_v5, %s1590_s2  ;;  %s2757_s18 = sld [smem:[#allocation7 + $0x49]] }
  0x43   :  { %442 = vrot.lane.b32.xlu1 %v1645_v6, %s1590_s2  ;;  %440 = vrot.lane.b32.xlu0 %v1647_v7, %s1590_s2 }
  0x44   :  { %490 = vrot.lane.b32.xlu2 %v1649_v8, %s1590_s2 }
  0x4b   :  { %494 = vrot.lane.b32.xlu1 %v1654_v9, %s1590_s2  ;;  %492 = vrot.lane.b32.xlu0 %v1656_v10, %s1590_s2 }
  0x4c   :  { %496 = vrot.lane.b32.xlu2 %v1658_v11, %s1590_s2  ;;  %s1939_s2 = sld [smem:[#allocation7 + $0x2a]] }
  0x53   :  { %546 = vrot.lane.b32.xlu1 %v1638_v4, %s1591_s26  ;;  %544 = vrot.lane.b32.xlu0 %v1629_v1, %s1591_s26 }
  0x54   :  { %548 = vrot.lane.b32.xlu2 %v1627_v0, %s1591_s26 }
  0x5b   :  { %599 = vrot.lane.b32.xlu1 %v1633_v2, %s1591_s26  ;;  %550 = vrot.lane.b32.xlu0 %v1636_v3, %s1591_s26 }
  0x5c   :  { %601 = vrot.lane.b32.xlu2 %v1640_v5, %s1591_s26 }
  0x63   :  { %605 = vrot.lane.b32.xlu1 %v1645_v6, %s1591_s26  ;;  %603 = vrot.lane.b32.xlu0 %v1647_v7, %s1591_s26 }
  0x64   :  { %653 = vrot.lane.b32.xlu2 %v1649_v8, %s1591_s26 }
  0x6b   :  { %657 = vrot.lane.b32.xlu1 %v1654_v9, %s1591_s26  ;;  %655 = vrot.lane.b32.xlu0 %v1656_v10, %s1591_s26 }
  0x6c   :  { %659 = vrot.lane.b32.xlu2 %v1658_v11, %s1591_s26  ;;  %s1959_s26 = sld [smem:[#allocation7 + $0x45]] }
  0x6e   :  { %v1697_v13 = vpop.permute.xlu2 %274 }
  0x6f   :  { %v3902_v30 = vrot.slane %v1697_v13, 7  ;;  %v3901_v31 = vrot.slane %v1697_v13, 1 }
  0x73   :  { %709 = vrot.lane.b32.xlu1 %v1638_v4, %s1592_s15  ;;  %707 = vrot.lane.b32.xlu0 %v1629_v1, %s1592_s15 }
  0x74   :  { %711 = vrot.lane.b32.xlu2 %v1627_v0, %s1592_s15 }
  0x76   :  { %v1756_v34 = vpop.permute.xlu2 %276 }
  0x77   :  { %v3900_v38 = vrot.slane %v1756_v34, 7  ;;  %v3899_v39 = vrot.slane %v1756_v34, 1 }
  0x79   :  { %v288_v46 = vsel %vm230_vm0, %v3902_v30, %v3900_v38  ;;  %v1013_v47 = vsel %vm963_vm2, %v3901_v31, %v3899_v39  ;;  %v161_v39 = vmul.f32 %v1736_v27, %v1640_v5  ;;  %v191_v38 = vmul.f32 %v1775_v44, %v1656_v10 }
  0x7a   :  { %v291_v50 = vsel %vm235_vm1, %v1756_v34, %v288_v46  ;;  %v1807_v51 = vsel %vm968_vm3, %v1697_v13, %v1013_v47  ;;  %v137_v46 = vmul.f32 %v1707_v17, %v1638_v4 }
  0x7b   :  { %3966 = vst [vmem:[#allocation16_spill] sm:$0xff] %v1807_v51  ;;  %749 = vrot.lane.b32.xlu1 %v1633_v2, %s1592_s15  ;;  %713 = vrot.lane.b32.xlu0 %v1636_v3, %s1592_s15  ;;  %v295_v47 = vsel %vm1819_vm4, %v291_v50, 0.0  ;;  %v164_v50 = vadd.f32 %v160_v36, %v130_v35  ;;  %v165_v52 = vadd.f32 %v161_v39, %v131_v57 }
  0x7c   :  { %751 = vrot.lane.b32.xlu2 %v1640_v5, %s1592_s15  ;;  %v1885_v62 = vmul.f32 %v1713_v19, %v295_v47  ;;  %v143_v12 = vadd.f32 %v1743_v28, %v137_v46  ;;  %v1897_v36 = vmul.f32 %v1715_v20, %v295_v47  ;;  %v1919_v31 = vmul.f32 %v1719_v21, %v295_v47 }
  0x7d   :  { %v1921_v30 = vadd.f32 %v190_v60, %v164_v50  ;;  %v1923_v51 = vadd.f32 %v200_v63, %v174_v58  ;;  %v126_v46 = vmul.f32 %v1701_v15, %v1627_v0  ;;  %v138_v60 = vmul.f32 %v1707_v17, %v1627_v0 }
  0x7e   :  { %v1841_v25 = vpop.permute.xlu2 %328  ;;  %v175_v47 = vadd.f32 %v171_v59, %v143_v12  ;;  %v185_v63 = vadd.f32 %v181_v23, %v155_v56  ;;  %v150_v50 = vmul.f32 %v1709_v18, %v1627_v0  ;;  %v1943_v58 = vadd.f32 %v191_v38, %v165_v52 }
  0x7f   :  { %3969 = vst [vmem:[#allocation17_spill] sm:$0xff] %v1841_v25  ;;  %v3903_v40 = vrot.slane %v1841_v25, 7  ;;  %v3975_v17 = vrot.slane %v1841_v25, 1  ;;  %v1962_v38 = vstv %s1867_s19  ;;  %v162_v59 = vmul.f32 %v1736_v27, %v1647_v7  ;;  %s2878_s19 = sld [smem:[#allocation7 + $0x8]] }
  0x80   :  { %v1985_v52 = vstv %s1877_s22  ;;  %v132_v27 = vadd.f32 %v1730_v24, %v126_v46  ;;  %v3978_v24 = vmov 0  ;;  %v2022_v46 = vstv %s1916_s25  ;;  %s2888_s22 = sld [smem:[#allocation7 + $0x23]] }
  0x81   :  { %v3979_v24 = vsel %vm2007_vm11, 4294967295, %v3978_v24  ;;  %3983 = vst [vmem:[#allocation26_spill] sm:$0xff] %v2022_v46  ;;  %v202_v23 = vmul.f32 %v1778_v45, %v1654_v9  ;;  %s2937_s25 = sld [smem:[#allocation7 + $0x47]] }
  0x82   :  { %3980 = vst [vmem:[#allocation23_spill] sm:$0xff] %v3979_v24 }
  0x83   :  { %755 = vrot.lane.b32.xlu1 %v1645_v6, %s1592_s15  ;;  %753 = vrot.lane.b32.xlu0 %v1647_v7, %s1592_s15 }
  0x84   :  { %791 = vrot.lane.b32.xlu2 %v1649_v8, %s1592_s15 }
  0x85   :  { %v1908_v35 = vpop.permute.xlu1 %222  ;;  %v1910_v37 = vpop.permute.xlu0 %218 }
  0x86   :  { %3973 = vst [vmem:[#allocation21_spill] sm:$0xff] %v1908_v35  ;;  %v1927_v22 = vpop.permute.xlu2 %334 }
  0x87   :  { %3974 = vst [vmem:[#allocation22_spill] sm:$0xff] %v1910_v37  ;;  %v3905_v39 = vrot.slane %v1927_v22, 7  ;;  %v3904_v57 = vrot.slane %v1927_v22, 1 }
  0x89   :  { %v343_v15 = vsel %vm230_vm0, %v3905_v39, %v3903_v40  ;;  %v1060_v18 = vsel %vm963_vm2, %v3904_v57, %v3975_v17  ;;  %v172_v17 = vmul.f32 %v1751_v32, %v1647_v7  ;;  %v1994_v40 = vstv %s1882_s23  ;;  %s2899_s23 = sld [smem:[#allocation7 + $0x3e]] }
  0x8a   :  { %v344_v12 = vsel %vm235_vm1, %v1841_v25, %v343_v15  ;;  %v1064_v56 = vsel %vm968_vm3, %v1927_v22, %v1060_v18  ;;  %v144_v15 = vadd.f32 %v1743_v28, %v138_v60  ;;  %v1991_v18 = vadd.f32 %v201_v42, %v175_v47 }
  0x8b   :  { %795 = vrot.lane.b32.xlu1 %v1654_v9, %s1592_s15  ;;  %793 = vrot.lane.b32.xlu0 %v1656_v10, %s1592_s15  ;;  %v156_v57 = vadd.f32 %v1746_v29, %v150_v50  ;;  %v182_v39 = vmul.f32 %v1754_v33, %v1647_v7  ;;  %v2011_v28 = vadd.f32 %v211_v61, %v185_v63  ;;  %v2016_v32 = vstv %s1894_s24  ;;  %s2908_s24 = sld [smem:[#allocation7 + $0x11]] }
  0x8c   :  { %797 = vrot.lane.b32.xlu2 %v1658_v11, %s1592_s15  ;;  %3981 = vst [vmem:[#allocation24_spill] sm:$0xff] %v2016_v32  ;;  %v2019_v33 = vstv %s1904_s0  ;;  %v226_v60 = vrot.slane %v1910_v37, 7  ;;  %v3984_v47 = vmov 0  ;;  %v2036_v50 = vstv %s1929_s1  ;;  %s2676_s15 = sld [smem:[#allocation7 + $0x4f]] }
  0x8d   :  { %v2001_v10 = vpop.permute.xlu1 %224  ;;  %v2013_v29 = vpop.permute.xlu0 %220  ;;  %3982 = vst [vmem:[#allocation25_spill] sm:$0xff] %v2019_v33  ;;  %v3985_v47 = vsel %vm2029_vm12, 4294967295, %v3984_v47  ;;  %v166_v61 = vadd.f32 %v162_v59, %v132_v27  ;;  %v176_v11 = vadd.f32 %v172_v17, %v144_v15  ;;  %v192_v25 = vmul.f32 %v1775_v44, %v1654_v9  ;;  %s2919_s0 = sld [smem:[#allocation7 + $0x2c]] }
  0x8e   :  { %3986 = vst [vmem:[#allocation27_spill] sm:$0xff] %v3985_v47  ;;  %v229_v63 = vrot.slane %v2001_v10, 7  ;;  %v227_v42 = vrot.slane %v2013_v29, 7  ;;  %v186_v59 = vadd.f32 %v182_v39, %v156_v57  ;;  %v212_v44 = vmul.f32 %v1795_v48, %v1654_v9  ;;  %s2955_s1 = sld [smem:[#allocation7 + $0x2]] }
  0x8f   :  { %3987 = vst [vmem:[#allocation28_spill] sm:$0xff] %v2036_v50  ;;  %v2053_v50 = vstv %s1939_s2  ;;  %v228_v27 = vrot.slane %v1908_v35, 7  ;;  %v348_v39 = vsel %vm2046_vm13, %v344_v12, 0.0  ;;  %v2072_v57 = vstv %s1959_s26  ;;  %s2972_s2 = sld [smem:[#allocation7 + $0x1d]] }
  0x90   :  { %v234_v41 = vsel %vm230_vm0, %v229_v63, %v226_v60  ;;  %3990 = vst [vmem:[#allocation29_spill] sm:$0xff] %v2053_v50  ;;  %v233_v47 = vsel %vm230_vm0, %v226_v60, %v227_v42  ;;  %v1068_v24 = vsel %vm2062_vm14, %v1064_v56, 0.0  ;;  %v2086_v12 = vadd.f32 %v192_v25, %v166_v61  ;;  %s2984_s26 = sld [smem:[#allocation7 + $0x38]] }
  0x91   :  { %v236_v15 = vsel %vm235_vm1, %v1910_v37, %v234_v41  ;;  %3993 = vst [vmem:[#allocation30_spill] sm:$0xff] %v2072_v57  ;;  %v231_v50 = vsel %vm230_vm0, %v228_v27, %v229_v63  ;;  %v2088_v48 = vadd.f32 %v202_v23, %v176_v11  ;;  %v237_v60 = vsel %vm235_vm1, %v2013_v29, %v233_v47 }
  0x92   :  { %v240_v41 = vsel %vm2046_vm13, %v236_v15, 0.0  ;;  %v2094_v56 = vmul.f32 %v1962_v38, %v348_v39  ;;  %v2097_v63 = vmul.f32 %v1985_v52, %v348_v39  ;;  %v2101_v15 = vadd.f32 %v212_v44, %v186_v59 }
  0x93   :  { %835 = vrot.lane.b32.xlu1 %v1638_v4, %s1593_s27  ;;  %833 = vrot.lane.b32.xlu0 %v1629_v1, %s1593_s27  ;;  %v232_v11 = vsel %vm230_vm0, %v227_v42, %v228_v27  ;;  %v2107_v25 = vmul.f32 %v1994_v40, %v348_v39  ;;  %v2110_v47 = vmul.f32 %v2016_v32, %v1068_v24  ;;  %v241_v42 = vsel %vm1819_vm4, %v237_v60, 0.0 }
  0x94   :  { %3994 = vst [vmem:[#allocation31_spill] sm:$0xff] %v2094_v56  ;;  %837 = vrot.lane.b32.xlu2 %v1627_v0, %s1593_s27  ;;  %v239_v1 = vsel %vm235_vm1, %v2001_v10, %v231_v50  ;;  %v246_v23 = vmul.f32 %v1844_v26, %v240_v41  ;;  %v256_v59 = vmul.f32 %v1863_v49, %v240_v41 }
  0x95   :  { %3995 = vst [vmem:[#allocation32_spill] sm:$0xff] %v2097_v63  ;;  %v2112_v61 = vpop.permute.xlu1 %280  ;;  %v266_v44 = vmul.f32 %v1872_v55, %v240_v41  ;;  %v2126_v39 = vmul.f32 %v2019_v33, %v1068_v24  ;;  %v2129_v0 = vmul.f32 %v2022_v46, %v1068_v24  ;;  %v238_v50 = vsel %vm235_vm1, %v1908_v35, %v232_v11  ;;  %v2137_v41 = vpop.permute.xlu2 %386 }
  0x96   :  { %3996 = vst [vmem:[#allocation33_spill] sm:$0xff] %v2107_v25  ;;  %v247_v4 = vmul.f32 %v1844_v26, %v241_v42  ;;  %v285_v17 = vrot.slane %v2112_v61, 7  ;;  %v1010_v60 = vrot.slane %v2112_v61, 1  ;;  %v2141_v27 = vsel %vm1819_vm4, %v239_v1, 0.0 }
  0x97   :  { %3997 = vst [vmem:[#allocation34_spill] sm:$0xff] %v2110_v47  ;;  %v279_v47 = vpop.permute.xlu0 %278  ;;  %v4000_v24 = vrot.slane %v1910_v37, 1  ;;  %v3923_v25 = vrot.slane %v2137_v41, 7  ;;  %v250_v63 = vadd.f32 %v246_v23, %v1921_v30  ;;  %v260_v56 = vadd.f32 %v256_v59, %v1923_v51 }
  0x98   :  { %3998 = vst [vmem:[#allocation35_spill] sm:$0xff] %v2126_v39  ;;  %v257_v39 = vmul.f32 %v1863_v49, %v241_v42  ;;  %v4002_v46 = vrot.slane %v1697_v13, 7  ;;  %v4003_v33 = vrot.slane %v1697_v13, 1  ;;  %v284_v51 = vrot.slane %v279_v47, 7 }
  0x99   :  { %3999 = vst [vmem:[#allocation36_spill] sm:$0xff] %v2129_v0  ;;  %v4001_v0 = vrot.slane %v2001_v10, 1  ;;  %v267_v23 = vmul.f32 %v1872_v55, %v241_v42 }
  0x9a   :  { %v289_v1 = vsel %vm230_vm0, %v285_v17, %v4002_v46  ;;  %v1014_v32 = vsel %vm963_vm2, %v1010_v60, %v4003_v33  ;;  %v270_v46 = vadd.f32 %v266_v44, %v1925_v53  ;;  %v251_v33 = vadd.f32 %v247_v4, %v1943_v58 }
  0x9b   :  { %v967_v11 = vsel %vm963_vm2, %v4001_v0, %v4000_v24  ;;  %v242_v0 = vsel %vm1819_vm4, %v238_v50, 0.0  ;;  %v290_v24 = vsel %vm235_vm1, %v1697_v13, %v289_v1  ;;  %v2169_v30 = vsel %vm968_vm3, %v2112_v61, %v1014_v32  ;;  %875 = vrot.lane.b32.xlu1 %v1633_v2, %s1593_s27  ;;  %839 = vrot.lane.b32.xlu0 %v1636_v3, %s1593_s27 }
  0x9c   :  { %v294_v59 = vsel %vm2046_vm13, %v290_v24, 0.0  ;;  %v261_v13 = vadd.f32 %v257_v39, %v1991_v18  ;;  %877 = vrot.lane.b32.xlu2 %v1640_v5, %s1593_s27  ;;  %v248_v53 = vmul.f32 %v1844_v26, %v242_v0  ;;  %v258_v58 = vmul.f32 %v1863_v49, %v242_v0 }
  0x9d   :  { %v300_v32 = vmul.f32 %v1713_v19, %v294_v59  ;;  %v310_v50 = vmul.f32 %v1715_v20, %v294_v59  ;;  %v320_v2 = vmul.f32 %v1719_v21, %v294_v59  ;;  %v268_v43 = vmul.f32 %v1872_v55, %v242_v0  ;;  %v333_v4 = vpop.permute.xlu1 %332 }
  0x9e   :  { %v286_v3 = vsel %vm230_vm0, %v284_v51, %v285_v17  ;;  %v4004_v39 = vrot.slane %v1756_v34, 7  ;;  %v271_v1 = vadd.f32 %v267_v23, %v2011_v28  ;;  %v338_v24 = vrot.slane %v333_v4, 7 }
  0x9f   :  { %v2191_v18 = vadd.f32 %v300_v32, %v250_v63  ;;  %v2193_v42 = vadd.f32 %v310_v50, %v260_v56  ;;  %v2195_v44 = vadd.f32 %v320_v2, %v270_v46  ;;  %v293_v17 = vsel %vm235_vm1, %v2112_v61, %v286_v3 }
  0xa0   :  { %v287_v5 = vsel %vm230_vm0, %v4004_v39, %v284_v51  ;;  %v1009_v63 = vrot.slane %v279_v47, 1  ;;  %v1055_v46 = vrot.slane %v333_v4, 1  ;;  %v2210_v59 = vadd.f32 %v1885_v62, %v251_v33  ;;  %v331_v33 = vpop.permute.xlu0 %330 }
  0xa1   :  { %v292_v0 = vsel %vm235_vm1, %v279_v47, %v287_v5  ;;  %v252_v51 = vadd.f32 %v248_v53, %v2086_v12  ;;  %v262_v28 = vadd.f32 %v258_v58, %v2088_v48  ;;  %v272_v50 = vadd.f32 %v268_v43, %v2101_v15 }
  0xa2   :  { %v296_v56 = vsel %vm1819_vm4, %v292_v0, 0.0  ;;  %v1011_v2 = vsel %vm963_vm2, %v1009_v63, %v1010_v60  ;;  %v4005_v3 = vrot.slane %v1756_v34, 1  ;;  %v249_v53 = vmul.f32 %v1844_v26, %v2141_v27 }
  0xa3   :  { %v302_v23 = vmul.f32 %v1713_v19, %v296_v56  ;;  %v312_v32 = vmul.f32 %v1715_v20, %v296_v56  ;;  %v322_v61 = vmul.f32 %v1719_v21, %v296_v56  ;;  %881 = vrot.lane.b32.xlu1 %v1645_v6, %s1593_s27  ;;  %v1017_v60 = vsel %vm968_vm3, %v279_v47, %v1011_v2 }
  0xa4   :  { %v1012_v62 = vsel %vm963_vm2, %v4005_v3, %v1009_v63  ;;  %879 = vrot.lane.b32.xlu0 %v1647_v7, %s1593_s27  ;;  %v4007_v6 = vrot.slane %v1927_v22, 7  ;;  %v4008_v39 = vrot.slane %v1927_v22, 1  ;;  %917 = vrot.lane.b32.xlu2 %v1649_v8, %s1593_s27  ;;  %v972_v7 = vsel %vm968_vm3, %v2001_v10, %v967_v11 }
  0xa5   :  { %v2226_v48 = vadd.f32 %v302_v23, %v252_v51  ;;  %v2228_v12 = vadd.f32 %v312_v32, %v262_v28  ;;  %v2233_v15 = vsel %vm968_vm3, %v1756_v34, %v1012_v62  ;;  %v2241_v58 = vadd.f32 %v322_v61, %v272_v50  ;;  %v4014_v61 = vld [vmem:[#allocation18_spill] sm:$0xff] }
  0xa6   :  { %4006 = vst [vmem:[#allocation37_spill] sm:$0xff] %v2233_v15  ;;  %v340_v43 = vsel %vm230_vm0, %v338_v24, %v4007_v6  ;;  %v1057_v34 = vsel %vm963_vm2, %v1055_v46, %v4008_v39  ;;  %v4009_v26 = vrot.slane %v1908_v35, 1  ;;  %v4010_v47 = vrot.slane %v2013_v29, 1 }
  0xa7   :  { %v3922_v0 = vrot.slane %v2137_v41, 1  ;;  %v347_v63 = vsel %vm235_vm1, %v1927_v22, %v340_v43  ;;  %v4011_v56 = vrot.slane %v2001_v10, 1  ;;  %v1063_v51 = vsel %vm968_vm3, %v333_v4, %v1057_v34  ;;  %v385_v43 = vpop.permute.xlu1 %384  ;;  %v4020_v34 = vld [vmem:[#allocation20_spill] sm:$0xff] }
  0xa8   :  { %v965_v5 = vsel %vm963_vm2, %v4010_v47, %v4009_v26  ;;  %v4012_v8 = vmov %v4009_v26  ;;  %v315_v28 = vadd.f32 %v1897_v36, %v261_v13  ;;  %v325_v23 = vadd.f32 %v1919_v31, %v271_v1  ;;  %v2328_v47 = vpop.permute.xlu2 %438 }
  0xa9   :  { %v2272_v11 = vsel %vm963_vm2, %v4012_v8, %v4011_v56  ;;  %v259_v32 = vmul.f32 %v1863_v49, %v2141_v27  ;;  %v269_v22 = vmul.f32 %v1872_v55, %v2141_v27  ;;  %v337_v10 = vrot.slane %v331_v33, 7  ;;  %v4016_v55 = vld [vmem:[#allocation17_spill] sm:$0xff] }
  0xaa   :  { %4013 = vst [vmem:[#allocation38_spill] sm:$0xff] %v2272_v11  ;;  %v1054_v50 = vrot.slane %v331_v33, 1  ;;  %v2283_v2 = vadd.f32 %v249_v53, %v4014_v61  ;;  %v2287_v3 = vsel %vm2062_vm14, %v972_v7, 0.0  ;;  %v970_v36 = vsel %vm968_vm3, %v2013_v29, %v965_v5  ;;  %v4029_v61 = vld [vmem:[#allocation29_spill] sm:$0xff] }
  0xab   :  { %4015 = vst [vmem:[#allocation18_spill] sm:$0xff] %v2287_v3  ;;  %v1022_v31 = vsel %vm2062_vm14, %v2169_v30, 0.0  ;;  %v341_v49 = vsel %vm230_vm0, %v337_v10, %v338_v24  ;;  %v4017_v27 = vrot.slane %v4016_v55, 7  ;;  %v4018_v62 = vrot.slane %v4016_v55, 1  ;;  %921 = vrot.lane.b32.xlu1 %v1654_v9, %s1593_s27 }
  0xac   :  { %v1058_v1 = vsel %vm963_vm2, %v1054_v50, %v1055_v46  ;;  %v346_v30 = vsel %vm235_vm1, %v333_v4, %v341_v49  ;;  %v4019_v46 = vld [vmem:[#allocation19_spill] sm:$0xff]  ;;  %v2322_v7 = vadd.f32 %v269_v22, %v4020_v34  ;;  %v297_v4 = vsel %vm1819_vm4, %v293_v17, 0.0  ;;  %v2346_v22 = vpop.permute.xlu0 %382 }
  0xad   :  { %v342_v13 = vsel %vm230_vm0, %v4017_v27, %v337_v10  ;;  %v1059_v53 = vsel %vm963_vm2, %v4018_v62, %v1054_v50  ;;  %v1062_v6 = vsel %vm968_vm3, %v331_v33, %v1058_v1  ;;  %v2319_v39 = vadd.f32 %v259_v32, %v4019_v46  ;;  %v4026_v10 = vld [vmem:[#allocation15_spill] sm:$0xff] }
  0xae   :  { %v345_v45 = vsel %vm235_vm1, %v331_v33, %v342_v13  ;;  %v1061_v24 = vsel %vm968_vm3, %v4016_v55, %v1059_v53  ;;  %v4021_v33 = vld [vmem:[#allocation14_spill] sm:$0xff]  ;;  %v4022_v5 = vrot.slane %v2013_v29, 1  ;;  %v4023_v9 = vrot.slane %v1910_v37, 1  ;;  %923 = vrot.lane.b32.xlu2 %v4026_v10, %s1593_s27  ;;  %v4027_v29 = vld [vmem:[#allocation28_spill] sm:$0xff]  ;;  %v4037_v10 = vld [vmem:[#allocation25_spill] sm:$0xff] }
  0xaf   :  { %v349_v26 = vsel %vm1819_vm4, %v345_v45, 0.0  ;;  %919 = vrot.lane.b32.xlu0 %v4021_v33, %s1593_s27  ;;  %v2342_v8 = vsel %vm1819_vm4, %v970_v36, 0.0  ;;  %v2351_v50 = vmul.f32 %v4027_v29, %v1022_v31  ;;  %v2354_v49 = vmul.f32 %v4029_v61, %v1022_v31  ;;  %s2998_s27 = sld [smem:[#allocation7 + $0x1a]] }
  0xb0   :  { %v2338_v56 = vsel %vm963_vm2, %v4023_v9, %v4022_v5  ;;  %4025 = vst [vmem:[#allocation19_spill] sm:$0xff] %v2342_v8  ;;  %v355_v17 = vmul.f32 %v1962_v38, %v349_v26  ;;  %v365_v32 = vmul.f32 %v1985_v52, %v349_v26  ;;  %v1021_v55 = vsel %vm1819_vm4, %v1017_v60, 0.0 }
  0xb1   :  { %4024 = vst [vmem:[#allocation17_spill] sm:$0xff] %v2338_v56  ;;  %v375_v36 = vmul.f32 %v1994_v40, %v349_v26  ;;  %v2360_v27 = vmul.f32 %v2072_v57, %v1022_v31  ;;  %v303_v13 = vmul.f32 %v1713_v19, %v297_v4  ;;  %v313_v53 = vmul.f32 %v1715_v20, %v297_v4 }
  0xb2   :  { %4028 = vst [vmem:[#allocation20_spill] sm:$0xff] %v2351_v50  ;;  %v2364_v1 = vadd.f32 %v355_v17, %v2210_v59  ;;  %v2366_v62 = vadd.f32 %v365_v32, %v315_v28  ;;  %v323_v45 = vmul.f32 %v1719_v21, %v297_v4  ;;  %v391_v34 = vrot.slane %v385_v43, 7  ;;  %v4035_v17 = vld [vmem:[#allocation24_spill] sm:$0xff] }
  0xb3   :  { %4030 = vst [vmem:[#allocation14_spill] sm:$0xff] %v2354_v49  ;;  %v2370_v46 = vadd.f32 %v375_v36, %v325_v23  ;;  %v2373_v60 = vmul.f32 %v4027_v29, %v1021_v55  ;;  %v2376_v31 = vmul.f32 %v4029_v61, %v1021_v55  ;;  %v2379_v19 = vmul.f32 %v2072_v57, %v1021_v55 }
  0xb4   :  { %4031 = vst [vmem:[#allocation15_spill] sm:$0xff] %v2360_v27  ;;  %v1100_v59 = vrot.slane %v385_v43, 1  ;;  %v1067_v28 = vsel %vm1819_vm4, %v1063_v51, 0.0  ;;  %v395_v20 = vsel %vm230_vm0, %v391_v34, %v3923_v25  ;;  %v390_v21 = vrot.slane %v2346_v22, 7 }
  0xb5   :  { %4032 = vst [vmem:[#allocation39_spill] sm:$0xff] %v2373_v60  ;;  %v1099_v23 = vrot.slane %v2346_v22, 1  ;;  %v351_v4 = vsel %vm1819_vm4, %v347_v63, 0.0  ;;  %v350_v26 = vsel %vm1819_vm4, %v346_v30, 0.0  ;;  %v2398_v51 = vsel %vm68_vm6, %v2137_v41, %v395_v20  ;;  %v2431_v20 = vpop.permute.xlu1 %436 }
  0xb6   :  { %4033 = vst [vmem:[#allocation40_spill] sm:$0xff] %v2376_v31  ;;  %v1104_v33 = vsel %vm963_vm2, %v1100_v59, %v3922_v0  ;;  %v2408_v5 = vsel %vm1819_vm4, %v1062_v6, 0.0  ;;  %v396_v30 = vsel %vm230_vm0, %v390_v21, %v391_v34  ;;  %v2421_v32 = vmul.f32 %v4035_v17, %v1067_v28  ;;  %v389_v6 = vpop.permute.xlu0 %388 }
  0xb7   :  { %4034 = vst [vmem:[#allocation41_spill] sm:$0xff] %v2379_v19  ;;  %v2412_v63 = vsel %vm81_vm7, %v385_v43, %v1104_v33  ;;  %v1105_v9 = vsel %vm963_vm2, %v1099_v23, %v1100_v59  ;;  %v2424_v55 = vmul.f32 %v4037_v10, %v1067_v28  ;;  %v2429_v36 = vsel %vm68_vm6, %v385_v43, %v396_v30  ;;  %v4039_v33 = vld [vmem:[#allocation26_spill] sm:$0xff]  ;;  %v2448_v43 = vpop.permute.xlu2 %490 }
  0xb8   :  { %4036 = vst [vmem:[#allocation42_spill] sm:$0xff] %v2421_v32  ;;  %v2434_v0 = vmul.f32 %v4039_v33, %v1067_v28  ;;  %v2438_v34 = vsel %vm1819_vm4, %v1061_v24, 0.0  ;;  %v2446_v25 = vsel %vm81_vm7, %v2346_v22, %v1105_v9  ;;  %v2451_v30 = vmul.f32 %v1962_v38, %v350_v26 }
  0xb9   :  { %4038 = vst [vmem:[#allocation43_spill] sm:$0xff] %v2424_v55  ;;  %v2454_v28 = vmul.f32 %v1985_v52, %v350_v26  ;;  %v2457_v24 = vmul.f32 %v1994_v40, %v350_v26  ;;  %v2461_v59 = vmul.f32 %v4035_v17, %v2408_v5  ;;  %v444_v9 = vrot.slane %v2431_v20, 7 }
  0xba   :  { %4040 = vst [vmem:[#allocation44_spill] sm:$0xff] %v2434_v0  ;;  %v307_v0 = vadd.f32 %v303_v13, %v2283_v2  ;;  %v317_v55 = vadd.f32 %v313_v53, %v2319_v39  ;;  %v327_v26 = vadd.f32 %v323_v45, %v2322_v7  ;;  %v367_v32 = vmul.f32 %v1985_v52, %v351_v4 }
  0xbb   :  { %4041 = vst [vmem:[#allocation45_spill] sm:$0xff] %v2438_v34  ;;  %v377_v19 = vmul.f32 %v1994_v40, %v351_v4  ;;  %v4043_v15 = vrot.slane %v2328_v47, 7  ;;  %v4044_v39 = vrot.slane %v2328_v47, 1  ;;  %v4045_v13 = vrot.slane %v2431_v20, 1 }
  0xbc   :  { %4042 = vst [vmem:[#allocation46_spill] sm:$0xff] %v2461_v59  ;;  %v357_v59 = vmul.f32 %v1962_v38, %v351_v4  ;;  %v393_v53 = vrot.slane %v389_v6, 7  ;;  %v1102_v38 = vrot.slane %v389_v6, 1  ;;  %v371_v45 = vadd.f32 %v367_v32, %v317_v55 }
  0xbd   :  { %v450_v2 = vsel %vm230_vm0, %v444_v9, %v4043_v15  ;;  %v1151_v7 = vsel %vm963_vm2, %v4045_v13, %v4044_v39  ;;  %v2500_v4 = vstv %s2387_s28  ;;  %v2503_v31 = vstv %s2404_s29  ;;  %s3010_s28 = sld [smem:[#allocation7 + $0x35]] }
  0xbe   :  { %v2492_v40 = vsel %vm68_vm6, %v2328_v47, %v450_v2  ;;  %v2497_v52 = vsel %vm81_vm7, %v2431_v20, %v1151_v7  ;;  %v361_v15 = vadd.f32 %v357_v59, %v307_v0  ;;  %v2506_v39 = vstv %s2414_s30  ;;  %v441_v11 = vpop.permute.xlu0 %440  ;;  %s3017_s29 = sld [smem:[#allocation7 + $0x50]] }
  0xbf   :  { %v381_v2 = vadd.f32 %v377_v19, %v327_v26  ;;  %v4046_v13 = vrot.slane %v2137_v41, 7  ;;  %v397_v0 = vsel %vm230_vm0, %v393_v53, %v390_v21  ;;  %v4047_v32 = vrot.slane %v2137_v41, 1  ;;  %s3101_s30 = sld [smem:[#allocation7 + $0xb]] }
  0xc0   :  { %v1106_v59 = vsel %vm963_vm2, %v1102_v38, %v1099_v23  ;;  %v398_v19 = vsel %vm68_vm6, %v2346_v22, %v397_v0  ;;  %v2545_v0 = vstv %s2463_s5  ;;  %v2574_v35 = vstv %s2477_s8  ;;  %s3130_s5 = sld [smem:[#allocation7 + $0x41]] }
  0xc1   :  { %v394_v7 = vsel %vm230_vm0, %v4046_v13, %v393_v53  ;;  %v1103_v55 = vsel %vm963_vm2, %v4047_v32, %v1102_v38  ;;  %v1110_v21 = vsel %vm81_vm7, %v389_v6, %v1106_v59  ;;  %v2535_v53 = vstv %s2441_s4  ;;  %4051 = vst [vmem:[#allocation50_spill] sm:$0xff] %v2545_v0  ;;  %v2551_v32 = vpop.permute.xlu2 %496  ;;  %s3117_s4 = sld [smem:[#allocation7 + $0x26]] }
  0xc2   :  { %v401_v26 = vsel %vm68_vm6, %v389_v6, %v394_v7  ;;  %v2530_v13 = vsel %vm81_vm7, %v2137_v41, %v1103_v55  ;;  %4049 = vst [vmem:[#allocation48_spill] sm:$0xff] %v2535_v53  ;;  %v2542_v7 = vmul.f32 %v4037_v10, %v2408_v5  ;;  %v2548_v41 = vstv %s2465_s6  ;;  %v2553_v55 = vpop.permute.xlu1 %442  ;;  %s3209_s6 = sld [smem:[#allocation7 + $0x14]] }
  0xc3   :  { %4048 = vst [vmem:[#allocation47_spill] sm:$0xff] %v2530_v13  ;;  %v411_v23 = vmul.f32 %v2500_v4, %v401_v26  ;;  %v421_v38 = vmul.f32 %v2503_v31, %v401_v26  ;;  %v431_v22 = vmul.f32 %v2506_v39, %v401_v26  ;;  %v2568_v6 = vmul.f32 %v2535_v53, %v2412_v63  ;;  %s3235_s8 = sld [smem:[#allocation7 + $0x4a]] }
  0xc4   :  { %4050 = vst [vmem:[#allocation49_spill] sm:$0xff] %v2542_v7  ;;  %v2564_v7 = vmul.f32 %v4039_v33, %v2408_v5  ;;  %v2571_v13 = vstv %s2471_s7  ;;  %v2585_v5 = vmul.f32 %v2548_v41, %v2412_v63  ;;  %v402_v59 = vsel %vm2007_vm11, %v398_v19, 0.0  ;;  %s3223_s7 = sld [smem:[#allocation7 + $0x2f]] }
  0xc5   :  { %4052 = vst [vmem:[#allocation51_spill] sm:$0xff] %v2548_v41  ;;  %v2556_v60 = vadd.f32 %v411_v23, %v361_v15  ;;  %v2558_v26 = vadd.f32 %v421_v38, %v371_v45  ;;  %v2560_v8 = vadd.f32 %v431_v22, %v381_v2  ;;  %v2578_v15 = vmul.f32 %v2545_v0, %v2412_v63 }
  0xc6   :  { %4056 = vst [vmem:[#allocation55_spill] sm:$0xff] %v2564_v7  ;;  %v3927_v45 = vrot.slane %v2551_v32, 7  ;;  %v447_v23 = vrot.slane %v2553_v55, 7  ;;  %v2588_v38 = vstv %s2508_s9  ;;  %v4065_v7 = vrot.slane %v2448_v43, 1  ;;  %s3247_s9 = sld [smem:[#allocation7 + $0x3]] }
  0xc7   :  { %4053 = vst [vmem:[#allocation52_spill] sm:$0xff] %v2556_v60  ;;  %v4066_v63 = vrot.slane %v2551_v32, 1  ;;  %v360_v27 = vadd.f32 %v2451_v30, %v2226_v48  ;;  %v2628_v48 = vmul.f32 %v2500_v4, %v2429_v36  ;;  %v2632_v30 = vmul.f32 %v2503_v31, %v2429_v36 }
  0xc8   :  { %4054 = vst [vmem:[#allocation53_spill] sm:$0xff] %v2558_v26  ;;  %v451_v19 = vsel %vm230_vm0, %v447_v23, %v444_v9  ;;  %v4067_v9 = vrot.slane %v2431_v20, 1  ;;  %v2667_v49 = vmul.f32 %v2588_v38, %v2497_v52  ;;  %v2670_v50 = vmul.f32 %v2500_v4, %v402_v59 }
  0xc9   :  { %4055 = vst [vmem:[#allocation54_spill] sm:$0xff] %v2560_v8  ;;  %v380_v3 = vadd.f32 %v2457_v24, %v2241_v58  ;;  %v1147_v33 = vrot.slane %v441_v11, 1  ;;  %v2697_v57 = vstv %s2593_s10  ;;  %v2833_v29 = vstv %s2746_s17  ;;  %s3260_s10 = sld [smem:[#allocation7 + $0x1e]] }
  0xca   :  { %4057 = vst [vmem:[#allocation56_spill] sm:$0xff] %v2568_v6  ;;  %v1148_v6 = vrot.slane %v2553_v55, 1  ;;  %v2694_v58 = vpop.permute.xlu1 %494  ;;  %vm560_vm1 = vcmp.ge.s32.totalorder %v1699_v14, 63  ;;  %v3071_v37 = vstv %s2955_s1  ;;  %s3521_s17 = sld [smem:[#allocation7 + $0x4b]] }
  0xcb   :  { %4058 = vst [vmem:[#allocation57_spill] sm:$0xff] %v2571_v13  ;;  %s3622_s1 = sld [smem:[#allocation7 + $0x32]] }
  0xcc   :  { %4059 = vst [vmem:[#allocation58_spill] sm:$0xff] %v2574_v35 }
  0xcd   :  { %4060 = vst [vmem:[#allocation59_spill] sm:$0xff] %v2578_v15  ;;  %v4064_v15 = vrot.slane %v2448_v43, 7 }
  0xce   :  { %4061 = vst [vmem:[#allocation60_spill] sm:$0xff] %v2585_v5  ;;  %v1198_v5 = vsel %vm963_vm2, %v4066_v63, %v4065_v7  ;;  %v452_v7 = vsel %vm68_vm6, %v2431_v20, %v451_v19  ;;  %v1152_v63 = vsel %vm963_vm2, %v1148_v6, %v4067_v9  ;;  %v2645_v20 = vmul.f32 %v2535_v53, %v2446_v25 }
  0xcf   :  { %4062 = vst [vmem:[#allocation61_spill] sm:$0xff] %v2588_v38  ;;  %v505_v2 = vsel %vm230_vm0, %v3927_v45, %v4064_v15  ;;  %v1202_v45 = vsel %vm81_vm7, %v2551_v32, %v1198_v5  ;;  %v1156_v5 = vsel %vm81_vm7, %v2553_v55, %v1152_v63  ;;  %v2649_v19 = vmul.f32 %v2545_v0, %v2446_v25 }
  0xd0   :  { %v506_v15 = vsel %vm68_vm6, %v2448_v43, %v505_v2  ;;  %v2636_v2 = vmul.f32 %v2506_v39, %v2429_v36  ;;  %4068 = vst [vmem:[#allocation23_spill] sm:$0xff] %v2645_v20  ;;  %v2653_v9 = vmul.f32 %v2548_v41, %v2446_v25  ;;  %v2657_v36 = vmul.f32 %v2571_v13, %v2497_v52 }
  0xd1   :  { %4069 = vst [vmem:[#allocation62_spill] sm:$0xff] %v2649_v19  ;;  %v2663_v63 = vmul.f32 %v2574_v35, %v2497_v52  ;;  %v370_v25 = vadd.f32 %v2454_v28, %v2228_v12  ;;  %v420_v52 = vmul.f32 %v2503_v31, %v2398_v51  ;;  %v2690_v12 = vmul.f32 %v2506_v39, %v402_v59 }
  0xd2   :  { %4070 = vst [vmem:[#allocation63_spill] sm:$0xff] %v2653_v9  ;;  %v1114_v9 = vsel %vm2029_vm12, %v1110_v21, 0.0  ;;  %v446_v19 = vrot.slane %v441_v11, 7 }
  0xd3   :  { %4071 = vst [vmem:[#allocation64_spill] sm:$0xff] %v2657_v36  ;;  %v2687_v36 = vmul.f32 %v2503_v31, %v402_v59 }
  0xd4   :  { %4072 = vst [vmem:[#allocation65_spill] sm:$0xff] %v2663_v63  ;;  %v410_v63 = vmul.f32 %v2500_v4, %v2398_v51  ;;  %v424_v4 = vadd.f32 %v420_v52, %v370_v25  ;;  %v448_v31 = vsel %vm230_vm0, %v446_v19, %v447_v23  ;;  %v2727_v25 = vstv %s2641_s12  ;;  %s3417_s12 = sld [smem:[#allocation7 + $0xc]] }
  0xd5   :  { %4073 = vst [vmem:[#allocation66_spill] sm:$0xff] %v2667_v49  ;;  %v430_v49 = vmul.f32 %v2506_v39, %v2398_v51  ;;  %v2700_v51 = vstv %s2609_s11  ;;  %v4075_v39 = vrot.slane %v2328_v47, 7  ;;  %s3277_s11 = sld [smem:[#allocation7 + $0x39]] }
  0xd6   :  { %v414_v24 = vadd.f32 %v410_v63, %v360_v27  ;;  %v4076_v27 = vrot.slane %v2328_v47, 1  ;;  %v2721_v63 = vpop.permute.xlu2 %548 }
  0xd7   :  { %v434_v20 = vadd.f32 %v430_v49, %v380_v3  ;;  %v449_v21 = vsel %vm230_vm0, %v4075_v39, %v446_v19  ;;  %v2713_v3 = vsel %vm68_vm6, %v2553_v55, %v448_v31  ;;  %v1149_v49 = vsel %vm963_vm2, %v1147_v33, %v1148_v6  ;;  %v493_v6 = vpop.permute.xlu0 %492 }
  0xd8   :  { %v454_v59 = vsel %vm68_vm6, %v441_v11, %v449_v21  ;;  %v1150_v23 = vsel %vm963_vm2, %v4076_v27, %v1147_v33  ;;  %v2724_v19 = vmul.f32 %v2535_v53, %v1114_v9  ;;  %v2734_v31 = vmul.f32 %v2545_v0, %v1114_v9 }
  0xd9   :  { %v464_v52 = vmul.f32 %v2697_v57, %v454_v59  ;;  %v474_v55 = vmul.f32 %v2700_v51, %v454_v59  ;;  %v484_v33 = vmul.f32 %v2727_v25, %v454_v59  ;;  %v2740_v39 = vsel %vm81_vm7, %v2328_v47, %v1150_v23 }
  0xda   :  { %4077 = vst [vmem:[#allocation27_spill] sm:$0xff] %v2724_v19  ;;  %v2744_v21 = vsel %vm81_vm7, %v441_v11, %v1149_v49  ;;  %v2749_v27 = vstv %s2659_s13  ;;  %v1206_v53 = vsel %vm2029_vm12, %v1202_v45, 0.0  ;;  %v2760_v47 = vmul.f32 %v2548_v41, %v1114_v9  ;;  %s3443_s13 = sld [smem:[#allocation7 + $0x27]] }
  0xdb   :  { %4078 = vst [vmem:[#allocation67_spill] sm:$0xff] %v2734_v31  ;;  %v2753_v0 = vadd.f32 %v464_v52, %v414_v24  ;;  %v2755_v31 = vadd.f32 %v474_v55, %v424_v4  ;;  %v2763_v59 = vstv %s2672_s14  ;;  %v2766_v11 = vstv %s2676_s15  ;;  %s3454_s14 = sld [smem:[#allocation7 + $0x42]] }
  0xdc   :  { %4079 = vst [vmem:[#allocation68_spill] sm:$0xff] %v2740_v39  ;;  %v2768_v49 = vadd.f32 %v484_v33, %v434_v20  ;;  %v2772_v23 = vsel %vm2007_vm11, %v506_v15, 0.0  ;;  %v456_v45 = vsel %vm2007_vm11, %v452_v7, 0.0  ;;  %v500_v24 = vrot.slane %v2694_v58, 7  ;;  %s3488_s15 = sld [smem:[#allocation7 + $0x15]] }
  0xdd   :  { %4080 = vst [vmem:[#allocation69_spill] sm:$0xff] %v2749_v27  ;;  %v1193_v4 = vrot.slane %v2694_v58, 1  ;;  %v2779_v9 = vmul.f32 %v2749_v27, %v1206_v53  ;;  %v1160_v52 = vsel %vm2029_vm12, %v1156_v5, 0.0  ;;  %v413_v20 = vadd.f32 %v2628_v48, %v2364_v1  ;;  %v2799_v1 = vpop.permute.xlu1 %546 }
  0xde   :  { %4081 = vst [vmem:[#allocation70_spill] sm:$0xff] %v2760_v47  ;;  %v423_v15 = vadd.f32 %v2632_v30, %v2366_v62  ;;  %v4085_v55 = vrot.slane %v2551_v32, 7  ;;  %v4086_v33 = vrot.slane %v2551_v32, 1  ;;  %v433_v41 = vadd.f32 %v2636_v2, %v2370_v46  ;;  %v2824_v19 = vpop.permute.xlu2 %601 }
  0xdf   :  { %4082 = vst [vmem:[#allocation71_spill] sm:$0xff] %v2763_v59  ;;  %v463_v5 = vmul.f32 %v2697_v57, %v2492_v40  ;;  %v473_v46 = vmul.f32 %v2700_v51, %v2492_v40  ;;  %v483_v30 = vmul.f32 %v2727_v25, %v2492_v40  ;;  %v2816_v2 = vmul.f32 %v2763_v59, %v1206_v53 }
  0xe0   :  { %4083 = vst [vmem:[#allocation72_spill] sm:$0xff] %v2766_v11  ;;  %v502_v7 = vsel %vm230_vm0, %v500_v24, %v4085_v55  ;;  %v1195_v39 = vsel %vm963_vm2, %v1193_v4, %v4086_v33  ;;  %v2819_v55 = vmul.f32 %v2766_v11, %v1206_v53  ;;  %v1192_v47 = vrot.slane %v493_v6, 1  ;;  %v2838_v53 = vpop.permute.xlu0 %544 }
  0xe1   :  { %4084 = vst [vmem:[#allocation73_spill] sm:$0xff] %v2779_v9  ;;  %v2804_v62 = vsel %vm68_vm6, %v2551_v32, %v502_v7  ;;  %v2809_v48 = vsel %vm81_vm7, %v2694_v58, %v1195_v39  ;;  %v2822_v32 = vmul.f32 %v2571_v13, %v1160_v52  ;;  %v467_v7 = vadd.f32 %v463_v5, %v413_v20 }
  0xe2   :  { %4087 = vst [vmem:[#allocation74_spill] sm:$0xff] %v2804_v62  ;;  %v477_v33 = vadd.f32 %v473_v46, %v423_v15  ;;  %v487_v9 = vadd.f32 %v483_v30, %v433_v41  ;;  %v499_v39 = vrot.slane %v493_v6, 7  ;;  %v2827_v61 = vmul.f32 %v2574_v35, %v1160_v52 }
  0xe3   :  { %4088 = vst [vmem:[#allocation75_spill] sm:$0xff] %v2816_v2  ;;  %v2830_v40 = vstv %s2731_s16  ;;  %v2836_v2 = vstv %s2757_s18  ;;  %v4092_v41 = vrot.slane %v2448_v43, 7  ;;  %v1196_v5 = vsel %vm963_vm2, %v1192_v47, %v1193_v4  ;;  %s3515_s16 = sld [smem:[#allocation7 + $0x30]] }
  0xe4   :  { %4089 = vst [vmem:[#allocation76_spill] sm:$0xff] %v2819_v55  ;;  %v503_v20 = vsel %vm230_vm0, %v499_v39, %v500_v24  ;;  %v4093_v46 = vrot.slane %v2448_v43, 1  ;;  %v2864_v4 = vsel %vm81_vm7, %v493_v6, %v1196_v5  ;;  %v553_v5 = vrot.slane %v2799_v1, 7  ;;  %s3566_s18 = sld [smem:[#allocation7 + $0x5]] }
  0xe5   :  { %4090 = vst [vmem:[#allocation77_spill] sm:$0xff] %v2822_v32  ;;  %v504_v15 = vsel %vm230_vm0, %v4092_v41, %v499_v39  ;;  %v2857_v24 = vsel %vm68_vm6, %v2694_v58, %v503_v20  ;;  %v4095_v41 = vand.u32 63, %v1699_v14  ;;  %v3115_v62 = vstv %s2998_s27  ;;  %s3640_s27 = sld [smem:[#allocation7 + $0x21]] }
  0xe6   :  { %4091 = vst [vmem:[#allocation78_spill] sm:$0xff] %v2827_v61  ;;  %v1197_v30 = vsel %vm963_vm2, %v4093_v46, %v1192_v47  ;;  %v507_v55 = vsel %vm68_vm6, %v493_v6, %v504_v15  ;;  %v2873_v15 = vmul.f32 %v2588_v38, %v1160_v52  ;;  %v2884_v6 = vmul.f32 %v2700_v51, %v456_v45 }
  0xe7   :  { %v1199_v39 = vsel %vm81_vm7, %v2448_v43, %v1197_v30  ;;  %4094 = vst [vmem:[#allocation79_spill] sm:$0xff] %v2864_v4  ;;  %vm2868_vm15 = vcmp.ne.s32.totalorder %v4095_v41, 63  ;;  %v517_v58 = vmul.f32 %v2830_v40, %v507_v55  ;;  %v527_v20 = vmul.f32 %v2833_v29, %v507_v55 }
  0xe8   :  { %4098 = vst [vmem:[#allocation80_spill] sm:$0xff] %v2873_v15  ;;  %v537_v46 = vmul.f32 %v2836_v2, %v507_v55  ;;  %v2881_v43 = vmul.f32 %v2697_v57, %v456_v45  ;;  %v2891_v52 = vmul.f32 %v2727_v25, %v456_v45  ;;  %v2903_v15 = vmul.f32 %v2697_v57, %v2713_v3  ;;  %v2910_v45 = vpop.permute.xlu1 %599  ;;  %vm3094_vm6 = vmand %vm2029_vm12, %vm2868_vm15 }
  0xe9   :  { %4099 = vst [vmem:[#allocation81_spill] sm:$0xff] %v2884_v6  ;;  %v2893_v41 = vadd.f32 %v517_v58, %v467_v7  ;;  %v2895_v55 = vadd.f32 %v527_v20, %v477_v33  ;;  %v1238_v30 = vrot.slane %v2799_v1, 1  ;;  %v1237_v57 = vrot.slane %v2838_v53, 1 }
  0xea   :  { %4100 = vst [vmem:[#allocation82_spill] sm:$0xff] %v2891_v52  ;;  %v2897_v4 = vadd.f32 %v537_v46, %v487_v9  ;;  %v2914_v9 = vmul.f32 %v2700_v51, %v2713_v3  ;;  %v2923_v33 = vmul.f32 %v2727_v25, %v2713_v3  ;;  %v2927_v58 = vmul.f32 %v2571_v13, %v2744_v21 }
  0xeb   :  { %4101 = vst [vmem:[#allocation83_spill] sm:$0xff] %v2903_v15  ;;  %v4105_v20 = vrot.slane %v2721_v63, 7  ;;  %v4106_v46 = vrot.slane %v2721_v63, 1  ;;  %v2941_v3 = vmul.f32 %v2574_v35, %v2744_v21  ;;  %v2959_v35 = vmul.f32 %v2588_v38, %v2744_v21 }
  0xec   :  { %4102 = vst [vmem:[#allocation84_spill] sm:$0xff] %v2914_v9  ;;  %v2976_v21 = vmul.f32 %v2763_v59, %v2809_v48  ;;  %v2980_v38 = vmul.f32 %v2766_v11, %v2809_v48  ;;  %v4130_v17 = vrot.slane %v2910_v45, 7  ;;  %v3206_v15 = vstv %s3101_s30 }
  0xed   :  { %4103 = vst [vmem:[#allocation85_spill] sm:$0xff] %v2923_v33  ;;  %v557_v51 = vsel %vm230_vm0, %v553_v5, %v4105_v20  ;;  %v1242_v7 = vsel %vm963_vm2, %v1238_v30, %v4106_v46  ;;  %v1243_v20 = vsel %vm963_vm2, %v1237_v57, %v1238_v30  ;;  %v2953_v46 = vpop.permute.xlu2 %653  ;;  %v3128_v33 = vstv %s3017_s29  ;;  %v4236_v14 = vld [vmem:[#allocation78_spill] sm:$0xff]  ;;  %s1594_s29 = smov [#allocation9]  }
  0xee   :  { %4104 = vst [vmem:[#allocation86_spill] sm:$0xff] %v2927_v58  ;;  %v563_v25 = vsel %vm560_vm1, %v2721_v63, %v557_v51  ;;  %v2949_v13 = vsel %vm1245_vm5, %v2799_v1, %v1242_v7  ;;  %v2963_v51 = vmul.f32 %v2749_v27, %v2809_v48  ;;  %v4111_v7 = vrot.slane %v2838_v53, 7  ;;  %s1394_s30 = sshll.u32 %s1594_s29, 4  ;;  %s1395_s30 = int_to_ptr.vmem [resolvable:$true] %s1394_s30 }
  0xef   :  { %4107 = vst [vmem:[#allocation87_spill] sm:$0xff] %v2941_v3  ;;  %v551_v3 = vpop.permute.xlu0 %550  ;;  %v3001_v48 = vmul.f32 %v2766_v11, %v1199_v39  ;;  %v3020_v58 = vstv %s2908_s24  ;;  %v3037_v11 = vstv %s2919_s0  ;;  %v526_v22 = vmul.f32 %v2833_v29, %v2772_v23  ;;  %s3605_s24 = sld [smem:[#allocation7 + $0x29]] }
  0xf0   :  { %4108 = vst [vmem:[#allocation88_spill] sm:$0xff] %v2949_v13  ;;  %v558_v30 = vsel %vm230_vm0, %v4111_v7, %v553_v5  ;;  %v1246_v13 = vsel %vm1245_vm5, %v2838_v53, %v1243_v20  ;;  %v2987_v5 = vmul.f32 %v2749_v27, %v1199_v39  ;;  %v2990_v20 = vmul.f32 %v2763_v59, %v1199_v39  ;;  %s3609_s0 = sld [smem:[#allocation7 + $0x44]] }
  0xf1   :  { %4109 = vst [vmem:[#allocation89_spill] sm:$0xff] %v2959_v35  ;;  %v2993_v7 = vstv %s2878_s19  ;;  %v562_v35 = vsel %vm560_vm1, %v2799_v1, %v558_v30  ;;  %v3945_v27 = vrot.slane %v2910_v45, 1  ;;  %v1250_v59 = vsel %vm2868_vm15, %v1246_v13, 0.0  ;;  %s3572_s19 = sld [smem:[#allocation7 + $0x20]] }
  0xf2   :  { %4110 = vst [vmem:[#allocation90_spill] sm:$0xff] %v2963_v51  ;;  %v3004_v51 = vstv %s2899_s23  ;;  %v4121_v1 = vrot.slane %v2824_v19, 1  ;;  %v555_v61 = vrot.slane %v551_v3, 7  ;;  %v1240_v13 = vrot.slane %v551_v3, 1  ;;  %s3594_s23 = sld [smem:[#allocation7 + $0xe]] }
  0xf3   :  { %4112 = vst [vmem:[#allocation91_spill] sm:$0xff] %v2976_v21  ;;  %v2996_v21 = vstv %s2888_s22  ;;  %v3034_v39 = vsel %vm2868_vm15, %v562_v35, 0.0  ;;  %v3062_v10 = vmul.f32 %v3004_v51, %v1250_v59  ;;  %s3580_s22 = sld [smem:[#allocation7 + $0x3b]] }
  0xf4   :  { %4113 = vst [vmem:[#allocation92_spill] sm:$0xff] %v2980_v38  ;;  %v1290_v30 = vsel %vm963_vm2, %v3945_v27, %v4121_v1  ;;  %v3030_v38 = vsel %vm2868_vm15, %v563_v25, 0.0  ;;  %v3045_v1 = vmul.f32 %v2993_v7, %v1250_v59  ;;  %v3048_v27 = vstv %s2937_s25  ;;  %s3613_s25 = sld [smem:[#allocation7 + $0x17]] }
  0xf5   :  { %4114 = vst [vmem:[#allocation93_spill] sm:$0xff] %v2987_v5  ;;  %v1292_v32 = vsel %vm1245_vm5, %v2910_v45, %v1290_v30  ;;  %v4125_v25 = vrot.slane %v2721_v63, 7  ;;  %v3059_v30 = vmul.f32 %v2996_v21, %v1250_v59  ;;  %v1244_v59 = vsel %vm963_vm2, %v1240_v13, %v1237_v57 }
  0xf6   :  { %4115 = vst [vmem:[#allocation94_spill] sm:$0xff] %v2990_v20  ;;  %v4126_v20 = vrot.slane %v2721_v63, 1  ;;  %v1249_v57 = vsel %vm1245_vm5, %v551_v3, %v1244_v59 }
  0xf7   :  { %4116 = vst [vmem:[#allocation95_spill] sm:$0xff] %v2993_v7  ;;  %v556_v35 = vsel %vm230_vm0, %v4125_v25, %v555_v61  ;;  %v1296_v25 = vsel %vm2868_vm15, %v1292_v32, 0.0 }
  0xf8   :  { %4117 = vst [vmem:[#allocation96_spill] sm:$0xff] %v2996_v21  ;;  %v1241_v5 = vsel %vm963_vm2, %v4126_v20, %v1240_v13  ;;  %v564_v20 = vsel %vm560_vm1, %v551_v3, %v556_v35  ;;  %v4134_v35 = vrot.slane %v2838_v53, 7  ;;  %v3120_v3 = vmul.f32 %v3020_v58, %v1296_v25 }
  0xf9   :  { %4118 = vst [vmem:[#allocation97_spill] sm:$0xff] %v3001_v48  ;;  %v3042_v48 = vpop.permute.xlu1 %605  ;;  %v568_v56 = vsel %vm2868_vm15, %v564_v20, 0.0  ;;  %v3136_v20 = vmul.f32 %v3048_v27, %v1296_v25 }
  0xfa   :  { %4119 = vst [vmem:[#allocation98_spill] sm:$0xff] %v3004_v51  ;;  %v559_v28 = vsel %vm230_vm0, %v555_v61, %v4134_v35  ;;  %v3133_v61 = vmul.f32 %v3037_v11, %v1296_v25  ;;  %v1253_v35 = vsel %vm3094_vm6, %v1249_v57, 0.0  ;;  %v3150_v9 = vmul.f32 %v3071_v37, %v568_v56 }
  0xfb   :  { %4120 = vst [vmem:[#allocation99_spill] sm:$0xff] %v3020_v58  ;;  %v3147_v8 = vsel %vm560_vm1, %v2838_v53, %v559_v28  ;;  %v1287_v25 = vrot.slane %v3042_v48, 1  ;;  %v3164_v53 = vmul.f32 %v2993_v7, %v1253_v35 }
  0xfc   :  { %4122 = vst [vmem:[#allocation100_spill] sm:$0xff] %v3037_v11 }
  0xfd   :  { %4123 = vst [vmem:[#allocation101_spill] sm:$0xff] %v3045_v1  ;;  %v4129_v1 = vrot.slane %v2824_v19, 7 }
  0xfe   :  { %4124 = vst [vmem:[#allocation102_spill] sm:$0xff] %v3048_v27 }
  0xff   :  { %4127 = vst [vmem:[#allocation103_spill] sm:$0xff] %v3059_v30  ;;  %v613_v34 = vsel %vm230_vm0, %v4130_v17, %v4129_v1  ;;  %v3082_v30 = vpop.permute.xlu2 %659  ;;  %v3085_v17 = vstv %s2972_s2  ;;  %v3088_v1 = vstv %s2984_s26  ;;  %s3629_s2 = sld [smem:[#allocation7 + $0x6]] }
 0x100   :  { %4128 = vst [vmem:[#allocation104_spill] sm:$0xff] %v3062_v10  ;;  %v1248_v10 = vsel %vm1245_vm5, %v2721_v63, %v1241_v5  ;;  %v1333_v63 = vrot.slane %v3082_v30, 1  ;;  %v604_v5 = vpop.permute.xlu0 %603  ;;  %v3106_v13 = vsel %vm560_vm1, %v2824_v19, %v613_v34  ;;  %v3125_v34 = vstv %s3010_s28  ;;  %s3634_s26 = sld [smem:[#allocation7 + $0x4d]] }
 0x101   :  { %4131 = vst [vmem:[#allocation105_spill] sm:$0xff] %v3082_v30  ;;  %v1252_v59 = vsel %vm2868_vm15, %v1248_v10, 0.0  ;;  %v3158_v57 = vmul.f32 %v3088_v1, %v568_v56  ;;  %v609_v26 = vrot.slane %v604_v5, 7  ;;  %s3644_s28 = sld [smem:[#allocation7 + $0x3c]] }
 0x102   :  { %4135 = vst [vmem:[#allocation106_spill] sm:$0xff] %v3115_v62  ;;  %v3167_v28 = vmul.f32 %v2996_v21, %v1252_v59 }
 0x103   :  { %4136 = vst [vmem:[#allocation107_spill] sm:$0xff] %v3120_v3  ;;  %v4141_v3 = vrot.slane %v2953_v46, 1 }
 0x104   :  { %4137 = vst [vmem:[#allocation108_spill] sm:$0xff] %v3125_v34 }
 0x105   :  { %4138 = vst [vmem:[#allocation109_spill] sm:$0xff] %v3128_v33  ;;  %v1337_v10 = vsel %vm963_vm2, %v1333_v63, %v4141_v3  ;;  %v3161_v3 = vmul.f32 %v2993_v7, %v1252_v59  ;;  %v4150_v7 = vrot.slane %v2910_v45, 1 }
 0x106   :  { %4139 = vst [vmem:[#allocation110_spill] sm:$0xff] %v3133_v61  ;;  %v664_v61 = vrot.slane %v3082_v30, 7 }
 0x107   :  { %4140 = vst [vmem:[#allocation111_spill] sm:$0xff] %v3136_v20  ;;  %v3155_v20 = vmul.f32 %v3085_v17, %v568_v56  ;;  %v3173_v56 = vpop.permute.xlu1 %657 }
 0x108   :  { %4142 = vst [vmem:[#allocation112_spill] sm:$0xff] %v3150_v9  ;;  %v1341_v9 = vsel %vm1245_vm5, %v3082_v30, %v1337_v10  ;;  %v3190_v30 = vmul.f32 %v3004_v51, %v1253_v35  ;;  %v656_v60 = vpop.permute.xlu0 %655  ;;  %v663_v32 = vrot.slane %v3173_v56, 7 }
 0x109   :  { %4143 = vst [vmem:[#allocation113_spill] sm:$0xff] %v3155_v20  ;;  %v610_v20 = vrot.slane %v3042_v48, 7 }
 0x10a   :  { %4144 = vst [vmem:[#allocation114_spill] sm:$0xff] %v3158_v57  ;;  %v3179_v57 = vmul.f32 %v3004_v51, %v1252_v59  ;;  %v3216_v51 = vstv %s3117_s4 }
 0x10b   :  { %4145 = vst [vmem:[#allocation115_spill] sm:$0xff] %v3161_v3  ;;  %v3176_v3 = vmul.f32 %v2996_v21, %v1253_v35  ;;  %v1332_v35 = vrot.slane %v3173_v56, 1 }
 0x10c   :  { %4146 = vst [vmem:[#allocation116_spill] sm:$0xff] %v3164_v53  ;;  %v4151_v53 = vrot.slane %v2824_v19, 7 }
 0x10d   :  { %4147 = vst [vmem:[#allocation117_spill] sm:$0xff] %v3167_v28  ;;  %v1291_v28 = vsel %vm963_vm2, %v1287_v25, %v4150_v7 }
 0x10e   :  { %4148 = vst [vmem:[#allocation118_spill] sm:$0xff] %v3176_v3  ;;  %v612_v10 = vsel %vm230_vm0, %v4151_v53, %v609_v26  ;;  %v1295_v21 = vsel %vm1245_vm5, %v3042_v48, %v1291_v28  ;;  %v4153_v3 = vrot.slane %v2953_v46, 7  ;;  %v1345_v53 = vsel %vm3094_vm6, %v1341_v9, 0.0 }
 0x10f   :  { %4149 = vst [vmem:[#allocation119_spill] sm:$0xff] %v3179_v57  ;;  %v617_v59 = vsel %vm560_vm1, %v604_v5, %v612_v10  ;;  %v1286_v57 = vrot.slane %v604_v5, 1  ;;  %v4155_v28 = vrot.slane %v2910_v45, 7  ;;  %v1299_v9 = vsel %vm3094_vm6, %v1295_v21, 0.0 }
 0x110   :  { %4152 = vst [vmem:[#allocation120_spill] sm:$0xff] %v3190_v30  ;;  %v3201_v7 = vsel %vm230_vm0, %v664_v61, %v4153_v3  ;;  %v3219_v30 = vstv %s3130_s5  ;;  %v611_v3 = vsel %vm230_vm0, %v609_v26, %v610_v20 }
 0x111   :  { %4154 = vst [vmem:[#allocation121_spill] sm:$0xff] %v3201_v7  ;;  %v614_v10 = vsel %vm230_vm0, %v610_v20, %v4155_v28  ;;  %v621_v7 = vsel %vm2868_vm15, %v617_v59, 0.0  ;;  %v1288_v52 = vsel %vm963_vm2, %v1286_v57, %v1287_v25  ;;  %v4156_v28 = vrot.slane %v2824_v19, 1 }
 0x112   :  { %v1294_v21 = vsel %vm1245_vm5, %v604_v5, %v1288_v52  ;;  %v1334_v20 = vsel %vm963_vm2, %v1332_v35, %v1333_v63  ;;  %v3250_v25 = vmul.f32 %v3115_v62, %v1345_v53  ;;  %v3263_v52 = vmul.f32 %v3128_v33, %v1345_v53 }
 0x113   :  { %v1289_v6 = vsel %vm963_vm2, %v4156_v28, %v1286_v57  ;;  %v3253_v57 = vmul.f32 %v3125_v34, %v1345_v53  ;;  %v3268_v63 = vsel %vm560_vm1, %v2910_v45, %v614_v10  ;;  %v3273_v5 = vsel %vm560_vm1, %v3042_v48, %v611_v3 }
 0x114   :  { %v3240_v26 = vsel %vm1245_vm5, %v2824_v19, %v1289_v6  ;;  %4158 = vst [vmem:[#allocation123_spill] sm:$0xff] %v3250_v25  ;;  %v3258_v19 = vsel %vm1245_vm5, %v3173_v56, %v1334_v20  ;;  %v662_v6 = vrot.slane %v656_v60, 7  ;;  %v1298_v59 = vsel %vm2868_vm15, %v1294_v21, 0.0 }
 0x115   :  { %4157 = vst [vmem:[#allocation122_spill] sm:$0xff] %v3240_v26  ;;  %v3280_v53 = vmul.f32 %v3020_v58, %v1299_v9  ;;  %v3283_v28 = vmul.f32 %v3037_v11, %v1299_v9  ;;  %v3286_v45 = vmul.f32 %v3048_v27, %v1299_v9  ;;  %v627_v10 = vmul.f32 %v3206_v15, %v621_v7 }
 0x116   :  { %4159 = vst [vmem:[#allocation124_spill] sm:$0xff] %v3253_v57  ;;  %v637_v48 = vmul.f32 %v3216_v51, %v621_v7  ;;  %v647_v3 = vmul.f32 %v3219_v30, %v621_v7  ;;  %v3293_v21 = vsel %vm230_vm0, %v663_v32, %v664_v61  ;;  %v4165_v20 = vrot.slane %v2953_v46, 7 }
 0x117   :  { %4160 = vst [vmem:[#allocation125_spill] sm:$0xff] %v3258_v19  ;;  %v3300_v19 = vmul.f32 %v3020_v58, %v1298_v59  ;;  %v3303_v9 = vmul.f32 %v3037_v11, %v1298_v59  ;;  %v1331_v7 = vrot.slane %v656_v60, 1  ;;  %v3308_v57 = vmul.f32 %v3048_v27, %v1298_v59  ;;  %v712_v58 = vpop.permute.xlu2 %711 }
 0x118   :  { %4161 = vst [vmem:[#allocation126_spill] sm:$0xff] %v3263_v52  ;;  %v667_v26 = vsel %vm230_vm0, %v4165_v20, %v662_v6  ;;  %v666_v61 = vsel %vm230_vm0, %v662_v6, %v663_v32  ;;  %v3313_v25 = vstv %s3209_s6  ;;  %v3316_v20 = vstv %s3223_s7  ;;  %vm3423_vm0 = vmand %vm2007_vm11, %vm2868_vm15  ;;  %s1396_s6 = sshll.u32 %s3897_s3, 4  ;;  %s1397_s6 = int_to_ptr.hbm [resolvable:$true] %s1396_s6 }
 0x119   :  { %4162 = vst [vmem:[#allocation127_spill] sm:$0xff] %v3280_v53  ;;  %v670_v52 = vsel %vm560_vm1, %v656_v60, %v667_v26  ;;  %v1335_v26 = vsel %vm963_vm2, %v1331_v7, %v1332_v35  ;;  %v4169_v59 = vrot.slane %v2953_v46, 1  ;;  %v518_v32 = vmul.f32 %v2830_v40, %v2857_v24 }
 0x11a   :  { %4163 = vst [vmem:[#allocation128_spill] sm:$0xff] %v3283_v28  ;;  %v674_v11 = vsel %vm2868_vm15, %v670_v52, 0.0  ;;  %v528_v52 = vmul.f32 %v2833_v29, %v2857_v24  ;;  %v538_v35 = vmul.f32 %v2836_v2, %v2857_v24  ;;  %v671_v28 = vsel %vm560_vm1, %v3173_v56, %v666_v61 }
 0x11b   :  { %4164 = vst [vmem:[#allocation129_spill] sm:$0xff] %v3286_v45  ;;  %v1336_v27 = vsel %vm963_vm2, %v4169_v59, %v1331_v7  ;;  %v3342_v7 = vstv %s3235_s8  ;;  %v522_v59 = vadd.f32 %v518_v32, %v2753_v0  ;;  %v593_v45 = vmul.f32 %v3088_v1, %v3030_v38 }
 0x11c   :  { %4166 = vst [vmem:[#allocation130_spill] sm:$0xff] %v3300_v19  ;;  %v1338_v6 = vsel %vm1245_vm5, %v2953_v46, %v1336_v27  ;;  %v573_v27 = vmul.f32 %v3071_v37, %v3030_v38  ;;  %v532_v0 = vadd.f32 %v528_v52, %v2755_v31  ;;  %v542_v32 = vadd.f32 %v538_v35, %v2768_v49 }
 0x11d   :  { %4167 = vst [vmem:[#allocation131_spill] sm:$0xff] %v3303_v9  ;;  %v1342_v16 = vsel %vm2868_vm15, %v1338_v6, 0.0  ;;  %v572_v31 = vmul.f32 %v3071_v37, %v3034_v39  ;;  %v582_v49 = vmul.f32 %v3085_v17, %v3034_v39 }
 0x11e   :  { %4168 = vst [vmem:[#allocation132_spill] sm:$0xff] %v3308_v57  ;;  %v3333_v57 = vsel %vm1245_vm5, %v656_v60, %v1335_v26  ;;  %v3348_v9 = vmul.f32 %v3115_v62, %v1342_v16  ;;  %v3351_v60 = vstv %s3247_s9  ;;  %v3354_v26 = vstv %s3260_s10 }
 0x11f   :  { %4170 = vst [vmem:[#allocation133_spill] sm:$0xff] %v3333_v57  ;;  %v3357_v57 = vstv %s3277_s11  ;;  %v3360_v24 = vmul.f32 %v3125_v34, %v1342_v16  ;;  %v3363_v6 = vmul.f32 %v3128_v33, %v1342_v16  ;;  %v577_v19 = vadd.f32 %v573_v27, %v522_v59  ;;  %v710_v27 = vpop.permute.xlu1 %709  ;;  %v3383_v33 = vpop.permute.xlu0 %707 }
 0x120   :  { %4171 = vst [vmem:[#allocation134_spill] sm:$0xff] %v3348_v9  ;;  %v583_v62 = vmul.f32 %v3085_v17, %v3030_v38  ;;  %v675_v34 = vsel %vm2868_vm15, %v671_v28, 0.0  ;;  %v717_v16 = vsel %vm1819_vm4, %v712_v58, 0.0  ;;  %v597_v35 = vadd.f32 %v593_v45, %v542_v32  ;;  %v3390_v45 = vpop.permute.xlu2 %751 }
 0x121   :  { %4172 = vst [vmem:[#allocation135_spill] sm:$0xff] %v3360_v24  ;;  %v631_v59 = vadd.f32 %v627_v10, %v577_v19  ;;  %v681_v38 = vmul.f32 %v3313_v25, %v675_v34  ;;  %v691_v56 = vmul.f32 %v3316_v20, %v675_v34  ;;  %v701_v28 = vmul.f32 %v3342_v7, %v675_v34 }
 0x122   :  { %4173 = vst [vmem:[#allocation136_spill] sm:$0xff] %v3363_v6  ;;  %v587_v52 = vadd.f32 %v583_v62, %v532_v0  ;;  %v723_v58 = vmul.f32 %v3351_v60, %v717_v16  ;;  %v733_v61 = vmul.f32 %v3354_v26, %v717_v16  ;;  %v651_v6 = vadd.f32 %v647_v3, %v597_v35 }
 0x123   :  { %v685_v24 = vadd.f32 %v681_v38, %v631_v59  ;;  %v743_v62 = vmul.f32 %v3357_v57, %v717_v16  ;;  %v576_v19 = vadd.f32 %v572_v31, %v2893_v41  ;;  %v586_v10 = vadd.f32 %v582_v49, %v2895_v55 }
 0x124   :  { %v641_v53 = vadd.f32 %v637_v48, %v587_v52  ;;  %v592_v0 = vmul.f32 %v3088_v1, %v3034_v39  ;;  %v620_v34 = vsel %vm2868_vm15, %v3106_v13, 0.0  ;;  %v705_v9 = vadd.f32 %v701_v28, %v651_v6 }
 0x125   :  { %v3399_v48 = vadd.f32 %v723_v58, %v685_v24  ;;  %v626_v3 = vmul.f32 %v3206_v15, %v620_v34  ;;  %v636_v52 = vmul.f32 %v3216_v51, %v620_v34  ;;  %v646_v41 = vmul.f32 %v3219_v30, %v620_v34 }
 0x126   :  { %v695_v32 = vadd.f32 %v691_v56, %v641_v53  ;;  %v596_v16 = vadd.f32 %v592_v0, %v2897_v4  ;;  %v680_v55 = vmul.f32 %v3313_v25, %v674_v11  ;;  %v3408_v39 = vadd.f32 %v743_v62, %v705_v9 }
 0x127   :  { %v630_v49 = vadd.f32 %v626_v3, %v576_v19  ;;  %v690_v13 = vmul.f32 %v3316_v20, %v674_v11  ;;  %v640_v53 = vadd.f32 %v636_v52, %v586_v10  ;;  %v700_v6 = vmul.f32 %v3342_v7, %v674_v11  ;;  %v4178_v10 = vld [vmem:[#allocation33_spill] sm:$0xff]  ;;  %v3439_v3 = vpop.permute.xlu0 %713 }
 0x128   :  { %v3406_v31 = vadd.f32 %v733_v61, %v695_v32  ;;  %v650_v24 = vadd.f32 %v646_v41, %v596_v16  ;;  %v716_v4 = vsel %vm1819_vm4, %v710_v27, 0.0  ;;  %v4176_v27 = vld [vmem:[#allocation31_spill] sm:$0xff]  ;;  %v4177_v61 = vld [vmem:[#allocation32_spill] sm:$0xff]  ;;  %v378_v0 = vadd.f32 %v4178_v10, %v2195_v44  ;;  %v750_v32 = vpop.permute.xlu1 %749 }
 0x129   :  { %v684_v35 = vadd.f32 %v680_v55, %v630_v49  ;;  %v722_v59 = vmul.f32 %v3351_v60, %v716_v4  ;;  %v732_v38 = vmul.f32 %v3354_v26, %v716_v4  ;;  %v742_v56 = vmul.f32 %v3357_v57, %v716_v4 }
 0x12a   :  { %v694_v9 = vadd.f32 %v690_v13, %v640_v53  ;;  %v704_v28 = vadd.f32 %v700_v6, %v650_v24  ;;  %v358_v58 = vadd.f32 %v4176_v27, %v2191_v18  ;;  %v368_v62 = vadd.f32 %v4177_v61, %v2193_v42  ;;  %v4179_v13 = vld [vmem:[#allocation81_spill] sm:$0xff]  ;;  %v4180_v24 = vld [vmem:[#allocation82_spill] sm:$0xff] }
 0x12b   :  { %v3431_v19 = vadd.f32 %v722_v59, %v684_v35  ;;  %v516_v34 = vmul.f32 %v2830_v40, %v2772_v23  ;;  %v432_v41 = vadd.f32 %v2690_v12, %v378_v0  ;;  %v536_v44 = vmul.f32 %v2836_v2, %v2772_v23 }
 0x12c   :  { %v736_v16 = vadd.f32 %v732_v38, %v694_v9  ;;  %v746_v52 = vadd.f32 %v742_v56, %v704_v28  ;;  %v412_v18 = vadd.f32 %v2670_v50, %v358_v58  ;;  %v422_v42 = vadd.f32 %v2687_v36, %v368_v62  ;;  %v3456_v50 = vpop.permute.xlu2 %791  ;;  %v4181_v56 = vld [vmem:[#allocation121_spill] sm:$0xff] }
 0x12d   :  { %v565_v55 = vsel %vm3423_vm0, %v3147_v8, 0.0  ;;  %v619_v49 = vsel %vm3423_vm0, %v3268_v63, 0.0  ;;  %v486_v6 = vadd.f32 %v4180_v24, %v432_v41  ;;  %v3477_v9 = vstv %s3417_s12 }
 0x12e   :  { %v466_v36 = vadd.f32 %v2881_v43, %v412_v18  ;;  %v476_v12 = vadd.f32 %v4179_v13, %v422_v42  ;;  %v571_v53 = vmul.f32 %v3071_v37, %v565_v55  ;;  %v581_v23 = vmul.f32 %v3085_v17, %v565_v55 }
 0x12f   :  { %v591_v8 = vmul.f32 %v3088_v1, %v565_v55  ;;  %v625_v4 = vmul.f32 %v3206_v15, %v619_v49  ;;  %v635_v63 = vmul.f32 %v3216_v51, %v619_v49  ;;  %v645_v38 = vmul.f32 %v3219_v30, %v619_v49  ;;  %v754_v49 = vpop.permute.xlu0 %753 }
 0x130   :  { %v520_v35 = vadd.f32 %v516_v34, %v466_v36  ;;  %v530_v59 = vadd.f32 %v526_v22, %v476_v12  ;;  %v669_v43 = vsel %vm560_vm1, %v2953_v46, %v4181_v56  ;;  %v540_v37 = vadd.f32 %v536_v44, %v486_v6  ;;  %v756_v55 = vpop.permute.xlu1 %755 }
 0x131   :  { %v673_v17 = vsel %vm3423_vm0, %v669_v43, 0.0  ;;  %v715_v1 = vsel %vm1819_vm4, %v3383_v33, 0.0  ;;  %v3486_v22 = vstv %s3443_s13  ;;  %v3491_v42 = vstv %s3454_s14  ;;  %v4182_v43 = vld [vmem:[#allocation52_spill] sm:$0xff] }
 0x132   :  { %v575_v28 = vadd.f32 %v571_v53, %v520_v35  ;;  %v585_v27 = vadd.f32 %v581_v23, %v530_v59  ;;  %v679_v58 = vmul.f32 %v3313_v25, %v673_v17  ;;  %v689_v61 = vmul.f32 %v3316_v20, %v673_v17 }
 0x133   :  { %v595_v62 = vadd.f32 %v591_v8, %v540_v37  ;;  %v699_v46 = vmul.f32 %v3342_v7, %v673_v17  ;;  %v721_v10 = vmul.f32 %v3351_v60, %v715_v1  ;;  %v731_v11 = vmul.f32 %v3354_v26, %v715_v1  ;;  %v4183_v37 = vld [vmem:[#allocation83_spill] sm:$0xff] }
 0x134   :  { %v629_v0 = vadd.f32 %v625_v4, %v575_v28  ;;  %v639_v34 = vadd.f32 %v635_v63, %v585_v27  ;;  %v741_v33 = vmul.f32 %v3357_v57, %v715_v1  ;;  %v758_v41 = vsel %vm1819_vm4, %v3390_v45, 0.0  ;;  %v3503_v4 = vpop.permute.xlu2 %797  ;;  %v4184_v27 = vld [vmem:[#allocation53_spill] sm:$0xff] }
 0x135   :  { %v649_v18 = vadd.f32 %v645_v38, %v595_v62  ;;  %v757_v44 = vsel %vm1819_vm4, %v750_v32, 0.0  ;;  %v764_v12 = vmul.f32 %v3477_v9, %v758_v41  ;;  %v774_v53 = vmul.f32 %v3486_v22, %v758_v41  ;;  %v4187_v62 = vld [vmem:[#allocation85_spill] sm:$0xff] }
 0x136   :  { %v683_v36 = vadd.f32 %v679_v58, %v629_v0  ;;  %v693_v13 = vadd.f32 %v689_v61, %v639_v34  ;;  %v784_v24 = vmul.f32 %v3491_v42, %v758_v41  ;;  %v763_v6 = vmul.f32 %v3477_v9, %v757_v44  ;;  %v4185_v58 = vld [vmem:[#allocation84_spill] sm:$0xff] }
 0x137   :  { %v703_v23 = vadd.f32 %v699_v46, %v649_v18  ;;  %v773_v8 = vmul.f32 %v3486_v22, %v757_v44  ;;  %v3506_v32 = vadd.f32 %v764_v12, %v3431_v19  ;;  %v3508_v35 = vadd.f32 %v774_v53, %v736_v16  ;;  %v4186_v19 = vld [vmem:[#allocation54_spill] sm:$0xff]  ;;  %v4190_v53 = vld [vmem:[#allocation112_spill] sm:$0xff] }
 0x138   :  { %v725_v45 = vadd.f32 %v721_v10, %v683_v36  ;;  %v735_v63 = vadd.f32 %v731_v11, %v693_v13  ;;  %v3510_v38 = vadd.f32 %v784_v24, %v746_v52  ;;  %v783_v56 = vmul.f32 %v3491_v42, %v757_v44  ;;  %v4188_v46 = vld [vmem:[#allocation74_spill] sm:$0xff] }
 0x139   :  { %v745_v59 = vadd.f32 %v741_v33, %v703_v23  ;;  %v469_v17 = vadd.f32 %v4183_v37, %v4182_v43  ;;  %v479_v61 = vadd.f32 %v4185_v58, %v4184_v27  ;;  %v489_v16 = vadd.f32 %v4187_v62, %v4186_v19  ;;  %v4189_v33 = vld [vmem:[#allocation105_spill] sm:$0xff] }
 0x13a   :  { %v767_v1 = vadd.f32 %v763_v6, %v725_v45  ;;  %v777_v28 = vadd.f32 %v773_v8, %v735_v63  ;;  %v519_v10 = vmul.f32 %v2830_v40, %v4188_v46  ;;  %v529_v11 = vmul.f32 %v2833_v29, %v4188_v46  ;;  %v4191_v23 = vld [vmem:[#allocation113_spill] sm:$0xff]  ;;  %v4192_v6 = vld [vmem:[#allocation114_spill] sm:$0xff]  ;;  %v794_v63 = vpop.permute.xlu0 %793 }
 0x13b   :  { %v787_v52 = vadd.f32 %v783_v56, %v745_v59  ;;  %v539_v0 = vmul.f32 %v2836_v2, %v4188_v46  ;;  %v622_v34 = vsel %vm2868_vm15, %v3273_v5, 0.0  ;;  %v672_v18 = vsel %vm560_vm1, %v4189_v33, %v3293_v21 }
 0x13c   :  { %v718_v41 = vsel %vm1819_vm4, %v3439_v3, 0.0  ;;  %v3540_v40 = vstv %s3488_s15  ;;  %v523_v44 = vadd.f32 %v519_v10, %v469_v17  ;;  %v533_v29 = vadd.f32 %v529_v11, %v479_v61  ;;  %v838_v27 = vpop.permute.xlu2 %837 }
 0x13d   :  { %v543_v36 = vadd.f32 %v539_v0, %v489_v16  ;;  %v628_v2 = vmul.f32 %v3206_v15, %v622_v34  ;;  %v638_v13 = vmul.f32 %v3216_v51, %v622_v34  ;;  %v648_v5 = vmul.f32 %v3219_v30, %v622_v34  ;;  %v796_v15 = vpop.permute.xlu1 %795 }
 0x13e   :  { %v676_v12 = vsel %vm2868_vm15, %v672_v18, 0.0  ;;  %v724_v21 = vmul.f32 %v3351_v60, %v718_v41  ;;  %v578_v3 = vadd.f32 %v4190_v53, %v523_v44  ;;  %v588_v24 = vadd.f32 %v4191_v23, %v533_v29 }
 0x13f   :  { %v598_v8 = vadd.f32 %v4192_v6, %v543_v36  ;;  %v682_v45 = vmul.f32 %v3313_v25, %v676_v12  ;;  %v692_v51 = vmul.f32 %v3316_v20, %v676_v12  ;;  %v702_v30 = vmul.f32 %v3342_v7, %v676_v12 }
 0x140   :  { %v734_v59 = vmul.f32 %v3354_v26, %v718_v41  ;;  %v744_v56 = vmul.f32 %v3357_v57, %v718_v41  ;;  %v632_v60 = vadd.f32 %v628_v2, %v578_v3  ;;  %v642_v43 = vadd.f32 %v638_v13, %v588_v24 }
 0x141   :  { %v652_v37 = vadd.f32 %v648_v5, %v598_v8  ;;  %v814_v17 = vstv %s3515_s16  ;;  %v824_v58 = vstv %s3521_s17  ;;  %v799_v25 = vsel %vm1819_vm4, %v3456_v50, 0.0 }
 0x142   :  { %v760_v61 = vsel %vm1819_vm4, %v756_v55, 0.0  ;;  %v759_v20 = vsel %vm1819_vm4, %v754_v49, 0.0  ;;  %v686_v7 = vadd.f32 %v682_v45, %v632_v60  ;;  %v696_v26 = vadd.f32 %v692_v51, %v642_v43 }
 0x143   :  { %v706_v19 = vadd.f32 %v702_v30, %v652_v37  ;;  %v805_v57 = vmul.f32 %v3540_v40, %v799_v25  ;;  %v815_v62 = vmul.f32 %v814_v17, %v799_v25  ;;  %v825_v16 = vmul.f32 %v824_v58, %v799_v25 }
 0x144   :  { %v766_v46 = vmul.f32 %v3477_v9, %v760_v61  ;;  %v776_v10 = vmul.f32 %v3486_v22, %v760_v61  ;;  %v728_v50 = vadd.f32 %v724_v21, %v686_v7  ;;  %v738_v11 = vadd.f32 %v734_v59, %v696_v26  ;;  %v878_v24 = vpop.permute.xlu2 %877 }
 0x145   :  { %v748_v0 = vadd.f32 %v744_v56, %v706_v19  ;;  %v3570_v55 = vadd.f32 %v805_v57, %v767_v1  ;;  %v3574_v49 = vadd.f32 %v815_v62, %v777_v28  ;;  %v3576_v34 = vadd.f32 %v825_v16, %v787_v52  ;;  %v836_v12 = vpop.permute.xlu1 %835 }
 0x146   :  { %v786_v33 = vmul.f32 %v3491_v42, %v760_v61  ;;  %v765_v18 = vmul.f32 %v3477_v9, %v759_v20  ;;  %v770_v41 = vadd.f32 %v766_v46, %v728_v50  ;;  %v780_v44 = vadd.f32 %v776_v10, %v738_v11 }
 0x147   :  { %v775_v29 = vmul.f32 %v3486_v22, %v759_v20  ;;  %v785_v36 = vmul.f32 %v3491_v42, %v759_v20  ;;  %v802_v28 = vsel %vm1819_vm4, %v3503_v4, 0.0  ;;  %v801_v52 = vsel %vm1819_vm4, %v796_v15, 0.0  ;;  %v834_v42 = vpop.permute.xlu0 %833 }
 0x148   :  { %v790_v1 = vadd.f32 %v786_v33, %v748_v0  ;;  %v769_v2 = vadd.f32 %v765_v18, %v3399_v48  ;;  %v808_v5 = vmul.f32 %v3540_v40, %v802_v28  ;;  %v818_v22 = vmul.f32 %v814_v17, %v802_v28 }
 0x149   :  { %v779_v9 = vadd.f32 %v775_v29, %v3406_v31  ;;  %v789_v13 = vadd.f32 %v785_v36, %v3408_v39  ;;  %v828_v21 = vmul.f32 %v824_v58, %v802_v28  ;;  %v807_v48 = vmul.f32 %v3540_v40, %v801_v52 }
 0x14a   :  { %v817_v53 = vmul.f32 %v814_v17, %v801_v52  ;;  %v827_v3 = vmul.f32 %v824_v58, %v801_v52  ;;  %v3596_v4 = vadd.f32 %v808_v5, %v770_v41  ;;  %v3598_v23 = vadd.f32 %v818_v22, %v780_v44 }
 0x14b   :  { %v800_v31 = vsel %vm1819_vm4, %v794_v63, 0.0  ;;  %v3603_v39 = vstv %s3566_s18  ;;  %v3607_v6 = vadd.f32 %v828_v21, %v790_v1  ;;  %v811_v8 = vadd.f32 %v807_v48, %v769_v2 }
 0x14c   :  { %v821_v45 = vadd.f32 %v817_v53, %v779_v9  ;;  %v831_v15 = vadd.f32 %v827_v3, %v789_v13  ;;  %v806_v51 = vmul.f32 %v3540_v40, %v800_v31  ;;  %v816_v30 = vmul.f32 %v814_v17, %v800_v31  ;;  %v918_v2 = vpop.permute.xlu2 %917 }
 0x14d   :  { %v826_v59 = vmul.f32 %v824_v58, %v800_v31  ;;  %v856_v56 = vstv %s3572_s19  ;;  %v866_v63 = vstv %s3580_s22  ;;  %v843_v60 = vsel %vm2868_vm15, %v838_v27, 0.0  ;;  %v876_v0 = vpop.permute.xlu1 %875 }
 0x14e   :  { %v842_v43 = vsel %vm2868_vm15, %v836_v12, 0.0  ;;  %v841_v37 = vsel %vm2868_vm15, %v834_v42, 0.0  ;;  %v810_v25 = vadd.f32 %v806_v51, %v3506_v32  ;;  %v820_v40 = vadd.f32 %v816_v30, %v3508_v35 }
 0x14f   :  { %v830_v17 = vadd.f32 %v826_v59, %v3510_v38  ;;  %v849_v58 = vmul.f32 %v3603_v39, %v843_v60  ;;  %v859_v61 = vmul.f32 %v856_v56, %v843_v60  ;;  %v869_v20 = vmul.f32 %v866_v63, %v843_v60  ;;  %v840_v33 = vpop.permute.xlu0 %839 }
 0x150   :  { %v848_v27 = vmul.f32 %v3603_v39, %v842_v43  ;;  %v858_v7 = vmul.f32 %v856_v56, %v842_v43  ;;  %v868_v19 = vmul.f32 %v866_v63, %v842_v43  ;;  %v847_v57 = vmul.f32 %v3603_v39, %v841_v37 }
 0x151   :  { %v3631_v26 = vadd.f32 %v849_v58, %v811_v8  ;;  %v857_v32 = vmul.f32 %v856_v56, %v841_v37  ;;  %v3636_v35 = vadd.f32 %v859_v61, %v821_v45  ;;  %v3638_v38 = vadd.f32 %v869_v20, %v831_v15  ;;  %v4196_v58 = vld [vmem:[#allocation45_spill] sm:$0xff]  ;;  %v4197_v61 = vld [vmem:[#allocation24_spill] sm:$0xff] }
 0x152   :  { %v852_v62 = vadd.f32 %v848_v27, %v810_v25  ;;  %v862_v16 = vadd.f32 %v858_v7, %v820_v40  ;;  %v872_v46 = vadd.f32 %v868_v19, %v830_v17  ;;  %v851_v10 = vadd.f32 %v847_v57, %v3570_v55  ;;  %v4193_v25 = vld [vmem:[#allocation17_spill] sm:$0xff]  ;;  %v4194_v40 = vld [vmem:[#allocation22_spill] sm:$0xff] }
 0x153   :  { %v861_v50 = vadd.f32 %v857_v32, %v3574_v49  ;;  %v867_v11 = vmul.f32 %v866_v63, %v841_v37  ;;  %v3647_v18 = vstv %s3594_s23  ;;  %v3650_v41 = vstv %s3605_s24  ;;  %v4198_v27 = vld [vmem:[#allocation25_spill] sm:$0xff] }
 0x154   :  { %v3653_v44 = vstv %s3609_s0  ;;  %v884_v29 = vsel %vm2868_vm15, %v878_v24, 0.0  ;;  %v883_v28 = vsel %vm2868_vm15, %v876_v0, 0.0  ;;  %v844_v52 = vsel %vm2868_vm15, %v840_v33, 0.0  ;;  %v4200_v0 = vld [vmem:[#allocation29_spill] sm:$0xff] }
 0x155   :  { %v871_v55 = vadd.f32 %v867_v11, %v3576_v34  ;;  %v890_v49 = vmul.f32 %v3647_v18, %v884_v29  ;;  %v900_v36 = vmul.f32 %v3650_v41, %v884_v29  ;;  %v910_v1 = vmul.f32 %v3653_v44, %v884_v29  ;;  %v882_v19 = vpop.permute.xlu1 %881 }
 0x156   :  { %v3666_v9 = vstv %s3613_s25  ;;  %v3669_v13 = vstv %s3622_s1  ;;  %v889_v12 = vmul.f32 %v3647_v18, %v883_v28  ;;  %v899_v42 = vmul.f32 %v3650_v41, %v883_v28 }
 0x157   :  { %v3671_v34 = vadd.f32 %v890_v49, %v852_v62  ;;  %v3673_v5 = vadd.f32 %v900_v36, %v862_v16  ;;  %v3675_v22 = vadd.f32 %v910_v1, %v872_v46  ;;  %v909_v21 = vmul.f32 %v3653_v44, %v883_v28  ;;  %v880_v29 = vpop.permute.xlu0 %879  ;;  %v4201_v36 = vld [vmem:[#allocation30_spill] sm:$0xff] }
 0x158   :  { %v850_v48 = vmul.f32 %v3603_v39, %v844_v52  ;;  %v860_v53 = vmul.f32 %v856_v56, %v844_v52  ;;  %v893_v3 = vadd.f32 %v889_v12, %v851_v10  ;;  %v870_v31 = vmul.f32 %v866_v63, %v844_v52 }
 0x159   :  { %v3682_v24 = vstv %s3634_s26  ;;  %v3685_v8 = vstv %s3629_s2  ;;  %v903_v45 = vadd.f32 %v899_v42, %v861_v50  ;;  %v913_v15 = vadd.f32 %v909_v21, %v871_v55  ;;  %v4199_v50 = vld [vmem:[#allocation28_spill] sm:$0xff]  ;;  %v924_v55 = vpop.permute.xlu2 %923 }
 0x15a   :  { %v854_v51 = vadd.f32 %v850_v48, %v3596_v4  ;;  %v864_v30 = vadd.f32 %v860_v53, %v3598_v23  ;;  %v874_v59 = vadd.f32 %v870_v31, %v3607_v6  ;;  %v3691_v60 = vstv %s3640_s27  ;;  %v4195_v6 = vld [vmem:[#allocation16_spill] sm:$0xff] }
 0x15b   :  { %v3694_v43 = vstv %s3644_s28  ;;  %v925_v39 = vsel %vm2868_vm15, %v918_v2, 0.0  ;;  %v969_v4 = vsel %vm968_vm3, %v4194_v40, %v4193_v25  ;;  %v1019_v17 = vsel %vm1819_vm4, %v4195_v6, 0.0  ;;  %v4202_v2 = vld [vmem:[#allocation26_spill] sm:$0xff] }
 0x15c   :  { %v931_v56 = vmul.f32 %v3666_v9, %v925_v39  ;;  %v941_v63 = vmul.f32 %v3669_v13, %v925_v39  ;;  %v951_v37 = vmul.f32 %v3682_v24, %v925_v39  ;;  %v973_v23 = vsel %vm1819_vm4, %v969_v4, 0.0 }
 0x15d   :  { %v1071_v20 = vmul.f32 %v4197_v61, %v4196_v58  ;;  %v1081_v7 = vmul.f32 %v4198_v27, %v4196_v58  ;;  %v979_v16 = vmul.f32 %v3685_v8, %v973_v23  ;;  %v989_v46 = vmul.f32 %v3691_v60, %v973_v23  ;;  %v4203_v61 = vld [vmem:[#allocation23_spill] sm:$0xff] }
 0x15e   :  { %v935_v57 = vadd.f32 %v931_v56, %v893_v3  ;;  %v945_v32 = vadd.f32 %v941_v63, %v903_v45  ;;  %v955_v62 = vadd.f32 %v951_v37, %v913_v15  ;;  %v999_v10 = vmul.f32 %v3694_v43, %v973_v23 }
 0x15f   :  { %v1025_v11 = vmul.f32 %v4199_v50, %v1019_v17  ;;  %v1035_v33 = vmul.f32 %v4200_v0, %v1019_v17  ;;  %v1045_v1 = vmul.f32 %v4201_v36, %v1019_v17  ;;  %v1091_v28 = vmul.f32 %v4202_v2, %v4196_v58 }
 0x160   :  { %v983_v49 = vadd.f32 %v979_v16, %v935_v57  ;;  %v886_v52 = vsel %vm2868_vm15, %v882_v19, 0.0  ;;  %v993_v12 = vadd.f32 %v989_v46, %v945_v32  ;;  %v1003_v42 = vadd.f32 %v999_v10, %v955_v62  ;;  %v922_v32 = vpop.permute.xlu1 %921  ;;  %v4206_v62 = vld [vmem:[#allocation64_spill] sm:$0xff]  ;;  %v4207_v10 = vld [vmem:[#allocation18_spill] sm:$0xff] }
 0x161   :  { %v892_v21 = vmul.f32 %v3647_v18, %v886_v52  ;;  %v902_v48 = vmul.f32 %v3650_v41, %v886_v52  ;;  %v912_v3 = vmul.f32 %v3653_v44, %v886_v52  ;;  %v885_v31 = vsel %vm2868_vm15, %v880_v29, 0.0 }
 0x162   :  { %v1029_v53 = vadd.f32 %v1025_v11, %v983_v49  ;;  %v928_v45 = vsel %vm2868_vm15, %v924_v55, 0.0  ;;  %v1039_v15 = vadd.f32 %v1035_v33, %v993_v12  ;;  %v1049_v39 = vadd.f32 %v1045_v1, %v1003_v42  ;;  %v4208_v11 = vld [vmem:[#allocation65_spill] sm:$0xff]  ;;  %v4209_v33 = vld [vmem:[#allocation66_spill] sm:$0xff] }
 0x163   :  { %v896_v56 = vadd.f32 %v892_v21, %v854_v51  ;;  %v906_v63 = vadd.f32 %v902_v48, %v864_v30  ;;  %v916_v25 = vadd.f32 %v912_v3, %v874_v59  ;;  %v891_v40 = vmul.f32 %v3647_v18, %v885_v31  ;;  %v4204_v30 = vld [vmem:[#allocation62_spill] sm:$0xff]  ;;  %v4210_v49 = vld [vmem:[#allocation93_spill] sm:$0xff] }
 0x164   :  { %v1075_v37 = vadd.f32 %v1071_v20, %v1029_v53  ;;  %v901_v4 = vmul.f32 %v3650_v41, %v885_v31  ;;  %v1085_v23 = vadd.f32 %v1081_v7, %v1039_v15  ;;  %v1095_v6 = vadd.f32 %v1091_v28, %v1049_v39  ;;  %v4205_v20 = vld [vmem:[#allocation63_spill] sm:$0xff]  ;;  %v4211_v12 = vld [vmem:[#allocation94_spill] sm:$0xff]  ;;  %v4212_v21 = vld [vmem:[#allocation97_spill] sm:$0xff] }
 0x165   :  { %v911_v17 = vmul.f32 %v3653_v44, %v885_v31  ;;  %v934_v58 = vmul.f32 %v3666_v9, %v928_v45  ;;  %v895_v19 = vadd.f32 %v891_v40, %v3631_v26  ;;  %v944_v51 = vmul.f32 %v3669_v13, %v928_v45  ;;  %v4213_v31 = vld [vmem:[#allocation101_spill] sm:$0xff]  ;;  %v4214_v39 = vld [vmem:[#allocation20_spill] sm:$0xff] }
 0x166   :  { %v1121_v27 = vadd.f32 %v4203_v61, %v1075_v37  ;;  %v905_v57 = vadd.f32 %v901_v4, %v3636_v35  ;;  %v1131_v59 = vadd.f32 %v4204_v30, %v1085_v23  ;;  %v1141_v18 = vadd.f32 %v4205_v20, %v1095_v6  ;;  %v4215_v37 = vld [vmem:[#allocation103_spill] sm:$0xff]  ;;  %v4216_v40 = vld [vmem:[#allocation104_spill] sm:$0xff]  ;;  %v4217_v23 = vld [vmem:[#allocation14_spill] sm:$0xff] }
 0x167   :  { %v915_v41 = vadd.f32 %v911_v17, %v3638_v38  ;;  %v938_v7 = vadd.f32 %v934_v58, %v896_v56  ;;  %v948_v16 = vadd.f32 %v944_v51, %v906_v63  ;;  %v954_v46 = vmul.f32 %v3682_v24, %v928_v45  ;;  %v4218_v58 = vld [vmem:[#allocation107_spill] sm:$0xff]  ;;  %v4220_v30 = vld [vmem:[#allocation34_spill] sm:$0xff] }
 0x168   :  { %v1167_v44 = vadd.f32 %v4206_v62, %v1121_v27  ;;  %v982_v26 = vmul.f32 %v3685_v8, %v4207_v10  ;;  %v1177_v35 = vadd.f32 %v4208_v11, %v1131_v59  ;;  %v1187_v29 = vadd.f32 %v4209_v33, %v1141_v18  ;;  %v4219_v27 = vld [vmem:[#allocation15_spill] sm:$0xff]  ;;  %v4221_v18 = vld [vmem:[#allocation110_spill] sm:$0xff]  ;;  %v4225_v11 = vld [vmem:[#allocation36_spill] sm:$0xff] }
 0x169   :  { %v992_v55 = vmul.f32 %v3691_v60, %v4207_v10  ;;  %v1002_v38 = vmul.f32 %v3694_v43, %v4207_v10  ;;  %v958_v2 = vadd.f32 %v954_v46, %v916_v25  ;;  %v927_v52 = vsel %vm2868_vm15, %v922_v32, 0.0  ;;  %v4222_v32 = vld [vmem:[#allocation111_spill] sm:$0xff]  ;;  %v4224_v10 = vld [vmem:[#allocation134_spill] sm:$0xff] }
 0x16a   :  { %v1213_v1 = vadd.f32 %v4210_v49, %v1167_v44  ;;  %v986_v28 = vadd.f32 %v982_v26, %v938_v7  ;;  %v1223_v42 = vadd.f32 %v4211_v12, %v1177_v35  ;;  %v1233_v48 = vadd.f32 %v4212_v21, %v1187_v29  ;;  %v4223_v44 = vld [vmem:[#allocation35_spill] sm:$0xff]  ;;  %v4227_v29 = vld [vmem:[#allocation38_spill] sm:$0xff] }
 0x16b   :  { %v996_v53 = vadd.f32 %v992_v55, %v948_v16  ;;  %v933_v3 = vmul.f32 %v3666_v9, %v927_v52  ;;  %v1006_v15 = vadd.f32 %v1002_v38, %v958_v2  ;;  %v943_v63 = vmul.f32 %v3669_v13, %v927_v52  ;;  %v4228_v55 = vld [vmem:[#allocation21_spill] sm:$0xff] }
 0x16c   :  { %v1260_v45 = vadd.f32 %v4213_v31, %v1213_v1  ;;  %v1032_v56 = vadd.f32 %v4214_v39, %v986_v28  ;;  %v1270_v25 = vadd.f32 %v4215_v37, %v1223_v42  ;;  %v1280_v4 = vadd.f32 %v4216_v40, %v1233_v48  ;;  %v4230_v1 = vld [vmem:[#allocation136_spill] sm:$0xff]  ;;  %v4231_v28 = vld [vmem:[#allocation67_spill] sm:$0xff]  ;;  %v4233_v48 = vld [vmem:[#allocation77_spill] sm:$0xff]  ;;  %v920_v37 = vpop.permute.xlu0 %919 }
 0x16d   :  { %v1042_v6 = vadd.f32 %v4217_v23, %v996_v53  ;;  %v937_v17 = vadd.f32 %v933_v3, %v895_v19  ;;  %v1052_v51 = vadd.f32 %v4219_v27, %v1006_v15  ;;  %v947_v20 = vadd.f32 %v943_v63, %v905_v57  ;;  %v4226_v19 = vld [vmem:[#allocation27_spill] sm:$0xff] }
 0x16e   :  { %v1306_v61 = vadd.f32 %v4218_v58, %v1260_v45  ;;  %v1078_v59 = vadd.f32 %v4220_v30, %v1032_v56  ;;  %v1316_v7 = vadd.f32 %v4221_v18, %v1270_v25  ;;  %v1326_v62 = vadd.f32 %v4222_v32, %v1280_v4  ;;  %v4229_v57 = vld [vmem:[#allocation135_spill] sm:$0xff]  ;;  %v4235_v45 = vld [vmem:[#allocation48_spill] sm:$0xff]  ;;  %v4238_v4 = vld [vmem:[#allocation73_spill] sm:$0xff] }
 0x16f   :  { %v1088_v16 = vadd.f32 %v4223_v44, %v1042_v6  ;;  %v953_v46 = vmul.f32 %v3682_v24, %v927_v52  ;;  %v1098_v35 = vadd.f32 %v4225_v11, %v1052_v51  ;;  %v971_v38 = vsel %vm968_vm3, %v4228_v55, %v4227_v29  ;;  %v4232_v52 = vld [vmem:[#allocation70_spill] sm:$0xff]  ;;  %v4234_v31 = vld [vmem:[#allocation47_spill] sm:$0xff]  ;;  %v4237_v25 = vld [vmem:[#allocation80_spill] sm:$0xff] }
 0x170   :  { %v1352_v26 = vadd.f32 %v4224_v10, %v1306_v61  ;;  %v1124_v33 = vadd.f32 %v4226_v19, %v1078_v59  ;;  %v1362_v49 = vadd.f32 %v4229_v57, %v1316_v7  ;;  %v1372_v2 = vadd.f32 %v4230_v1, %v1326_v62  ;;  %v4239_v6 = vld [vmem:[#allocation50_spill] sm:$0xff]  ;;  %v4240_v61 = vld [vmem:[#allocation51_spill] sm:$0xff]  ;;  %v4242_v32 = vld [vmem:[#allocation76_spill] sm:$0xff] }
 0x171   :  { %v1134_v12 = vadd.f32 %v4231_v28, %v1088_v16  ;;  %v957_v42 = vadd.f32 %v953_v46, %v915_v41  ;;  %v1144_v21 = vadd.f32 %v4232_v52, %v1098_v35  ;;  %v975_v3 = vsel %vm1819_vm4, %v971_v38, 0.0  ;;  %v4241_v51 = vld [vmem:[#allocation75_spill] sm:$0xff]  ;;  %v4243_v44 = vld [vmem:[#allocation116_spill] sm:$0xff]  ;;  %v4245_v11 = vld [vmem:[#allocation118_spill] sm:$0xff] }
 0x172   :  { %1376 = vst [vmem:[#allocation9] sm:$0xff] %v1352_v26  ;;  %v1170_v53 = vadd.f32 %v4233_v48, %v1124_v33  ;;  %v1119_v15 = vmul.f32 %v4235_v45, %v4234_v31  ;;  %v981_v56 = vmul.f32 %v3685_v8, %v975_v3  ;;  %v991_v63 = vmul.f32 %v3691_v60, %v975_v3  ;;  %v4244_v10 = vld [vmem:[#allocation19_spill] sm:$0xff]  ;;  %v4247_v29 = vld [vmem:[#allocation40_spill] sm:$0xff]  ;;  %v4248_v38 = vld [vmem:[#allocation41_spill] sm:$0xff] }
 0x173   :  { %1381 = vst [vmem:[#allocation9 + $0x20] sm:$0xff] %v1362_v49  ;;  %v1180_v39 = vadd.f32 %v4236_v14, %v1134_v12  ;;  %v1001_v41 = vmul.f32 %v3694_v43, %v975_v3  ;;  %v1190_v40 = vadd.f32 %v4237_v25, %v1144_v21  ;;  %v1129_v58 = vmul.f32 %v4239_v6, %v4234_v31  ;;  %v4246_v19 = vld [vmem:[#allocation39_spill] sm:$0xff]  ;;  %v4251_v12 = vld [vmem:[#allocation128_spill] sm:$0xff]  ;;  %v4252_v52 = vld [vmem:[#allocation42_spill] sm:$0xff] }
 0x174   :  { %1386 = vst [vmem:[#allocation9 + $0x40] sm:$0xff] %v1372_v2  ;;  %v1216_v23 = vadd.f32 %v4238_v4, %v1170_v53  ;;  %v1139_v27 = vmul.f32 %v4240_v61, %v4234_v31  ;;  %v985_v59 = vadd.f32 %v981_v56, %v937_v17  ;;  %v995_v18 = vadd.f32 %v991_v63, %v947_v20  ;;  %v4249_v20 = vld [vmem:[#allocation120_spill] sm:$0xff]  ;;  %v4250_v49 = vld [vmem:[#allocation127_spill] sm:$0xff]  ;;  %v4255_v31 = vld [vmem:[#allocation129_spill] sm:$0xff] }
 0x175   :  { %v1226_v30 = vadd.f32 %v4241_v51, %v1180_v39  ;;  %v1005_v7 = vadd.f32 %v1001_v41, %v957_v42  ;;  %v1236_v62 = vadd.f32 %v4242_v32, %v1190_v40  ;;  %v926_v46 = vsel %vm2868_vm15, %v920_v37, 0.0  ;;  %v4253_v21 = vld [vmem:[#allocation43_spill] sm:$0xff]  ;;  %v4254_v53 = vld [vmem:[#allocation44_spill] sm:$0xff]  ;;  %v4258_v40 = vld [vmem:[#allocation126_spill] sm:$0xff] }
 0x176   :  { %v1263_v16 = vadd.f32 %v4243_v44, %v1216_v23  ;;  %v980_v26 = vmul.f32 %v3685_v8, %v4244_v10  ;;  %v1031_v33 = vadd.f32 %v4246_v19, %v985_v59  ;;  %v1041_v55 = vadd.f32 %v4247_v29, %v995_v18  ;;  %v4256_v14 = vld [vmem:[#allocation123_spill] sm:$0xff]  ;;  %v4257_v41 = vld [vmem:[#allocation124_spill] sm:$0xff]  ;;  %v4259_v51 = vld [vmem:[#allocation125_spill] sm:$0xff] }
 0x177   :  { %v1273_v35 = vadd.f32 %v4245_v11, %v1226_v30  ;;  %v1051_v17 = vadd.f32 %v4248_v38, %v1005_v7  ;;  %v1283_v57 = vadd.f32 %v4249_v20, %v1236_v62  ;;  %v932_v2 = vmul.f32 %v3666_v9, %v926_v46  ;;  %v4261_v59 = vld [vmem:[#allocation87_spill] sm:$0xff]  ;;  %v4263_v32 = vld [vmem:[#allocation37_spill] sm:$0xff]  ;;  %v4264_v62 = vld [vmem:[#allocation90_spill] sm:$0xff] }
 0x178   :  { %v1309_v1 = vadd.f32 %v4250_v49, %v1263_v16  ;;  %v942_v28 = vmul.f32 %v3669_v13, %v926_v46  ;;  %v1077_v8 = vadd.f32 %v4252_v52, %v1031_v33  ;;  %v1087_v48 = vadd.f32 %v4253_v21, %v1041_v55  ;;  %v4265_v16 = vld [vmem:[#allocation91_spill] sm:$0xff]  ;;  %v4267_v19 = vld [vmem:[#allocation106_spill] sm:$0xff]  ;;  %v4269_v38 = vld [vmem:[#allocation117_spill] sm:$0xff] }
 0x179   :  { %v1319_v42 = vadd.f32 %v4251_v12, %v1273_v35  ;;  %v1097_v3 = vadd.f32 %v4254_v53, %v1051_v17  ;;  %v1329_v45 = vadd.f32 %v4255_v31, %v1283_v57  ;;  %v936_v56 = vadd.f32 %v932_v2, %v3671_v34  ;;  %v4270_v17 = vld [vmem:[#allocation119_spill] sm:$0xff]  ;;  %v4271_v49 = vld [vmem:[#allocation108_spill] sm:$0xff]  ;;  %v4272_v2 = vld [vmem:[#allocation109_spill] sm:$0xff] }
 0x17a   :  { %v1355_v39 = vadd.f32 %v4256_v14, %v1309_v1  ;;  %v946_v63 = vadd.f32 %v942_v28, %v3673_v5  ;;  %v1123_v37 = vadd.f32 %v1119_v15, %v1077_v8  ;;  %v1133_v13 = vadd.f32 %v1129_v58, %v1087_v48  ;;  %v4260_v5 = vld [vmem:[#allocation86_spill] sm:$0xff]  ;;  %v4262_v58 = vld [vmem:[#allocation89_spill] sm:$0xff]  ;;  %v4274_v8 = vld [vmem:[#allocation131_spill] sm:$0xff] }
 0x17b   :  { %v1365_v9 = vadd.f32 %v4257_v41, %v1319_v42  ;;  %v1143_v25 = vadd.f32 %v1139_v27, %v1097_v3  ;;  %v1375_v4 = vadd.f32 %v4258_v40, %v1329_v45  ;;  %v952_v23 = vmul.f32 %v3682_v24, %v926_v46  ;;  %v4273_v42 = vld [vmem:[#allocation130_spill] sm:$0xff]  ;;  %v4277_v3 = vld [vmem:[#allocation68_spill] sm:$0xff]  ;;  %v4278_v31 = vld [vmem:[#allocation57_spill] sm:$0xff] }
 0x17c   :  { %1379 = vst [vmem:[#allocation9 + $0x18] sm:$0xff] %v1355_v39  ;;  %v984_v6 = vadd.f32 %v980_v26, %v936_v56  ;;  %v990_v61 = vmul.f32 %v3691_v60, %v4244_v10  ;;  %v1344_v34 = vsel %vm2868_vm15, %v4259_v51, 0.0  ;;  %v1169_v30 = vadd.f32 %v4260_v5, %v1123_v37  ;;  %v4266_v26 = vld [vmem:[#allocation92_spill] sm:$0xff]  ;;  %v4279_v14 = vld [vmem:[#allocation58_spill] sm:$0xff]  ;;  %v4280_v56 = vld [vmem:[#allocation49_spill] sm:$0xff] }
 0x17d   :  { %1384 = vst [vmem:[#allocation9 + $0x38] sm:$0xff] %v1365_v9  ;;  %v1179_v15 = vadd.f32 %v4261_v59, %v1133_v13  ;;  %v1189_v27 = vadd.f32 %v4262_v58, %v1143_v25  ;;  %v956_v18 = vadd.f32 %v952_v23, %v3675_v22  ;;  %v1000_v24 = vmul.f32 %v3694_v43, %v4244_v10  ;;  %v4268_v43 = vld [vmem:[#allocation115_spill] sm:$0xff]  ;;  %v4282_v40 = vld [vmem:[#allocation56_spill] sm:$0xff]  ;;  %v4283_v23 = vld [vmem:[#allocation61_spill] sm:$0xff] }
 0x17e   :  { %1389 = vst [vmem:[#allocation9 + $0x58] sm:$0xff] %v1375_v4  ;;  %v994_v7 = vadd.f32 %v990_v61, %v946_v63  ;;  %v1020_v60 = vsel %vm1819_vm4, %v4263_v32, 0.0  ;;  %v1215_v44 = vadd.f32 %v4264_v62, %v1169_v30  ;;  %v1350_v33 = vmul.f32 %v4267_v19, %v1344_v34  ;;  %v4281_v41 = vld [vmem:[#allocation55_spill] sm:$0xff]  ;;  %v4284_v61 = vld [vmem:[#allocation88_spill] sm:$0xff]  ;;  %v4288_v58 = vld [vmem:[#allocation69_spill] sm:$0xff] }
 0x17f   :  { %v1225_v46 = vadd.f32 %v4265_v16, %v1179_v15  ;;  %v1235_v11 = vadd.f32 %v4266_v26, %v1189_v27  ;;  %v1026_v35 = vmul.f32 %v4199_v50, %v1020_v60  ;;  %v1004_v29 = vadd.f32 %v1000_v24, %v956_v18  ;;  %v4286_v30 = vld [vmem:[#allocation60_spill] sm:$0xff]  ;;  %v4287_v15 = vld [vmem:[#allocation79_spill] sm:$0xff]  ;;  %v4291_v62 = vld [vmem:[#allocation122_spill] sm:$0xff] }
 0x180   :  { %v1036_v22 = vmul.f32 %v4200_v0, %v1020_v60  ;;  %v1046_v55 = vmul.f32 %v4201_v36, %v1020_v60  ;;  %v1262_v10 = vadd.f32 %v4268_v43, %v1215_v44  ;;  %v1360_v1 = vmul.f32 %v4271_v49, %v1344_v34  ;;  %v4275_v0 = vld [vmem:[#allocation132_spill] sm:$0xff]  ;;  %v4276_v36 = vld [vmem:[#allocation46_spill] sm:$0xff]  ;;  %v4289_v18 = vld [vmem:[#allocation71_spill] sm:$0xff] }
 0x181   :  { %v1272_v54 = vadd.f32 %v4269_v38, %v1225_v46  ;;  %v1282_v20 = vadd.f32 %v4270_v17, %v1235_v11  ;;  %v1030_v57 = vadd.f32 %v1026_v35, %v984_v6  ;;  %v1370_v28 = vmul.f32 %v4272_v2, %v1344_v34  ;;  %v4285_v34 = vld [vmem:[#allocation59_spill] sm:$0xff]  ;;  %v4290_v32 = vld [vmem:[#allocation72_spill] sm:$0xff]  ;;  %v4295_v43 = vld [vmem:[#allocation133_spill] sm:$0xff] }
 0x182   :  { %v1040_v12 = vadd.f32 %v1036_v22, %v994_v7  ;;  %v1050_v50 = vadd.f32 %v1046_v55, %v1004_v29  ;;  %v1308_v52 = vadd.f32 %v4273_v42, %v1262_v10  ;;  %v1164_v45 = vmul.f32 %v4278_v31, %v4277_v3  ;;  %v4292_v26 = vld [vmem:[#allocation95_spill] sm:$0xff]  ;;  %v4293_v35 = vld [vmem:[#allocation96_spill] sm:$0xff]  ;;  %v4294_v22 = vld [vmem:[#allocation98_spill] sm:$0xff] }
 0x183   :  { %v1318_v21 = vadd.f32 %v4274_v8, %v1272_v54  ;;  %v1328_v48 = vadd.f32 %v4275_v0, %v1282_v20  ;;  %v1076_v53 = vadd.f32 %v4276_v36, %v1030_v57  ;;  %v1174_v39 = vmul.f32 %v4279_v14, %v4277_v3  ;;  %v4296_v17 = vld [vmem:[#allocation99_spill] sm:$0xff] }
 0x184   :  { %v1086_v63 = vadd.f32 %v4280_v56, %v1040_v12  ;;  %v1096_v9 = vadd.f32 %v4281_v41, %v1050_v50  ;;  %v1354_v37 = vadd.f32 %v1350_v33, %v1308_v52  ;;  %v1184_v6 = vmul.f32 %v4283_v23, %v4277_v3  ;;  %v4298_v12 = vld [vmem:[#allocation102_spill] sm:$0xff] }
 0x185   :  { %v1364_v13 = vadd.f32 %v1360_v1, %v1318_v21  ;;  %v1374_v25 = vadd.f32 %v1370_v28, %v1328_v48  ;;  %v1122_v4 = vadd.f32 %v4282_v40, %v1076_v53  ;;  %v1251_v51 = vsel %vm2868_vm15, %v4284_v61, 0.0  ;;  %v4297_v1 = vld [vmem:[#allocation100_spill] sm:$0xff] }
 0x186   :  { %v1132_v5 = vadd.f32 %v4285_v34, %v1086_v63  ;;  %v1142_v59 = vadd.f32 %v4286_v30, %v1096_v9  ;;  %v1210_v27 = vmul.f32 %v4288_v58, %v4287_v15  ;;  %v1220_v7 = vmul.f32 %v4289_v18, %v4287_v15  ;;  %1378 = vst [vmem:[#allocation9 + $0x10] sm:$0xff] %v1354_v37 }
 0x187   :  { %v1168_v24 = vadd.f32 %v1164_v45, %v1122_v4  ;;  %v1230_v60 = vmul.f32 %v4290_v32, %v4287_v15  ;;  %v1297_v44 = vsel %vm2868_vm15, %v4291_v62, 0.0  ;;  %1383 = vst [vmem:[#allocation9 + $0x30] sm:$0xff] %v1364_v13  ;;  %v1257_v11 = vmul.f32 %v4292_v26, %v1251_v51 }
 0x188   :  { %v1178_v16 = vadd.f32 %v1174_v39, %v1132_v5  ;;  %v1188_v46 = vadd.f32 %v1184_v6, %v1142_v59  ;;  %v1267_v33 = vmul.f32 %v4293_v35, %v1251_v51  ;;  %1388 = vst [vmem:[#allocation9 + $0x50] sm:$0xff] %v1374_v25  ;;  %v1277_v55 = vmul.f32 %v4294_v22, %v1251_v51 }
 0x189   :  { %v1214_v29 = vadd.f32 %v1210_v27, %v1168_v24  ;;  %v1343_v10 = vsel %vm2868_vm15, %v4295_v43, 0.0  ;;  %v1303_v20 = vmul.f32 %v4296_v17, %v1297_v44  ;;  %v1313_v28 = vmul.f32 %v4297_v1, %v1297_v44 }
 0x18a   :  { %v1224_v38 = vadd.f32 %v1220_v7, %v1178_v16  ;;  %v1234_v54 = vadd.f32 %v1230_v60, %v1188_v46  ;;  %v1323_v50 = vmul.f32 %v4298_v12, %v1297_v44  ;;  %v1349_v8 = vmul.f32 %v4267_v19, %v1343_v10 }
 0x18b   :  { %v1261_v57 = vadd.f32 %v1257_v11, %v1214_v29  ;;  %v1359_v0 = vmul.f32 %v4271_v49, %v1343_v10  ;;  %v1369_v48 = vmul.f32 %v4272_v2, %v1343_v10 }
 0x18c   :  { %v1271_v42 = vadd.f32 %v1267_v33, %v1224_v38  ;;  %v1281_v52 = vadd.f32 %v1277_v55, %v1234_v54 }
 0x18d   :  { %v1307_v21 = vadd.f32 %v1303_v20, %v1261_v57 }
 0x18e   :  { %v1317_v47 = vadd.f32 %v1313_v28, %v1271_v42  ;;  %v1327_v36 = vadd.f32 %v1323_v50, %v1281_v52 }
 0x18f   :  { %v1353_v53 = vadd.f32 %v1349_v8, %v1307_v21 }
 0x190   :  { %v1363_v3 = vadd.f32 %v1359_v0, %v1317_v47  ;;  %v1373_v31 = vadd.f32 %v1369_v48, %v1327_v36 }
 0x191   :  { %1377 = vst [vmem:[#allocation9 + $0x8] sm:$0xff] %v1353_v53 }
 0x192   :  { %1382 = vst [vmem:[#allocation9 + $0x28] sm:$0xff] %v1363_v3 }
 0x193   :  { %1387 = vst [vmem:[#allocation9 + $0x48] sm:$0xff] %v1373_v31 }
 0x194   :  { %1402 = dma.vmem_to_hbm [thread:$0]  %s1395_s30, 1536, %s1397_s6, [#allocation4], %s1585_s20, %s1585_s20, %s1586_s21  }
 0x195   :  { %1582 = dma.done.wait [#allocation4], 1536  }
 0x196   :  { %1583 = vsyncadd [#allocation4], 4294965760 }
 0x197   :  { %1407 = vsyncpa [#allocation3], 1 }
 0x198   :  { %1408 = vsyncpa [#allocation4], 1 }
 0x199   :  { %1409 = vsyncpa [#allocation5], 1 }
 0x19a   :  { %1410 = vsyncpa [#allocation6], 1 }

</bundles_post_ra>
